<compile_context>
chip_gen: v7x
topology: tpu7x:2x2x1
jax: 0.10.0
libtpu: 0.0.40
codegen_flags: <defaults>
</compile_context>

<pallas_src>
import functools
import math

import jax
import jax.numpy as jnp
from jax.experimental import pallas as pl
from jax.experimental.pallas import tpu as pltpu


_MAX_TIME_CHUNK = 32      # timesteps per grid step
_LAYER_UNROLL = 8         # fori_loop unroll, single-layer kernel
_DILATED_UNROLL = 4       # fori_loop unroll, fused multi-layer kernel
_MIB = 1024 * 1024


def _round_up(n, m):
    return ((n + m - 1) // m) * m


def _vmem_limit(need_bytes):
    """Explicit scoped-VMEM budget: 2x headroom, floor 32 MiB, cap 120 MiB."""
    return int(min(max(2 * need_bytes, 32 * _MIB), 120 * _MIB))


# ------------------------------ parameter prep --------------------------------

def _pack_gate_cols(w, H, G3):
    """(d, 3H) -> (d, G3): gates r/z/n packed at cols [0,H),[H,2H),[2H,3H)."""
    d = w.shape[0]
    return jnp.zeros((d, G3), jnp.float32).at[:, :3 * H].set(w)


def _fold_biases(b_ih, b_hh, H, G3):
    """b_gi = b_ih + [b_hh_r, b_hh_z, 0] (folded into the hoisted input proj);
    b_hn = b_hh_n kept separate because of r * (h @ W_hn + b_hn)."""
    b = b_ih.at[:2 * H].add(b_hh[:2 * H])
    b_gi = jnp.zeros((1, G3), jnp.float32).at[0, :3 * H].set(b)
    b_hn = b_hh[2 * H:3 * H].reshape(1, H)
    return b_gi, b_hn


def _init_layer(key, d_in, H):
    """PyTorch-style uniform(-1/sqrt(H), 1/sqrt(H)); weights stored transposed."""
    k = 1.0 / math.sqrt(H)
    key, k1, k2, k3, k4 = jax.random.split(key, 5)
    w_ih = jax.random.uniform(k1, (d_in, 3 * H), jnp.float32, -k, k)
    w_hh = jax.random.uniform(k2, (H, 3 * H), jnp.float32, -k, k)
    b_ih = jax.random.uniform(k3, (3 * H,), jnp.float32, -k, k)
    b_hh = jax.random.uniform(k4, (3 * H,), jnp.float32, -k, k)
    return key, w_ih, w_hh, b_ih, b_hh


# ----------------------------- Pallas GRU kernels ------------------------------

def _gru_layer_kernel(gi_ref, h0_ref, w_hh_ref, b_hn_ref, out_ref, h_scr,
                      *, unroll):
    """Single GRU layer. Grid axis 0 = time chunks (sequential).

    gi_ref  : (Tc, Bp, G3)  bf16  precomputed x @ W_ih + folded biases
    h0_ref  : (Bp, H)       f32
    w_hh_ref: (H, G3)       bf16
    b_hn_ref: (1, H)        f32
    out_ref : (Tc, Bp, H)   bf16
    h_scr   : (Bp, H)       f32   hidden state carried across chunks
    """
    c = pl.program_id(0)

    @pl.when(c == 0)
    def _():
        h_scr[...] = h0_ref[...]

    t_chunk = gi_ref.shape[0]
    Hh = h_scr.shape[-1]
    b_hn = b_hn_ref[...]

    # Note: grid-padding timesteps (T -> T1) run with gi = bias-only; harmless
    # because this layer's final hidden state is never exposed and the padded
    # output rows are sliced off in the wrapper.
    def step(t, h):
        gi = gi_ref[t].astype(jnp.float32)                      # (Bp, G3)
        gh = jnp.dot(h.astype(jnp.bfloat16), w_hh_ref[...],
                     preferred_element_type=jnp.float32)        # (Bp, G3)
        r = jax.nn.sigmoid(gi[:, 0:Hh] + gh[:, 0:Hh])
        z = jax.nn.sigmoid(gi[:, Hh:2 * Hh] + gh[:, Hh:2 * Hh])
        n = jnp.tanh(gi[:, 2 * Hh:3 * Hh] + r * (gh[:, 2 * Hh:3 * Hh] + b_hn))
        h = (1.0 - z) * n + z * h
        out_ref[t] = h.astype(out_ref.dtype)
        return h

    h_scr[...] = jax.lax.fori_loop(0, t_chunk, step, h_scr[...], unroll=unroll)


def _dilated_gru_kernel(y_ref, w_ih_hbm, w_hh_hbm, b_gi_ref, b_hn_ref,
                        out_ref, hn_ref,
                        w_ih_vmem, w_hh_vmem, gi0_scr, h_scr,
                        *, n_real, unroll):
    """Fused stack of L GRU layers over the dilated sequence.

    y_ref    : (Tc, Bd, H)   bf16  layer-0 input activations (streamed)
    w_ih_hbm : (L, H, G3)    bf16  HBM ref (memory_space=ANY)
    w_hh_hbm : (L, H, G3)    bf16  HBM ref (memory_space=ANY)
    b_gi_ref : (L, 1, G3)    f32   b_ih with r/z hidden biases folded in
    b_hn_ref : (L, 1, H)     f32
    out_ref  : (Tc, Bd, H)   f32   last layer's sequence
    hn_ref   : (L, Bd, H)    f32   final hidden per layer (written last chunk)
    w_*_vmem : VMEM-resident single-buffered copies of the weight stacks
    gi0_scr  : (Tc, Bd, G3)  f32   per-chunk layer-0 input projection
    h_scr    : (L, Bd, H)    f32   hidden states carried across chunks
    """
    c = pl.program_id(0)
    last_c = pl.num_programs(0) - 1

    @pl.when(c == 0)
    def _():
        h_scr[...] = jnp.zeros_like(h_scr)
        # Grid-invariant weights: DMA once to VMEM, keep resident (no 2x
        # double-buffered BlockSpec copies).
        pltpu.sync_copy(w_ih_hbm, w_ih_vmem)
        pltpu.sync_copy(w_hh_hbm, w_hh_vmem)

    t_chunk, Bd, Hh = y_ref.shape
    n_layers = h_scr.shape[0]
    t_base = c * t_chunk

    # ---- layer-0 input projection for the whole chunk: parallel work, off
    #      the serial h-chain; consumes the H-wide bf16 activation stream ----
    w_ih0 = w_ih_vmem[0]
    b_gi0 = b_gi_ref[0]
    for t in range(t_chunk):
        gi0_scr[t] = jnp.dot(y_ref[t], w_ih0,
                             preferred_element_type=jnp.float32) + b_gi0

    # hoist the small per-layer biases out of the time loop
    b_gi = [b_gi_ref[l] for l in range(n_layers)]
    b_hn = [b_hn_ref[l] for l in range(n_layers)]

    def step(t, hs):
        x_in = None
        new_hs = []
        for l in range(n_layers):
            h_l = hs[l]
            if l == 0:
                gi = gi0_scr[t]
            else:
                gi = jnp.dot(x_in.astype(jnp.bfloat16), w_ih_vmem[l],
                             preferred_element_type=jnp.float32) + b_gi[l]
            gh = jnp.dot(h_l.astype(jnp.bfloat16), w_hh_vmem[l],
                         preferred_element_type=jnp.float32)
            r = jax.nn.sigmoid(gi[:, 0:Hh] + gh[:, 0:Hh])
            z = jax.nn.sigmoid(gi[:, Hh:2 * Hh] + gh[:, Hh:2 * Hh])
            n = jnp.tanh(gi[:, 2 * Hh:3 * Hh] + r * (gh[:, 2 * Hh:3 * Hh] + b_hn[l]))
            h_new = (1.0 - z) * n + z * h_l
            if n_real is not None:          # only present when grid is padded
                h_new = jnp.where(t_base + t < n_real, h_new, h_l)
            new_hs.append(h_new)
            x_in = h_new
        out_ref[t] = x_in.astype(out_ref.dtype)
        return tuple(new_hs)

    hs0 = tuple(h_scr[l] for l in range(n_layers))
    hs = jax.lax.fori_loop(0, t_chunk, step, hs0, unroll=unroll)
    for l in range(n_layers):
        h_scr[l] = hs[l]

    @pl.when(c == last_c)
    def _():
        for l in range(n_layers):
            hn_ref[l] = hs[l]


# ------------------------------ pallas_call wrappers ---------------------------

def _gru_layer(gi, h0, w_hh, b_hn, t_chunk):
    T, Bp, G3 = gi.shape
    Hh = h0.shape[-1]
    need = (2 * t_chunk * Bp * G3 * 2        # gi blocks (bf16, double-buffered)
            + 2 * t_chunk * Bp * Hh * 2      # out blocks (bf16)
            + 2 * Bp * Hh * 4                # h0
            + 2 * Hh * G3 * 2                # w_hh (bf16)
            + 2 * G3 * 4                     # b_hn (padded)
            + Bp * Hh * 4)                   # h scratch
    kernel = functools.partial(_gru_layer_kernel,
                               unroll=min(t_chunk, _LAYER_UNROLL))
    return pl.pallas_call(
        kernel,
        out_shape=jax.ShapeDtypeStruct((T, Bp, Hh), jnp.bfloat16),
        grid_spec=pltpu.PrefetchScalarGridSpec(
            num_scalar_prefetch=0,
            grid=(T // t_chunk,),
            in_specs=[
                pl.BlockSpec((t_chunk, Bp, G3), lambda c: (c, 0, 0)),   # gi
                pl.BlockSpec((Bp, Hh), lambda c: (0, 0)),               # h0
                pl.BlockSpec((Hh, G3), lambda c: (0, 0)),               # w_hh
                pl.BlockSpec((1, Hh), lambda c: (0, 0)),                # b_hn
            ],
            out_specs=pl.BlockSpec((t_chunk, Bp, Hh), lambda c: (c, 0, 0)),
            scratch_shapes=[pltpu.VMEM((Bp, Hh), jnp.float32)],
        ),
        compiler_params=pltpu.CompilerParams(
            dimension_semantics=("arbitrary",),     # sequential recurrence
            vmem_limit_bytes=_vmem_limit(need)),
    )(gi, h0, w_hh, b_hn)


def _dilated_gru(y_dil, w_ih, w_hh, b_gi, b_hn, t_chunk, n_real):
    T, Bd, Hh = y_dil.shape
    L, _, G3 = w_hh.shape
    need = (2 * t_chunk * Bd * Hh * 2        # y blocks (bf16)
            + 2 * t_chunk * Bd * Hh * 4      # out blocks (f32)
            + 2 * L * Bd * Hh * 4            # hn block
            + 2 * L * G3 * 4 + 2 * L * Hh * 4          # biases
            + 2 * L * Hh * G3 * 2            # resident weight stacks (bf16)
            + t_chunk * Bd * G3 * 4          # gi0 scratch
            + L * Bd * Hh * 4)               # h scratch
    kernel = functools.partial(_dilated_gru_kernel, n_real=n_real,
                               unroll=min(t_chunk, _DILATED_UNROLL))
    return pl.pallas_call(
        kernel,
        out_shape=(jax.ShapeDtypeStruct((T, Bd, Hh), jnp.float32),
                   jax.ShapeDtypeStruct((L, Bd, Hh), jnp.float32)),
        grid_spec=pltpu.PrefetchScalarGridSpec(
            num_scalar_prefetch=0,
            grid=(T // t_chunk,),
            in_specs=[
                pl.BlockSpec((t_chunk, Bd, Hh), lambda c: (c, 0, 0)),   # y (bf16)
                pl.BlockSpec(memory_space=pl.ANY),                      # w_ih HBM
                pl.BlockSpec(memory_space=pl.ANY),                      # w_hh HBM
                pl.BlockSpec((L, 1, G3), lambda c: (0, 0, 0)),          # b_gi
                pl.BlockSpec((L, 1, Hh), lambda c: (0, 0, 0)),          # b_hn
            ],
            out_specs=[
                pl.BlockSpec((t_chunk, Bd, Hh), lambda c: (c, 0, 0)),
                pl.BlockSpec((L, Bd, Hh), lambda c: (0, 0, 0)),
            ],
            scratch_shapes=[
                pltpu.VMEM((L, Hh, G3), jnp.bfloat16),       # w_ih resident
                pltpu.VMEM((L, Hh, G3), jnp.bfloat16),       # w_hh resident
                pltpu.VMEM((t_chunk, Bd, G3), jnp.float32),  # layer-0 gates
                pltpu.VMEM((L, Bd, Hh), jnp.float32),        # carried hidden
            ],
        ),
        compiler_params=pltpu.CompilerParams(
            dimension_semantics=("arbitrary",),
            vmem_limit_bytes=_vmem_limit(need)),
    )(y_dil, w_ih, w_hh, b_gi, b_hn)


# ----------------------------------- RNNCell ------------------------------------

class RNNCellPallas:
    def __init__(self, input_size, hidden_size, num_rnn_layers, recurrent_skip,
                 key=jax.random.PRNGKey(0)):
        self.input_size = input_size
        self.hidden_size = hidden_size
        self.g3 = _round_up(3 * hidden_size, 128)   # packed, lane-aligned gates
        self.num_layers = num_rnn_layers
        self.skip = recurrent_skip
        H, G3 = hidden_size, self.g3
        bf16 = jnp.bfloat16

        # ----- initial single-layer GRU (input_size -> H) -----
        key, w_ih, w_hh, b_ih, b_hh = _init_layer(key, input_size, H)
        self.w_ih0 = _pack_gate_cols(w_ih, H, G3)                  # (D, G3) f32
        self.w_hh0 = _pack_gate_cols(w_hh, H, G3).astype(bf16)     # (H, G3) bf16
        self.b_gi0, self.b_hn0 = _fold_biases(b_ih, b_hh, H, G3)

        # ----- fused stacked dilated GRU (H -> H, L layers) -----
        w_ih_l, w_hh_l, b_gi_l, b_hn_l = [], [], [], []
        for _ in range(num_rnn_layers):
            key, w_ih, w_hh, b_ih, b_hh = _init_layer(key, H, H)
            w_ih_l.append(_pack_gate_cols(w_ih, H, G3))
            w_hh_l.append(_pack_gate_cols(w_hh, H, G3))
            bg, bn = _fold_biases(b_ih, b_hh, H, G3)
            b_gi_l.append(bg)
            b_hn_l.append(bn)
        self.w_ih_d = jnp.stack(w_ih_l).astype(bf16)   # (L, H, G3)
        self.w_hh_d = jnp.stack(w_hh_l).astype(bf16)   # (L, H, G3)
        self.b_gi_d = jnp.stack(b_gi_l)                # (L, 1, G3)
        self.b_hn_d = jnp.stack(b_hn_l)                # (L, 1, H)

    @functools.partial(jax.jit, static_argnums=0)
    def __call__(self, x, state):
        """x: (B, T, input_size), state: (B, hidden_size).
        Returns (output, h_n): output (B, T, H), h_n (num_layers, skip*B, H)."""
        B, T, _ = x.shape
        H = self.hidden_size
        skip, L = self.skip, self.num_layers
        Bp = _round_up(B, 8)                           # sublane-aligned batch
        bf16 = jnp.bfloat16

        x = x.astype(jnp.float32)

        # -------- initial single-layer GRU --------
        tc0 = T if T <= _MAX_TIME_CHUNK else _MAX_TIME_CHUNK
        T1 = _round_up(T, tc0)
        xt = jnp.transpose(x, (1, 0, 2))                            # (T, B, D)
        xt = jnp.pad(xt, ((0, T1 - T), (0, Bp - B), (0, 0)))
        # hoisted input projection (one parallel matmul), streamed as bf16
        gi = (jnp.dot(xt, self.w_ih0) + self.b_gi0).astype(bf16)    # (T1, Bp, G3)
        h0 = jnp.pad(state.astype(jnp.float32), ((0, Bp - B), (0, 0)))
        y = _gru_layer(gi, h0, self.w_hh0, self.b_hn0, tc0)         # (T1, Bp, H) bf16

        # -------- dilation: pure reshape of the time-major tensor --------
        T2 = _round_up(T, skip)
        Ld = T2 // skip
        y = jnp.pad(y[:T], ((0, T2 - T), (0, 0), (0, 0)))           # zero-pad tail
        y_dil = y.reshape(Ld, skip * Bp, H)                         # (Ld, Bd, H)

        # -------- fused stacked dilated GRU --------
        tcd = Ld if Ld <= _MAX_TIME_CHUNK else _MAX_TIME_CHUNK
        Ld_pad = _round_up(Ld, tcd)
        y_dil = jnp.pad(y_dil, ((0, Ld_pad - Ld), (0, 0), (0, 0)))
        out_dil, h_n = _dilated_gru(
            y_dil, self.w_ih_d, self.w_hh_d, self.b_gi_d, self.b_hn_d, tcd,
            n_real=(Ld if Ld_pad != Ld else None))

        # -------- undilate + strip padding --------
        out = out_dil[:Ld].reshape(T2, Bp, H)[:T, :B, :]
        out = jnp.transpose(out, (1, 0, 2))                         # (B, T, H)
        h_n = h_n.reshape(L, skip, Bp, H)[:, :, :B, :].reshape(L, skip * B, H)
        return out, h_n


# ------------------------------------- main --------------------------------------

if __name__ == "__main__":
    input_size = 8
    hidden_size = 32
    num_rnn_layers = 2
    recurrent_skip = 2
    B, T = 2, 8

    key = jax.random.PRNGKey(0)
    kx, ks, kp = jax.random.split(key, 3)
    x = jax.random.normal(kx, (B, T, input_size), jnp.float32)
    state = jax.random.normal(ks, (B, hidden_size), jnp.float32)

    cell = RNNCellPallas(input_size, hidden_size, num_rnn_layers,
                         recurrent_skip, key=kp)
    out, h_n = cell(x, state)
    jax.block_until_ready(out)
    jax.block_until_ready(h_n)

    assert out.shape == (B, T, hidden_size)
    assert h_n.shape == (num_rnn_layers, recurrent_skip * B, hidden_size)
    print("KERNEL_OK")
</pallas_src>

<mosaic_0001>
module attributes {stable_mosaic.version = 11 : i64} {
  func.func @_gru_layer_kernel(%arg0: i32, %arg1: memref<8x8x128xbf16, #tpu.memory_space<vmem>>, %arg2: memref<8x32xf32, #tpu.memory_space<vmem>>, %arg3: memref<32x128xbf16, #tpu.memory_space<vmem>>, %arg4: memref<1x32xf32, #tpu.memory_space<vmem>>, %arg5: memref<8x8x32xbf16, #tpu.memory_space<vmem>>, %arg6: memref<8x32xf32, #tpu.memory_space<vmem>>) attributes {dimension_semantics = [#tpu.dimension_semantics<arbitrary>], iteration_bounds = array<i64: 1>, scalar_prefetch = 0 : i64, scratch_operands = 1 : i64, tpu.core_type = #tpu.core_type<tc>, window_params = [{transform_indices = @transform_0, window_bounds = array<i64: 8, 8, 128>}, {pipeline_mode = #tpu.pipeline_mode<synchronous>, transform_indices = @transform_1, window_bounds = array<i64: 8, 32>}, {pipeline_mode = #tpu.pipeline_mode<synchronous>, transform_indices = @transform_2, window_bounds = array<i64: 32, 128>}, {pipeline_mode = #tpu.pipeline_mode<synchronous>, transform_indices = @transform_3, window_bounds = array<i64: 1, 32>}, {transform_indices = @transform_4, window_bounds = array<i64: 8, 8, 32>}]} {
    %c0_i32 = arith.constant 0 : i32
    %0 = arith.cmpi eq, %arg0, %c0_i32 : i32
    %1 = arith.extui %0 : i1 to i32
    %c0_i32_0 = arith.constant 0 : i32
    %2 = arith.cmpi ne, %1, %c0_i32_0 : i32
    scf.if %2 {
      %c0_86 = arith.constant 0 : index
      %c0_87 = arith.constant 0 : index
      %326 = vector.load %arg2[%c0_86, %c0_87] : memref<8x32xf32, #tpu.memory_space<vmem>>, vector<8x32xf32>
      %c0_88 = arith.constant 0 : index
      %c0_89 = arith.constant 0 : index
      %327 = vector.load %arg6[%c0_88, %c0_89] : memref<8x32xf32, #tpu.memory_space<vmem>>, vector<8x32xf32>
      tpu.vector_store %arg6[%c0_88, %c0_89], %326 {strides = array<i32>} : memref<8x32xf32, #tpu.memory_space<vmem>>, vector<8x32xf32>,
    } else {
    }
    %c0 = arith.constant 0 : index
    %c0_1 = arith.constant 0 : index
    %3 = vector.load %arg4[%c0, %c0_1] : memref<1x32xf32, #tpu.memory_space<vmem>>, vector<1x32xf32>
    %c0_2 = arith.constant 0 : index
    %c0_3 = arith.constant 0 : index
    %4 = vector.load %arg6[%c0_2, %c0_3] : memref<8x32xf32, #tpu.memory_space<vmem>>, vector<8x32xf32>
    %c0_i32_4 = arith.constant 0 : i32
    %5 = arith.index_cast %c0_i32_4 : i32 to index
    %c0_5 = arith.constant 0 : index
    %c0_6 = arith.constant 0 : index
    %6 = vector.load %arg1[%5, %c0_5, %c0_6] : memref<8x8x128xbf16, #tpu.memory_space<vmem>>, vector<1x8x128xbf16>
    %7 = vector.shape_cast %6 : vector<1x8x128xbf16> to vector<8x128xbf16>
    %8 = arith.extf %7 : vector<8x128xbf16> to vector<8x128xf32>
    %9 = arith.truncf %4 : vector<8x32xf32> to vector<8x32xbf16>
    %c0_7 = arith.constant 0 : index
    %c0_8 = arith.constant 0 : index
    %10 = vector.load %arg3[%c0_7, %c0_8] : memref<32x128xbf16, #tpu.memory_space<vmem>>, vector<32x128xbf16>
    %cst = arith.constant dense<0.000000e+00> : vector<8x128xf32>
    %11 = tpu.matmul %9, %10, %cst {dimension_numbers = #tpu.dot_dimension_numbers<[1], [0], [0], [1], [0, 0, 1, 1], [], []>} : vector<8x32xbf16>, vector<32x128xbf16>, vector<8x128xf32> -> vector<8x128xf32>
    %12 = vector.extract_strided_slice %8 {offsets = [0, 0], sizes = [8, 32], strides = [1, 1]} : vector<8x128xf32> to vector<8x32xf32>
    %13 = vector.extract_strided_slice %11 {offsets = [0, 0], sizes = [8, 32], strides = [1, 1]} : vector<8x128xf32> to vector<8x32xf32>
    %14 = arith.addf %12, %13 : vector<8x32xf32>
    %15 = arith.negf %14 : vector<8x32xf32>
    %16 = math.exp %15 : vector<8x32xf32>
    %cst_9 = arith.constant 1.000000e+00 : f32
    %17 = vector.broadcast %cst_9 : f32 to vector<8x32xf32>
    %18 = arith.addf %17, %16 : vector<8x32xf32>
    %19 = arith.divf %17, %18 : vector<8x32xf32>
    %20 = vector.extract_strided_slice %8 {offsets = [0, 32], sizes = [8, 32], strides = [1, 1]} : vector<8x128xf32> to vector<8x32xf32>
    %21 = vector.extract_strided_slice %11 {offsets = [0, 32], sizes = [8, 32], strides = [1, 1]} : vector<8x128xf32> to vector<8x32xf32>
    %22 = arith.addf %20, %21 : vector<8x32xf32>
    %23 = arith.negf %22 : vector<8x32xf32>
    %24 = math.exp %23 : vector<8x32xf32>
    %cst_10 = arith.constant 1.000000e+00 : f32
    %25 = vector.broadcast %cst_10 : f32 to vector<8x32xf32>
    %26 = arith.addf %25, %24 : vector<8x32xf32>
    %27 = arith.divf %25, %26 : vector<8x32xf32>
    %28 = vector.extract_strided_slice %8 {offsets = [0, 64], sizes = [8, 32], strides = [1, 1]} : vector<8x128xf32> to vector<8x32xf32>
    %29 = vector.extract_strided_slice %11 {offsets = [0, 64], sizes = [8, 32], strides = [1, 1]} : vector<8x128xf32> to vector<8x32xf32>
    %30 = vector.broadcast %3 : vector<1x32xf32> to vector<8x32xf32>
    %31 = arith.addf %29, %30 : vector<8x32xf32>
    %32 = arith.mulf %19, %31 : vector<8x32xf32>
    %33 = arith.addf %28, %32 : vector<8x32xf32>
    %34 = math.tanh %33 : vector<8x32xf32>
    %cst_11 = arith.constant 1.000000e+00 : f32
    %35 = vector.broadcast %cst_11 : f32 to vector<8x32xf32>
    %36 = arith.subf %35, %27 : vector<8x32xf32>
    %37 = arith.mulf %36, %34 : vector<8x32xf32>
    %38 = arith.mulf %27, %4 : vector<8x32xf32>
    %39 = arith.addf %37, %38 : vector<8x32xf32>
    %40 = arith.truncf %39 : vector<8x32xf32> to vector<8x32xbf16>
    %41 = arith.index_cast %c0_i32_4 : i32 to index
    %c0_12 = arith.constant 0 : index
    %c0_13 = arith.constant 0 : index
    %42 = vector.load %arg5[%41, %c0_12, %c0_13] : memref<8x8x32xbf16, #tpu.memory_space<vmem>>, vector<1x8x32xbf16>
    %43 = vector.shape_cast %42 : vector<1x8x32xbf16> to vector<8x32xbf16>
    %44 = vector.shape_cast %40 : vector<8x32xbf16> to vector<1x8x32xbf16>
    tpu.vector_store %arg5[%41, %c0_12, %c0_13], %44 {strides = array<i32>} : memref<8x8x32xbf16, #tpu.memory_space<vmem>>, vector<1x8x32xbf16>,
    %c1_i32 = arith.constant 1 : i32
    %45 = arith.index_cast %c1_i32 : i32 to index
    %c0_14 = arith.constant 0 : index
    %c0_15 = arith.constant 0 : index
    %46 = vector.load %arg1[%45, %c0_14, %c0_15] : memref<8x8x128xbf16, #tpu.memory_space<vmem>>, vector<1x8x128xbf16>
    %47 = vector.shape_cast %46 : vector<1x8x128xbf16> to vector<8x128xbf16>
    %48 = arith.extf %47 : vector<8x128xbf16> to vector<8x128xf32>
    %49 = arith.truncf %39 : vector<8x32xf32> to vector<8x32xbf16>
    %c0_16 = arith.constant 0 : index
    %c0_17 = arith.constant 0 : index
    %50 = vector.load %arg3[%c0_16, %c0_17] : memref<32x128xbf16, #tpu.memory_space<vmem>>, vector<32x128xbf16>
    %cst_18 = arith.constant dense<0.000000e+00> : vector<8x128xf32>
    %51 = tpu.matmul %49, %50, %cst_18 {dimension_numbers = #tpu.dot_dimension_numbers<[1], [0], [0], [1], [0, 0, 1, 1], [], []>} : vector<8x32xbf16>, vector<32x128xbf16>, vector<8x128xf32> -> vector<8x128xf32>
    %52 = vector.extract_strided_slice %48 {offsets = [0, 0], sizes = [8, 32], strides = [1, 1]} : vector<8x128xf32> to vector<8x32xf32>
    %53 = vector.extract_strided_slice %51 {offsets = [0, 0], sizes = [8, 32], strides = [1, 1]} : vector<8x128xf32> to vector<8x32xf32>
    %54 = arith.addf %52, %53 : vector<8x32xf32>
    %55 = arith.negf %54 : vector<8x32xf32>
    %56 = math.exp %55 : vector<8x32xf32>
    %cst_19 = arith.constant 1.000000e+00 : f32
    %57 = vector.broadcast %cst_19 : f32 to vector<8x32xf32>
    %58 = arith.addf %57, %56 : vector<8x32xf32>
    %59 = arith.divf %57, %58 : vector<8x32xf32>
    %60 = vector.extract_strided_slice %48 {offsets = [0, 32], sizes = [8, 32], strides = [1, 1]} : vector<8x128xf32> to vector<8x32xf32>
    %61 = vector.extract_strided_slice %51 {offsets = [0, 32], sizes = [8, 32], strides = [1, 1]} : vector<8x128xf32> to vector<8x32xf32>
    %62 = arith.addf %60, %61 : vector<8x32xf32>
    %63 = arith.negf %62 : vector<8x32xf32>
    %64 = math.exp %63 : vector<8x32xf32>
    %cst_20 = arith.constant 1.000000e+00 : f32
    %65 = vector.broadcast %cst_20 : f32 to vector<8x32xf32>
    %66 = arith.addf %65, %64 : vector<8x32xf32>
    %67 = arith.divf %65, %66 : vector<8x32xf32>
    %68 = vector.extract_strided_slice %48 {offsets = [0, 64], sizes = [8, 32], strides = [1, 1]} : vector<8x128xf32> to vector<8x32xf32>
    %69 = vector.extract_strided_slice %51 {offsets = [0, 64], sizes = [8, 32], strides = [1, 1]} : vector<8x128xf32> to vector<8x32xf32>
    %70 = vector.broadcast %3 : vector<1x32xf32> to vector<8x32xf32>
    %71 = arith.addf %69, %70 : vector<8x32xf32>
    %72 = arith.mulf %59, %71 : vector<8x32xf32>
    %73 = arith.addf %68, %72 : vector<8x32xf32>
    %74 = math.tanh %73 : vector<8x32xf32>
    %cst_21 = arith.constant 1.000000e+00 : f32
    %75 = vector.broadcast %cst_21 : f32 to vector<8x32xf32>
    %76 = arith.subf %75, %67 : vector<8x32xf32>
    %77 = arith.mulf %76, %74 : vector<8x32xf32>
    %78 = arith.mulf %67, %39 : vector<8x32xf32>
    %79 = arith.addf %77, %78 : vector<8x32xf32>
    %80 = arith.truncf %79 : vector<8x32xf32> to vector<8x32xbf16>
    %81 = arith.index_cast %c1_i32 : i32 to index
    %c0_22 = arith.constant 0 : index
    %c0_23 = arith.constant 0 : index
    %82 = vector.load %arg5[%81, %c0_22, %c0_23] : memref<8x8x32xbf16, #tpu.memory_space<vmem>>, vector<1x8x32xbf16>
    %83 = vector.shape_cast %82 : vector<1x8x32xbf16> to vector<8x32xbf16>
    %84 = vector.shape_cast %80 : vector<8x32xbf16> to vector<1x8x32xbf16>
    tpu.vector_store %arg5[%81, %c0_22, %c0_23], %84 {strides = array<i32>} : memref<8x8x32xbf16, #tpu.memory_space<vmem>>, vector<1x8x32xbf16>,
    %c2_i32 = arith.constant 2 : i32
    %85 = arith.index_cast %c2_i32 : i32 to index
    %c0_24 = arith.constant 0 : index
    %c0_25 = arith.constant 0 : index
    %86 = vector.load %arg1[%85, %c0_24, %c0_25] : memref<8x8x128xbf16, #tpu.memory_space<vmem>>, vector<1x8x128xbf16>
    %87 = vector.shape_cast %86 : vector<1x8x128xbf16> to vector<8x128xbf16>
    %88 = arith.extf %87 : vector<8x128xbf16> to vector<8x128xf32>
    %89 = arith.truncf %79 : vector<8x32xf32> to vector<8x32xbf16>
    %c0_26 = arith.constant 0 : index
    %c0_27 = arith.constant 0 : index
    %90 = vector.load %arg3[%c0_26, %c0_27] : memref<32x128xbf16, #tpu.memory_space<vmem>>, vector<32x128xbf16>
    %cst_28 = arith.constant dense<0.000000e+00> : vector<8x128xf32>
    %91 = tpu.matmul %89, %90, %cst_28 {dimension_numbers = #tpu.dot_dimension_numbers<[1], [0], [0], [1], [0, 0, 1, 1], [], []>} : vector<8x32xbf16>, vector<32x128xbf16>, vector<8x128xf32> -> vector<8x128xf32>
    %92 = vector.extract_strided_slice %88 {offsets = [0, 0], sizes = [8, 32], strides = [1, 1]} : vector<8x128xf32> to vector<8x32xf32>
    %93 = vector.extract_strided_slice %91 {offsets = [0, 0], sizes = [8, 32], strides = [1, 1]} : vector<8x128xf32> to vector<8x32xf32>
    %94 = arith.addf %92, %93 : vector<8x32xf32>
    %95 = arith.negf %94 : vector<8x32xf32>
    %96 = math.exp %95 : vector<8x32xf32>
    %cst_29 = arith.constant 1.000000e+00 : f32
    %97 = vector.broadcast %cst_29 : f32 to vector<8x32xf32>
    %98 = arith.addf %97, %96 : vector<8x32xf32>
    %99 = arith.divf %97, %98 : vector<8x32xf32>
    %100 = vector.extract_strided_slice %88 {offsets = [0, 32], sizes = [8, 32], strides = [1, 1]} : vector<8x128xf32> to vector<8x32xf32>
    %101 = vector.extract_strided_slice %91 {offsets = [0, 32], sizes = [8, 32], strides = [1, 1]} : vector<8x128xf32> to vector<8x32xf32>
    %102 = arith.addf %100, %101 : vector<8x32xf32>
    %103 = arith.negf %102 : vector<8x32xf32>
    %104 = math.exp %103 : vector<8x32xf32>
    %cst_30 = arith.constant 1.000000e+00 : f32
    %105 = vector.broadcast %cst_30 : f32 to vector<8x32xf32>
    %106 = arith.addf %105, %104 : vector<8x32xf32>
    %107 = arith.divf %105, %106 : vector<8x32xf32>
    %108 = vector.extract_strided_slice %88 {offsets = [0, 64], sizes = [8, 32], strides = [1, 1]} : vector<8x128xf32> to vector<8x32xf32>
    %109 = vector.extract_strided_slice %91 {offsets = [0, 64], sizes = [8, 32], strides = [1, 1]} : vector<8x128xf32> to vector<8x32xf32>
    %110 = vector.broadcast %3 : vector<1x32xf32> to vector<8x32xf32>
    %111 = arith.addf %109, %110 : vector<8x32xf32>
    %112 = arith.mulf %99, %111 : vector<8x32xf32>
    %113 = arith.addf %108, %112 : vector<8x32xf32>
    %114 = math.tanh %113 : vector<8x32xf32>
    %cst_31 = arith.constant 1.000000e+00 : f32
    %115 = vector.broadcast %cst_31 : f32 to vector<8x32xf32>
    %116 = arith.subf %115, %107 : vector<8x32xf32>
    %117 = arith.mulf %116, %114 : vector<8x32xf32>
    %118 = arith.mulf %107, %79 : vector<8x32xf32>
    %119 = arith.addf %117, %118 : vector<8x32xf32>
    %120 = arith.truncf %119 : vector<8x32xf32> to vector<8x32xbf16>
    %121 = arith.index_cast %c2_i32 : i32 to index
    %c0_32 = arith.constant 0 : index
    %c0_33 = arith.constant 0 : index
    %122 = vector.load %arg5[%121, %c0_32, %c0_33] : memref<8x8x32xbf16, #tpu.memory_space<vmem>>, vector<1x8x32xbf16>
    %123 = vector.shape_cast %122 : vector<1x8x32xbf16> to vector<8x32xbf16>
    %124 = vector.shape_cast %120 : vector<8x32xbf16> to vector<1x8x32xbf16>
    tpu.vector_store %arg5[%121, %c0_32, %c0_33], %124 {strides = array<i32>} : memref<8x8x32xbf16, #tpu.memory_space<vmem>>, vector<1x8x32xbf16>,
    %c3_i32 = arith.constant 3 : i32
    %125 = arith.index_cast %c3_i32 : i32 to index
    %c0_34 = arith.constant 0 : index
    %c0_35 = arith.constant 0 : index
    %126 = vector.load %arg1[%125, %c0_34, %c0_35] : memref<8x8x128xbf16, #tpu.memory_space<vmem>>, vector<1x8x128xbf16>
    %127 = vector.shape_cast %126 : vector<1x8x128xbf16> to vector<8x128xbf16>
    %128 = arith.extf %127 : vector<8x128xbf16> to vector<8x128xf32>
    %129 = arith.truncf %119 : vector<8x32xf32> to vector<8x32xbf16>
    %c0_36 = arith.constant 0 : index
    %c0_37 = arith.constant 0 : index
    %130 = vector.load %arg3[%c0_36, %c0_37] : memref<32x128xbf16, #tpu.memory_space<vmem>>, vector<32x128xbf16>
    %cst_38 = arith.constant dense<0.000000e+00> : vector<8x128xf32>
    %131 = tpu.matmul %129, %130, %cst_38 {dimension_numbers = #tpu.dot_dimension_numbers<[1], [0], [0], [1], [0, 0, 1, 1], [], []>} : vector<8x32xbf16>, vector<32x128xbf16>, vector<8x128xf32> -> vector<8x128xf32>
    %132 = vector.extract_strided_slice %128 {offsets = [0, 0], sizes = [8, 32], strides = [1, 1]} : vector<8x128xf32> to vector<8x32xf32>
    %133 = vector.extract_strided_slice %131 {offsets = [0, 0], sizes = [8, 32], strides = [1, 1]} : vector<8x128xf32> to vector<8x32xf32>
    %134 = arith.addf %132, %133 : vector<8x32xf32>
    %135 = arith.negf %134 : vector<8x32xf32>
    %136 = math.exp %135 : vector<8x32xf32>
    %cst_39 = arith.constant 1.000000e+00 : f32
    %137 = vector.broadcast %cst_39 : f32 to vector<8x32xf32>
    %138 = arith.addf %137, %136 : vector<8x32xf32>
    %139 = arith.divf %137, %138 : vector<8x32xf32>
    %140 = vector.extract_strided_slice %128 {offsets = [0, 32], sizes = [8, 32], strides = [1, 1]} : vector<8x128xf32> to vector<8x32xf32>
    %141 = vector.extract_strided_slice %131 {offsets = [0, 32], sizes = [8, 32], strides = [1, 1]} : vector<8x128xf32> to vector<8x32xf32>
    %142 = arith.addf %140, %141 : vector<8x32xf32>
    %143 = arith.negf %142 : vector<8x32xf32>
    %144 = math.exp %143 : vector<8x32xf32>
    %cst_40 = arith.constant 1.000000e+00 : f32
    %145 = vector.broadcast %cst_40 : f32 to vector<8x32xf32>
    %146 = arith.addf %145, %144 : vector<8x32xf32>
    %147 = arith.divf %145, %146 : vector<8x32xf32>
    %148 = vector.extract_strided_slice %128 {offsets = [0, 64], sizes = [8, 32], strides = [1, 1]} : vector<8x128xf32> to vector<8x32xf32>
    %149 = vector.extract_strided_slice %131 {offsets = [0, 64], sizes = [8, 32], strides = [1, 1]} : vector<8x128xf32> to vector<8x32xf32>
    %150 = vector.broadcast %3 : vector<1x32xf32> to vector<8x32xf32>
    %151 = arith.addf %149, %150 : vector<8x32xf32>
    %152 = arith.mulf %139, %151 : vector<8x32xf32>
    %153 = arith.addf %148, %152 : vector<8x32xf32>
    %154 = math.tanh %153 : vector<8x32xf32>
    %cst_41 = arith.constant 1.000000e+00 : f32
    %155 = vector.broadcast %cst_41 : f32 to vector<8x32xf32>
    %156 = arith.subf %155, %147 : vector<8x32xf32>
    %157 = arith.mulf %156, %154 : vector<8x32xf32>
    %158 = arith.mulf %147, %119 : vector<8x32xf32>
    %159 = arith.addf %157, %158 : vector<8x32xf32>
    %160 = arith.truncf %159 : vector<8x32xf32> to vector<8x32xbf16>
    %161 = arith.index_cast %c3_i32 : i32 to index
    %c0_42 = arith.constant 0 : index
    %c0_43 = arith.constant 0 : index
    %162 = vector.load %arg5[%161, %c0_42, %c0_43] : memref<8x8x32xbf16, #tpu.memory_space<vmem>>, vector<1x8x32xbf16>
    %163 = vector.shape_cast %162 : vector<1x8x32xbf16> to vector<8x32xbf16>
    %164 = vector.shape_cast %160 : vector<8x32xbf16> to vector<1x8x32xbf16>
    tpu.vector_store %arg5[%161, %c0_42, %c0_43], %164 {strides = array<i32>} : memref<8x8x32xbf16, #tpu.memory_space<vmem>>, vector<1x8x32xbf16>,
    %c4_i32 = arith.constant 4 : i32
    %165 = arith.index_cast %c4_i32 : i32 to index
    %c0_44 = arith.constant 0 : index
    %c0_45 = arith.constant 0 : index
    %166 = vector.load %arg1[%165, %c0_44, %c0_45] : memref<8x8x128xbf16, #tpu.memory_space<vmem>>, vector<1x8x128xbf16>
    %167 = vector.shape_cast %166 : vector<1x8x128xbf16> to vector<8x128xbf16>
    %168 = arith.extf %167 : vector<8x128xbf16> to vector<8x128xf32>
    %169 = arith.truncf %159 : vector<8x32xf32> to vector<8x32xbf16>
    %c0_46 = arith.constant 0 : index
    %c0_47 = arith.constant 0 : index
    %170 = vector.load %arg3[%c0_46, %c0_47] : memref<32x128xbf16, #tpu.memory_space<vmem>>, vector<32x128xbf16>
    %cst_48 = arith.constant dense<0.000000e+00> : vector<8x128xf32>
    %171 = tpu.matmul %169, %170, %cst_48 {dimension_numbers = #tpu.dot_dimension_numbers<[1], [0], [0], [1], [0, 0, 1, 1], [], []>} : vector<8x32xbf16>, vector<32x128xbf16>, vector<8x128xf32> -> vector<8x128xf32>
    %172 = vector.extract_strided_slice %168 {offsets = [0, 0], sizes = [8, 32], strides = [1, 1]} : vector<8x128xf32> to vector<8x32xf32>
    %173 = vector.extract_strided_slice %171 {offsets = [0, 0], sizes = [8, 32], strides = [1, 1]} : vector<8x128xf32> to vector<8x32xf32>
    %174 = arith.addf %172, %173 : vector<8x32xf32>
    %175 = arith.negf %174 : vector<8x32xf32>
    %176 = math.exp %175 : vector<8x32xf32>
    %cst_49 = arith.constant 1.000000e+00 : f32
    %177 = vector.broadcast %cst_49 : f32 to vector<8x32xf32>
    %178 = arith.addf %177, %176 : vector<8x32xf32>
    %179 = arith.divf %177, %178 : vector<8x32xf32>
    %180 = vector.extract_strided_slice %168 {offsets = [0, 32], sizes = [8, 32], strides = [1, 1]} : vector<8x128xf32> to vector<8x32xf32>
    %181 = vector.extract_strided_slice %171 {offsets = [0, 32], sizes = [8, 32], strides = [1, 1]} : vector<8x128xf32> to vector<8x32xf32>
    %182 = arith.addf %180, %181 : vector<8x32xf32>
    %183 = arith.negf %182 : vector<8x32xf32>
    %184 = math.exp %183 : vector<8x32xf32>
    %cst_50 = arith.constant 1.000000e+00 : f32
    %185 = vector.broadcast %cst_50 : f32 to vector<8x32xf32>
    %186 = arith.addf %185, %184 : vector<8x32xf32>
    %187 = arith.divf %185, %186 : vector<8x32xf32>
    %188 = vector.extract_strided_slice %168 {offsets = [0, 64], sizes = [8, 32], strides = [1, 1]} : vector<8x128xf32> to vector<8x32xf32>
    %189 = vector.extract_strided_slice %171 {offsets = [0, 64], sizes = [8, 32], strides = [1, 1]} : vector<8x128xf32> to vector<8x32xf32>
    %190 = vector.broadcast %3 : vector<1x32xf32> to vector<8x32xf32>
    %191 = arith.addf %189, %190 : vector<8x32xf32>
    %192 = arith.mulf %179, %191 : vector<8x32xf32>
    %193 = arith.addf %188, %192 : vector<8x32xf32>
    %194 = math.tanh %193 : vector<8x32xf32>
    %cst_51 = arith.constant 1.000000e+00 : f32
    %195 = vector.broadcast %cst_51 : f32 to vector<8x32xf32>
    %196 = arith.subf %195, %187 : vector<8x32xf32>
    %197 = arith.mulf %196, %194 : vector<8x32xf32>
    %198 = arith.mulf %187, %159 : vector<8x32xf32>
    %199 = arith.addf %197, %198 : vector<8x32xf32>
    %200 = arith.truncf %199 : vector<8x32xf32> to vector<8x32xbf16>
    %201 = arith.index_cast %c4_i32 : i32 to index
    %c0_52 = arith.constant 0 : index
    %c0_53 = arith.constant 0 : index
    %202 = vector.load %arg5[%201, %c0_52, %c0_53] : memref<8x8x32xbf16, #tpu.memory_space<vmem>>, vector<1x8x32xbf16>
    %203 = vector.shape_cast %202 : vector<1x8x32xbf16> to vector<8x32xbf16>
    %204 = vector.shape_cast %200 : vector<8x32xbf16> to vector<1x8x32xbf16>
    tpu.vector_store %arg5[%201, %c0_52, %c0_53], %204 {strides = array<i32>} : memref<8x8x32xbf16, #tpu.memory_space<vmem>>, vector<1x8x32xbf16>,
    %c5_i32 = arith.constant 5 : i32
    %205 = arith.index_cast %c5_i32 : i32 to index
    %c0_54 = arith.constant 0 : index
    %c0_55 = arith.constant 0 : index
    %206 = vector.load %arg1[%205, %c0_54, %c0_55] : memref<8x8x128xbf16, #tpu.memory_space<vmem>>, vector<1x8x128xbf16>
    %207 = vector.shape_cast %206 : vector<1x8x128xbf16> to vector<8x128xbf16>
    %208 = arith.extf %207 : vector<8x128xbf16> to vector<8x128xf32>
    %209 = arith.truncf %199 : vector<8x32xf32> to vector<8x32xbf16>
    %c0_56 = arith.constant 0 : index
    %c0_57 = arith.constant 0 : index
    %210 = vector.load %arg3[%c0_56, %c0_57] : memref<32x128xbf16, #tpu.memory_space<vmem>>, vector<32x128xbf16>
    %cst_58 = arith.constant dense<0.000000e+00> : vector<8x128xf32>
    %211 = tpu.matmul %209, %210, %cst_58 {dimension_numbers = #tpu.dot_dimension_numbers<[1], [0], [0], [1], [0, 0, 1, 1], [], []>} : vector<8x32xbf16>, vector<32x128xbf16>, vector<8x128xf32> -> vector<8x128xf32>
    %212 = vector.extract_strided_slice %208 {offsets = [0, 0], sizes = [8, 32], strides = [1, 1]} : vector<8x128xf32> to vector<8x32xf32>
    %213 = vector.extract_strided_slice %211 {offsets = [0, 0], sizes = [8, 32], strides = [1, 1]} : vector<8x128xf32> to vector<8x32xf32>
    %214 = arith.addf %212, %213 : vector<8x32xf32>
    %215 = arith.negf %214 : vector<8x32xf32>
    %216 = math.exp %215 : vector<8x32xf32>
    %cst_59 = arith.constant 1.000000e+00 : f32
    %217 = vector.broadcast %cst_59 : f32 to vector<8x32xf32>
    %218 = arith.addf %217, %216 : vector<8x32xf32>
    %219 = arith.divf %217, %218 : vector<8x32xf32>
    %220 = vector.extract_strided_slice %208 {offsets = [0, 32], sizes = [8, 32], strides = [1, 1]} : vector<8x128xf32> to vector<8x32xf32>
    %221 = vector.extract_strided_slice %211 {offsets = [0, 32], sizes = [8, 32], strides = [1, 1]} : vector<8x128xf32> to vector<8x32xf32>
    %222 = arith.addf %220, %221 : vector<8x32xf32>
    %223 = arith.negf %222 : vector<8x32xf32>
    %224 = math.exp %223 : vector<8x32xf32>
    %cst_60 = arith.constant 1.000000e+00 : f32
    %225 = vector.broadcast %cst_60 : f32 to vector<8x32xf32>
    %226 = arith.addf %225, %224 : vector<8x32xf32>
    %227 = arith.divf %225, %226 : vector<8x32xf32>
    %228 = vector.extract_strided_slice %208 {offsets = [0, 64], sizes = [8, 32], strides = [1, 1]} : vector<8x128xf32> to vector<8x32xf32>
    %229 = vector.extract_strided_slice %211 {offsets = [0, 64], sizes = [8, 32], strides = [1, 1]} : vector<8x128xf32> to vector<8x32xf32>
    %230 = vector.broadcast %3 : vector<1x32xf32> to vector<8x32xf32>
    %231 = arith.addf %229, %230 : vector<8x32xf32>
    %232 = arith.mulf %219, %231 : vector<8x32xf32>
    %233 = arith.addf %228, %232 : vector<8x32xf32>
    %234 = math.tanh %233 : vector<8x32xf32>
    %cst_61 = arith.constant 1.000000e+00 : f32
    %235 = vector.broadcast %cst_61 : f32 to vector<8x32xf32>
    %236 = arith.subf %235, %227 : vector<8x32xf32>
    %237 = arith.mulf %236, %234 : vector<8x32xf32>
    %238 = arith.mulf %227, %199 : vector<8x32xf32>
    %239 = arith.addf %237, %238 : vector<8x32xf32>
    %240 = arith.truncf %239 : vector<8x32xf32> to vector<8x32xbf16>
    %241 = arith.index_cast %c5_i32 : i32 to index
    %c0_62 = arith.constant 0 : index
    %c0_63 = arith.constant 0 : index
    %242 = vector.load %arg5[%241, %c0_62, %c0_63] : memref<8x8x32xbf16, #tpu.memory_space<vmem>>, vector<1x8x32xbf16>
    %243 = vector.shape_cast %242 : vector<1x8x32xbf16> to vector<8x32xbf16>
    %244 = vector.shape_cast %240 : vector<8x32xbf16> to vector<1x8x32xbf16>
    tpu.vector_store %arg5[%241, %c0_62, %c0_63], %244 {strides = array<i32>} : memref<8x8x32xbf16, #tpu.memory_space<vmem>>, vector<1x8x32xbf16>,
    %c6_i32 = arith.constant 6 : i32
    %245 = arith.index_cast %c6_i32 : i32 to index
    %c0_64 = arith.constant 0 : index
    %c0_65 = arith.constant 0 : index
    %246 = vector.load %arg1[%245, %c0_64, %c0_65] : memref<8x8x128xbf16, #tpu.memory_space<vmem>>, vector<1x8x128xbf16>
    %247 = vector.shape_cast %246 : vector<1x8x128xbf16> to vector<8x128xbf16>
    %248 = arith.extf %247 : vector<8x128xbf16> to vector<8x128xf32>
    %249 = arith.truncf %239 : vector<8x32xf32> to vector<8x32xbf16>
    %c0_66 = arith.constant 0 : index
    %c0_67 = arith.constant 0 : index
    %250 = vector.load %arg3[%c0_66, %c0_67] : memref<32x128xbf16, #tpu.memory_space<vmem>>, vector<32x128xbf16>
    %cst_68 = arith.constant dense<0.000000e+00> : vector<8x128xf32>
    %251 = tpu.matmul %249, %250, %cst_68 {dimension_numbers = #tpu.dot_dimension_numbers<[1], [0], [0], [1], [0, 0, 1, 1], [], []>} : vector<8x32xbf16>, vector<32x128xbf16>, vector<8x128xf32> -> vector<8x128xf32>
    %252 = vector.extract_strided_slice %248 {offsets = [0, 0], sizes = [8, 32], strides = [1, 1]} : vector<8x128xf32> to vector<8x32xf32>
    %253 = vector.extract_strided_slice %251 {offsets = [0, 0], sizes = [8, 32], strides = [1, 1]} : vector<8x128xf32> to vector<8x32xf32>
    %254 = arith.addf %252, %253 : vector<8x32xf32>
    %255 = arith.negf %254 : vector<8x32xf32>
    %256 = math.exp %255 : vector<8x32xf32>
    %cst_69 = arith.constant 1.000000e+00 : f32
    %257 = vector.broadcast %cst_69 : f32 to vector<8x32xf32>
    %258 = arith.addf %257, %256 : vector<8x32xf32>
    %259 = arith.divf %257, %258 : vector<8x32xf32>
    %260 = vector.extract_strided_slice %248 {offsets = [0, 32], sizes = [8, 32], strides = [1, 1]} : vector<8x128xf32> to vector<8x32xf32>
    %261 = vector.extract_strided_slice %251 {offsets = [0, 32], sizes = [8, 32], strides = [1, 1]} : vector<8x128xf32> to vector<8x32xf32>
    %262 = arith.addf %260, %261 : vector<8x32xf32>
    %263 = arith.negf %262 : vector<8x32xf32>
    %264 = math.exp %263 : vector<8x32xf32>
    %cst_70 = arith.constant 1.000000e+00 : f32
    %265 = vector.broadcast %cst_70 : f32 to vector<8x32xf32>
    %266 = arith.addf %265, %264 : vector<8x32xf32>
    %267 = arith.divf %265, %266 : vector<8x32xf32>
    %268 = vector.extract_strided_slice %248 {offsets = [0, 64], sizes = [8, 32], strides = [1, 1]} : vector<8x128xf32> to vector<8x32xf32>
    %269 = vector.extract_strided_slice %251 {offsets = [0, 64], sizes = [8, 32], strides = [1, 1]} : vector<8x128xf32> to vector<8x32xf32>
    %270 = vector.broadcast %3 : vector<1x32xf32> to vector<8x32xf32>
    %271 = arith.addf %269, %270 : vector<8x32xf32>
    %272 = arith.mulf %259, %271 : vector<8x32xf32>
    %273 = arith.addf %268, %272 : vector<8x32xf32>
    %274 = math.tanh %273 : vector<8x32xf32>
    %cst_71 = arith.constant 1.000000e+00 : f32
    %275 = vector.broadcast %cst_71 : f32 to vector<8x32xf32>
    %276 = arith.subf %275, %267 : vector<8x32xf32>
    %277 = arith.mulf %276, %274 : vector<8x32xf32>
    %278 = arith.mulf %267, %239 : vector<8x32xf32>
    %279 = arith.addf %277, %278 : vector<8x32xf32>
    %280 = arith.truncf %279 : vector<8x32xf32> to vector<8x32xbf16>
    %281 = arith.index_cast %c6_i32 : i32 to index
    %c0_72 = arith.constant 0 : index
    %c0_73 = arith.constant 0 : index
    %282 = vector.load %arg5[%281, %c0_72, %c0_73] : memref<8x8x32xbf16, #tpu.memory_space<vmem>>, vector<1x8x32xbf16>
    %283 = vector.shape_cast %282 : vector<1x8x32xbf16> to vector<8x32xbf16>
    %284 = vector.shape_cast %280 : vector<8x32xbf16> to vector<1x8x32xbf16>
    tpu.vector_store %arg5[%281, %c0_72, %c0_73], %284 {strides = array<i32>} : memref<8x8x32xbf16, #tpu.memory_space<vmem>>, vector<1x8x32xbf16>,
    %c7_i32 = arith.constant 7 : i32
    %285 = arith.index_cast %c7_i32 : i32 to index
    %c0_74 = arith.constant 0 : index
    %c0_75 = arith.constant 0 : index
    %286 = vector.load %arg1[%285, %c0_74, %c0_75] : memref<8x8x128xbf16, #tpu.memory_space<vmem>>, vector<1x8x128xbf16>
    %287 = vector.shape_cast %286 : vector<1x8x128xbf16> to vector<8x128xbf16>
    %288 = arith.extf %287 : vector<8x128xbf16> to vector<8x128xf32>
    %289 = arith.truncf %279 : vector<8x32xf32> to vector<8x32xbf16>
    %c0_76 = arith.constant 0 : index
    %c0_77 = arith.constant 0 : index
    %290 = vector.load %arg3[%c0_76, %c0_77] : memref<32x128xbf16, #tpu.memory_space<vmem>>, vector<32x128xbf16>
    %cst_78 = arith.constant dense<0.000000e+00> : vector<8x128xf32>
    %291 = tpu.matmul %289, %290, %cst_78 {dimension_numbers = #tpu.dot_dimension_numbers<[1], [0], [0], [1], [0, 0, 1, 1], [], []>} : vector<8x32xbf16>, vector<32x128xbf16>, vector<8x128xf32> -> vector<8x128xf32>
    %292 = vector.extract_strided_slice %288 {offsets = [0, 0], sizes = [8, 32], strides = [1, 1]} : vector<8x128xf32> to vector<8x32xf32>
    %293 = vector.extract_strided_slice %291 {offsets = [0, 0], sizes = [8, 32], strides = [1, 1]} : vector<8x128xf32> to vector<8x32xf32>
    %294 = arith.addf %292, %293 : vector<8x32xf32>
    %295 = arith.negf %294 : vector<8x32xf32>
    %296 = math.exp %295 : vector<8x32xf32>
    %cst_79 = arith.constant 1.000000e+00 : f32
    %297 = vector.broadcast %cst_79 : f32 to vector<8x32xf32>
    %298 = arith.addf %297, %296 : vector<8x32xf32>
    %299 = arith.divf %297, %298 : vector<8x32xf32>
    %300 = vector.extract_strided_slice %288 {offsets = [0, 32], sizes = [8, 32], strides = [1, 1]} : vector<8x128xf32> to vector<8x32xf32>
    %301 = vector.extract_strided_slice %291 {offsets = [0, 32], sizes = [8, 32], strides = [1, 1]} : vector<8x128xf32> to vector<8x32xf32>
    %302 = arith.addf %300, %301 : vector<8x32xf32>
    %303 = arith.negf %302 : vector<8x32xf32>
    %304 = math.exp %303 : vector<8x32xf32>
    %cst_80 = arith.constant 1.000000e+00 : f32
    %305 = vector.broadcast %cst_80 : f32 to vector<8x32xf32>
    %306 = arith.addf %305, %304 : vector<8x32xf32>
    %307 = arith.divf %305, %306 : vector<8x32xf32>
    %308 = vector.extract_strided_slice %288 {offsets = [0, 64], sizes = [8, 32], strides = [1, 1]} : vector<8x128xf32> to vector<8x32xf32>
    %309 = vector.extract_strided_slice %291 {offsets = [0, 64], sizes = [8, 32], strides = [1, 1]} : vector<8x128xf32> to vector<8x32xf32>
    %310 = vector.broadcast %3 : vector<1x32xf32> to vector<8x32xf32>
    %311 = arith.addf %309, %310 : vector<8x32xf32>
    %312 = arith.mulf %299, %311 : vector<8x32xf32>
    %313 = arith.addf %308, %312 : vector<8x32xf32>
    %314 = math.tanh %313 : vector<8x32xf32>
    %cst_81 = arith.constant 1.000000e+00 : f32
    %315 = vector.broadcast %cst_81 : f32 to vector<8x32xf32>
    %316 = arith.subf %315, %307 : vector<8x32xf32>
    %317 = arith.mulf %316, %314 : vector<8x32xf32>
    %318 = arith.mulf %307, %279 : vector<8x32xf32>
    %319 = arith.addf %317, %318 : vector<8x32xf32>
    %320 = arith.truncf %319 : vector<8x32xf32> to vector<8x32xbf16>
    %321 = arith.index_cast %c7_i32 : i32 to index
    %c0_82 = arith.constant 0 : index
    %c0_83 = arith.constant 0 : index
    %322 = vector.load %arg5[%321, %c0_82, %c0_83] : memref<8x8x32xbf16, #tpu.memory_space<vmem>>, vector<1x8x32xbf16>
    %323 = vector.shape_cast %322 : vector<1x8x32xbf16> to vector<8x32xbf16>
    %324 = vector.shape_cast %320 : vector<8x32xbf16> to vector<1x8x32xbf16>
    tpu.vector_store %arg5[%321, %c0_82, %c0_83], %324 {strides = array<i32>} : memref<8x8x32xbf16, #tpu.memory_space<vmem>>, vector<1x8x32xbf16>,
    %c8_i32 = arith.constant 8 : i32
    %c0_84 = arith.constant 0 : index
    %c0_85 = arith.constant 0 : index
    %325 = vector.load %arg6[%c0_84, %c0_85] : memref<8x32xf32, #tpu.memory_space<vmem>>, vector<8x32xf32>
    tpu.vector_store %arg6[%c0_84, %c0_85], %319 {strides = array<i32>} : memref<8x32xf32, #tpu.memory_space<vmem>>, vector<8x32xf32>,
    return
  }
  func.func @transform_0(%arg0: i32) -> (i32, i32, i32) {
    %c0_i32 = arith.constant 0 : i32
    %c0_i32_0 = arith.constant 0 : i32
    %c0_i32_1 = arith.constant 0 : i32
    return %arg0, %c0_i32, %c0_i32_0 : i32, i32, i32
  }
  func.func @transform_1(%arg0: i32) -> (i32, i32) {
    %c0_i32 = arith.constant 0 : i32
    %c0_i32_0 = arith.constant 0 : i32
    %c0_i32_1 = arith.constant 0 : i32
    return %c0_i32, %c0_i32_0 : i32, i32
  }
  func.func @transform_2(%arg0: i32) -> (i32, i32) {
    %c0_i32 = arith.constant 0 : i32
    %c0_i32_0 = arith.constant 0 : i32
    %c0_i32_1 = arith.constant 0 : i32
    return %c0_i32, %c0_i32_0 : i32, i32
  }
  func.func @transform_3(%arg0: i32) -> (i32, i32) {
    %c0_i32 = arith.constant 0 : i32
    %c0_i32_0 = arith.constant 0 : i32
    %c0_i32_1 = arith.constant 0 : i32
    return %c0_i32, %c0_i32_0 : i32, i32
  }
  func.func @transform_4(%arg0: i32) -> (i32, i32, i32) {
    %c0_i32 = arith.constant 0 : i32
    %c0_i32_0 = arith.constant 0 : i32
    %c0_i32_1 = arith.constant 0 : i32
    return %arg0, %c0_i32, %c0_i32_0 : i32, i32, i32
  }
}

module attributes {stable_mosaic.version = 11 : i64} {
  func.func @_dilated_gru_kernel(%arg0: i32, %arg1: memref<4x16x32xbf16, #tpu.memory_space<vmem>>, %arg2: memref<2x32x128xbf16, #tpu.memory_space<any>>, %arg3: memref<2x32x128xbf16, #tpu.memory_space<any>>, %arg4: memref<2x1x128xf32, #tpu.memory_space<vmem>>, %arg5: memref<2x1x32xf32, #tpu.memory_space<vmem>>, %arg6: memref<4x16x32xf32, #tpu.memory_space<vmem>>, %arg7: memref<2x16x32xf32, #tpu.memory_space<vmem>>, %arg8: memref<2x32x128xbf16, #tpu.memory_space<vmem>>, %arg9: memref<2x32x128xbf16, #tpu.memory_space<vmem>>, %arg10: memref<4x16x128xf32, #tpu.memory_space<vmem>>, %arg11: memref<2x16x32xf32, #tpu.memory_space<vmem>>) attributes {dimension_semantics = [#tpu.dimension_semantics<arbitrary>], iteration_bounds = array<i64: 1>, scalar_prefetch = 0 : i64, scratch_operands = 4 : i64, tpu.core_type = #tpu.core_type<tc>, window_params = [{transform_indices = @transform_0, window_bounds = array<i64: 4, 16, 32>}, {}, {}, {pipeline_mode = #tpu.pipeline_mode<synchronous>, transform_indices = @transform_3, window_bounds = array<i64: 2, 1, 128>}, {pipeline_mode = #tpu.pipeline_mode<synchronous>, transform_indices = @transform_4, window_bounds = array<i64: 2, 1, 32>}, {transform_indices = @transform_5, window_bounds = array<i64: 4, 16, 32>}, {pipeline_mode = #tpu.pipeline_mode<synchronous>, transform_indices = @transform_6, window_bounds = array<i64: 2, 16, 32>}]} {
    %c0_i32 = arith.constant 0 : i32
    %0 = arith.cmpi eq, %arg0, %c0_i32 : i32
    %1 = arith.extui %0 : i1 to i32
    %c0_i32_0 = arith.constant 0 : i32
    %2 = arith.cmpi ne, %1, %c0_i32_0 : i32
    scf.if %2 {
      %cst_142 = arith.constant 0.000000e+00 : f32
      %366 = vector.broadcast %cst_142 : f32 to vector<2x16x32xf32>
      %c0_143 = arith.constant 0 : index
      %c0_144 = arith.constant 0 : index
      %c0_145 = arith.constant 0 : index
      %367 = vector.load %arg11[%c0_143, %c0_144, %c0_145] : memref<2x16x32xf32, #tpu.memory_space<vmem>>, vector<2x16x32xf32>
      tpu.vector_store %arg11[%c0_143, %c0_144, %c0_145], %366 {strides = array<i32>} : memref<2x16x32xf32, #tpu.memory_space<vmem>>, vector<2x16x32xf32>,
      "tpu.region"() ({
        %368 = tpu.sem_alloc : memref<!tpu.dma_semaphore, #tpu.memory_space<semaphore_mem>>
        tpu.enqueue_dma source(%arg2 : memref<2x32x128xbf16, #tpu.memory_space<any>>) target(%arg8 : memref<2x32x128xbf16, #tpu.memory_space<vmem>>) target_semaphore(%368 : memref<!tpu.dma_semaphore, #tpu.memory_space<semaphore_mem>>)
        tpu.wait_dma2 semaphore(%368 : memref<!tpu.dma_semaphore, #tpu.memory_space<semaphore_mem>>) src(%arg2 : memref<2x32x128xbf16, #tpu.memory_space<any>>) dst(%arg8 : memref<2x32x128xbf16, #tpu.memory_space<vmem>>)
        tpu.yield
      }) : () -> ()
      "tpu.region"() ({
        %368 = tpu.sem_alloc : memref<!tpu.dma_semaphore, #tpu.memory_space<semaphore_mem>>
        tpu.enqueue_dma source(%arg3 : memref<2x32x128xbf16, #tpu.memory_space<any>>) target(%arg9 : memref<2x32x128xbf16, #tpu.memory_space<vmem>>) target_semaphore(%368 : memref<!tpu.dma_semaphore, #tpu.memory_space<semaphore_mem>>)
        tpu.wait_dma2 semaphore(%368 : memref<!tpu.dma_semaphore, #tpu.memory_space<semaphore_mem>>) src(%arg3 : memref<2x32x128xbf16, #tpu.memory_space<any>>) dst(%arg9 : memref<2x32x128xbf16, #tpu.memory_space<vmem>>)
        tpu.yield
      }) : () -> ()
    } else {
    }
    %c0 = arith.constant 0 : index
    %c0_1 = arith.constant 0 : index
    %c0_2 = arith.constant 0 : index
    %3 = vector.load %arg8[%c0, %c0_1, %c0_2] : memref<2x32x128xbf16, #tpu.memory_space<vmem>>, vector<1x32x128xbf16>
    %4 = vector.shape_cast %3 : vector<1x32x128xbf16> to vector<32x128xbf16>
    %c0_3 = arith.constant 0 : index
    %c0_4 = arith.constant 0 : index
    %c0_5 = arith.constant 0 : index
    %5 = vector.load %arg4[%c0_3, %c0_4, %c0_5] : memref<2x1x128xf32, #tpu.memory_space<vmem>>, vector<1x1x128xf32>
    %6 = vector.shape_cast %5 : vector<1x1x128xf32> to vector<1x128xf32>
    %c0_6 = arith.constant 0 : index
    %c0_7 = arith.constant 0 : index
    %c0_8 = arith.constant 0 : index
    %7 = vector.load %arg1[%c0_6, %c0_7, %c0_8] : memref<4x16x32xbf16, #tpu.memory_space<vmem>>, vector<1x16x32xbf16>
    %8 = vector.shape_cast %7 : vector<1x16x32xbf16> to vector<16x32xbf16>
    %cst = arith.constant dense<0.000000e+00> : vector<16x128xf32>
    %9 = tpu.matmul %8, %4, %cst {dimension_numbers = #tpu.dot_dimension_numbers<[1], [0], [0], [1], [0, 0, 1, 1], [], []>} : vector<16x32xbf16>, vector<32x128xbf16>, vector<16x128xf32> -> vector<16x128xf32>
    %10 = vector.broadcast %6 : vector<1x128xf32> to vector<16x128xf32>
    %11 = arith.addf %9, %10 : vector<16x128xf32>
    %c0_9 = arith.constant 0 : index
    %c0_10 = arith.constant 0 : index
    %c0_11 = arith.constant 0 : index
    %12 = vector.load %arg10[%c0_9, %c0_10, %c0_11] : memref<4x16x128xf32, #tpu.memory_space<vmem>>, vector<1x16x128xf32>
    %13 = vector.shape_cast %12 : vector<1x16x128xf32> to vector<16x128xf32>
    %14 = vector.shape_cast %11 : vector<16x128xf32> to vector<1x16x128xf32>
    tpu.vector_store %arg10[%c0_9, %c0_10, %c0_11], %14 {strides = array<i32>} : memref<4x16x128xf32, #tpu.memory_space<vmem>>, vector<1x16x128xf32>,
    %c1 = arith.constant 1 : index
    %c0_12 = arith.constant 0 : index
    %c0_13 = arith.constant 0 : index
    %15 = vector.load %arg1[%c1, %c0_12, %c0_13] : memref<4x16x32xbf16, #tpu.memory_space<vmem>>, vector<1x16x32xbf16>
    %16 = vector.shape_cast %15 : vector<1x16x32xbf16> to vector<16x32xbf16>
    %cst_14 = arith.constant dense<0.000000e+00> : vector<16x128xf32>
    %17 = tpu.matmul %16, %4, %cst_14 {dimension_numbers = #tpu.dot_dimension_numbers<[1], [0], [0], [1], [0, 0, 1, 1], [], []>} : vector<16x32xbf16>, vector<32x128xbf16>, vector<16x128xf32> -> vector<16x128xf32>
    %18 = vector.broadcast %6 : vector<1x128xf32> to vector<16x128xf32>
    %19 = arith.addf %17, %18 : vector<16x128xf32>
    %c1_15 = arith.constant 1 : index
    %c0_16 = arith.constant 0 : index
    %c0_17 = arith.constant 0 : index
    %20 = vector.load %arg10[%c1_15, %c0_16, %c0_17] : memref<4x16x128xf32, #tpu.memory_space<vmem>>, vector<1x16x128xf32>
    %21 = vector.shape_cast %20 : vector<1x16x128xf32> to vector<16x128xf32>
    %22 = vector.shape_cast %19 : vector<16x128xf32> to vector<1x16x128xf32>
    tpu.vector_store %arg10[%c1_15, %c0_16, %c0_17], %22 {strides = array<i32>} : memref<4x16x128xf32, #tpu.memory_space<vmem>>, vector<1x16x128xf32>,
    %c2 = arith.constant 2 : index
    %c0_18 = arith.constant 0 : index
    %c0_19 = arith.constant 0 : index
    %23 = vector.load %arg1[%c2, %c0_18, %c0_19] : memref<4x16x32xbf16, #tpu.memory_space<vmem>>, vector<1x16x32xbf16>
    %24 = vector.shape_cast %23 : vector<1x16x32xbf16> to vector<16x32xbf16>
    %cst_20 = arith.constant dense<0.000000e+00> : vector<16x128xf32>
    %25 = tpu.matmul %24, %4, %cst_20 {dimension_numbers = #tpu.dot_dimension_numbers<[1], [0], [0], [1], [0, 0, 1, 1], [], []>} : vector<16x32xbf16>, vector<32x128xbf16>, vector<16x128xf32> -> vector<16x128xf32>
    %26 = vector.broadcast %6 : vector<1x128xf32> to vector<16x128xf32>
    %27 = arith.addf %25, %26 : vector<16x128xf32>
    %c2_21 = arith.constant 2 : index
    %c0_22 = arith.constant 0 : index
    %c0_23 = arith.constant 0 : index
    %28 = vector.load %arg10[%c2_21, %c0_22, %c0_23] : memref<4x16x128xf32, #tpu.memory_space<vmem>>, vector<1x16x128xf32>
    %29 = vector.shape_cast %28 : vector<1x16x128xf32> to vector<16x128xf32>
    %30 = vector.shape_cast %27 : vector<16x128xf32> to vector<1x16x128xf32>
    tpu.vector_store %arg10[%c2_21, %c0_22, %c0_23], %30 {strides = array<i32>} : memref<4x16x128xf32, #tpu.memory_space<vmem>>, vector<1x16x128xf32>,
    %c3 = arith.constant 3 : index
    %c0_24 = arith.constant 0 : index
    %c0_25 = arith.constant 0 : index
    %31 = vector.load %arg1[%c3, %c0_24, %c0_25] : memref<4x16x32xbf16, #tpu.memory_space<vmem>>, vector<1x16x32xbf16>
    %32 = vector.shape_cast %31 : vector<1x16x32xbf16> to vector<16x32xbf16>
    %cst_26 = arith.constant dense<0.000000e+00> : vector<16x128xf32>
    %33 = tpu.matmul %32, %4, %cst_26 {dimension_numbers = #tpu.dot_dimension_numbers<[1], [0], [0], [1], [0, 0, 1, 1], [], []>} : vector<16x32xbf16>, vector<32x128xbf16>, vector<16x128xf32> -> vector<16x128xf32>
    %34 = vector.broadcast %6 : vector<1x128xf32> to vector<16x128xf32>
    %35 = arith.addf %33, %34 : vector<16x128xf32>
    %c3_27 = arith.constant 3 : index
    %c0_28 = arith.constant 0 : index
    %c0_29 = arith.constant 0 : index
    %36 = vector.load %arg10[%c3_27, %c0_28, %c0_29] : memref<4x16x128xf32, #tpu.memory_space<vmem>>, vector<1x16x128xf32>
    %37 = vector.shape_cast %36 : vector<1x16x128xf32> to vector<16x128xf32>
    %38 = vector.shape_cast %35 : vector<16x128xf32> to vector<1x16x128xf32>
    tpu.vector_store %arg10[%c3_27, %c0_28, %c0_29], %38 {strides = array<i32>} : memref<4x16x128xf32, #tpu.memory_space<vmem>>, vector<1x16x128xf32>,
    %c1_30 = arith.constant 1 : index
    %c0_31 = arith.constant 0 : index
    %c0_32 = arith.constant 0 : index
    %39 = vector.load %arg4[%c1_30, %c0_31, %c0_32] : memref<2x1x128xf32, #tpu.memory_space<vmem>>, vector<1x1x128xf32>
    %40 = vector.shape_cast %39 : vector<1x1x128xf32> to vector<1x128xf32>
    %c0_33 = arith.constant 0 : index
    %c0_34 = arith.constant 0 : index
    %c0_35 = arith.constant 0 : index
    %41 = vector.load %arg5[%c0_33, %c0_34, %c0_35] : memref<2x1x32xf32, #tpu.memory_space<vmem>>, vector<1x1x32xf32>
    %42 = vector.shape_cast %41 : vector<1x1x32xf32> to vector<1x32xf32>
    %c1_36 = arith.constant 1 : index
    %c0_37 = arith.constant 0 : index
    %c0_38 = arith.constant 0 : index
    %43 = vector.load %arg5[%c1_36, %c0_37, %c0_38] : memref<2x1x32xf32, #tpu.memory_space<vmem>>, vector<1x1x32xf32>
    %44 = vector.shape_cast %43 : vector<1x1x32xf32> to vector<1x32xf32>
    %c0_39 = arith.constant 0 : index
    %c0_40 = arith.constant 0 : index
    %c0_41 = arith.constant 0 : index
    %45 = vector.load %arg11[%c0_39, %c0_40, %c0_41] : memref<2x16x32xf32, #tpu.memory_space<vmem>>, vector<1x16x32xf32>
    %46 = vector.shape_cast %45 : vector<1x16x32xf32> to vector<16x32xf32>
    %c1_42 = arith.constant 1 : index
    %c0_43 = arith.constant 0 : index
    %c0_44 = arith.constant 0 : index
    %47 = vector.load %arg11[%c1_42, %c0_43, %c0_44] : memref<2x16x32xf32, #tpu.memory_space<vmem>>, vector<1x16x32xf32>
    %48 = vector.shape_cast %47 : vector<1x16x32xf32> to vector<16x32xf32>
    %c0_i32_45 = arith.constant 0 : i32
    %49 = arith.index_cast %c0_i32_45 : i32 to index
    %c0_46 = arith.constant 0 : index
    %c0_47 = arith.constant 0 : index
    %50 = vector.load %arg10[%49, %c0_46, %c0_47] : memref<4x16x128xf32, #tpu.memory_space<vmem>>, vector<1x16x128xf32>
    %51 = vector.shape_cast %50 : vector<1x16x128xf32> to vector<16x128xf32>
    %52 = arith.truncf %46 : vector<16x32xf32> to vector<16x32xbf16>
    %c0_48 = arith.constant 0 : index
    %c0_49 = arith.constant 0 : index
    %c0_50 = arith.constant 0 : index
    %53 = vector.load %arg9[%c0_48, %c0_49, %c0_50] : memref<2x32x128xbf16, #tpu.memory_space<vmem>>, vector<1x32x128xbf16>
    %54 = vector.shape_cast %53 : vector<1x32x128xbf16> to vector<32x128xbf16>
    %cst_51 = arith.constant dense<0.000000e+00> : vector<16x128xf32>
    %55 = tpu.matmul %52, %54, %cst_51 {dimension_numbers = #tpu.dot_dimension_numbers<[1], [0], [0], [1], [0, 0, 1, 1], [], []>} : vector<16x32xbf16>, vector<32x128xbf16>, vector<16x128xf32> -> vector<16x128xf32>
    %56 = vector.extract_strided_slice %51 {offsets = [0, 0], sizes = [16, 32], strides = [1, 1]} : vector<16x128xf32> to vector<16x32xf32>
    %57 = vector.extract_strided_slice %55 {offsets = [0, 0], sizes = [16, 32], strides = [1, 1]} : vector<16x128xf32> to vector<16x32xf32>
    %58 = arith.addf %56, %57 : vector<16x32xf32>
    %59 = arith.negf %58 : vector<16x32xf32>
    %60 = math.exp %59 : vector<16x32xf32>
    %cst_52 = arith.constant 1.000000e+00 : f32
    %61 = vector.broadcast %cst_52 : f32 to vector<16x32xf32>
    %62 = arith.addf %61, %60 : vector<16x32xf32>
    %63 = arith.divf %61, %62 : vector<16x32xf32>
    %64 = vector.extract_strided_slice %51 {offsets = [0, 32], sizes = [16, 32], strides = [1, 1]} : vector<16x128xf32> to vector<16x32xf32>
    %65 = vector.extract_strided_slice %55 {offsets = [0, 32], sizes = [16, 32], strides = [1, 1]} : vector<16x128xf32> to vector<16x32xf32>
    %66 = arith.addf %64, %65 : vector<16x32xf32>
    %67 = arith.negf %66 : vector<16x32xf32>
    %68 = math.exp %67 : vector<16x32xf32>
    %cst_53 = arith.constant 1.000000e+00 : f32
    %69 = vector.broadcast %cst_53 : f32 to vector<16x32xf32>
    %70 = arith.addf %69, %68 : vector<16x32xf32>
    %71 = arith.divf %69, %70 : vector<16x32xf32>
    %72 = vector.extract_strided_slice %51 {offsets = [0, 64], sizes = [16, 32], strides = [1, 1]} : vector<16x128xf32> to vector<16x32xf32>
    %73 = vector.extract_strided_slice %55 {offsets = [0, 64], sizes = [16, 32], strides = [1, 1]} : vector<16x128xf32> to vector<16x32xf32>
    %74 = vector.broadcast %42 : vector<1x32xf32> to vector<16x32xf32>
    %75 = arith.addf %73, %74 : vector<16x32xf32>
    %76 = arith.mulf %63, %75 : vector<16x32xf32>
    %77 = arith.addf %72, %76 : vector<16x32xf32>
    %78 = math.tanh %77 : vector<16x32xf32>
    %cst_54 = arith.constant 1.000000e+00 : f32
    %79 = vector.broadcast %cst_54 : f32 to vector<16x32xf32>
    %80 = arith.subf %79, %71 : vector<16x32xf32>
    %81 = arith.mulf %80, %78 : vector<16x32xf32>
    %82 = arith.mulf %71, %46 : vector<16x32xf32>
    %83 = arith.addf %81, %82 : vector<16x32xf32>
    %84 = arith.truncf %83 : vector<16x32xf32> to vector<16x32xbf16>
    %c1_55 = arith.constant 1 : index
    %c0_56 = arith.constant 0 : index
    %c0_57 = arith.constant 0 : index
    %85 = vector.load %arg8[%c1_55, %c0_56, %c0_57] : memref<2x32x128xbf16, #tpu.memory_space<vmem>>, vector<1x32x128xbf16>
    %86 = vector.shape_cast %85 : vector<1x32x128xbf16> to vector<32x128xbf16>
    %cst_58 = arith.constant dense<0.000000e+00> : vector<16x128xf32>
    %87 = tpu.matmul %84, %86, %cst_58 {dimension_numbers = #tpu.dot_dimension_numbers<[1], [0], [0], [1], [0, 0, 1, 1], [], []>} : vector<16x32xbf16>, vector<32x128xbf16>, vector<16x128xf32> -> vector<16x128xf32>
    %88 = vector.broadcast %40 : vector<1x128xf32> to vector<16x128xf32>
    %89 = arith.addf %87, %88 : vector<16x128xf32>
    %90 = arith.truncf %48 : vector<16x32xf32> to vector<16x32xbf16>
    %c1_59 = arith.constant 1 : index
    %c0_60 = arith.constant 0 : index
    %c0_61 = arith.constant 0 : index
    %91 = vector.load %arg9[%c1_59, %c0_60, %c0_61] : memref<2x32x128xbf16, #tpu.memory_space<vmem>>, vector<1x32x128xbf16>
    %92 = vector.shape_cast %91 : vector<1x32x128xbf16> to vector<32x128xbf16>
    %cst_62 = arith.constant dense<0.000000e+00> : vector<16x128xf32>
    %93 = tpu.matmul %90, %92, %cst_62 {dimension_numbers = #tpu.dot_dimension_numbers<[1], [0], [0], [1], [0, 0, 1, 1], [], []>} : vector<16x32xbf16>, vector<32x128xbf16>, vector<16x128xf32> -> vector<16x128xf32>
    %94 = vector.extract_strided_slice %89 {offsets = [0, 0], sizes = [16, 32], strides = [1, 1]} : vector<16x128xf32> to vector<16x32xf32>
    %95 = vector.extract_strided_slice %93 {offsets = [0, 0], sizes = [16, 32], strides = [1, 1]} : vector<16x128xf32> to vector<16x32xf32>
    %96 = arith.addf %94, %95 : vector<16x32xf32>
    %97 = arith.negf %96 : vector<16x32xf32>
    %98 = math.exp %97 : vector<16x32xf32>
    %cst_63 = arith.constant 1.000000e+00 : f32
    %99 = vector.broadcast %cst_63 : f32 to vector<16x32xf32>
    %100 = arith.addf %99, %98 : vector<16x32xf32>
    %101 = arith.divf %99, %100 : vector<16x32xf32>
    %102 = vector.extract_strided_slice %89 {offsets = [0, 32], sizes = [16, 32], strides = [1, 1]} : vector<16x128xf32> to vector<16x32xf32>
    %103 = vector.extract_strided_slice %93 {offsets = [0, 32], sizes = [16, 32], strides = [1, 1]} : vector<16x128xf32> to vector<16x32xf32>
    %104 = arith.addf %102, %103 : vector<16x32xf32>
    %105 = arith.negf %104 : vector<16x32xf32>
    %106 = math.exp %105 : vector<16x32xf32>
    %cst_64 = arith.constant 1.000000e+00 : f32
    %107 = vector.broadcast %cst_64 : f32 to vector<16x32xf32>
    %108 = arith.addf %107, %106 : vector<16x32xf32>
    %109 = arith.divf %107, %108 : vector<16x32xf32>
    %110 = vector.extract_strided_slice %89 {offsets = [0, 64], sizes = [16, 32], strides = [1, 1]} : vector<16x128xf32> to vector<16x32xf32>
    %111 = vector.extract_strided_slice %93 {offsets = [0, 64], sizes = [16, 32], strides = [1, 1]} : vector<16x128xf32> to vector<16x32xf32>
    %112 = vector.broadcast %44 : vector<1x32xf32> to vector<16x32xf32>
    %113 = arith.addf %111, %112 : vector<16x32xf32>
    %114 = arith.mulf %101, %113 : vector<16x32xf32>
    %115 = arith.addf %110, %114 : vector<16x32xf32>
    %116 = math.tanh %115 : vector<16x32xf32>
    %cst_65 = arith.constant 1.000000e+00 : f32
    %117 = vector.broadcast %cst_65 : f32 to vector<16x32xf32>
    %118 = arith.subf %117, %109 : vector<16x32xf32>
    %119 = arith.mulf %118, %116 : vector<16x32xf32>
    %120 = arith.mulf %109, %48 : vector<16x32xf32>
    %121 = arith.addf %119, %120 : vector<16x32xf32>
    %122 = arith.index_cast %c0_i32_45 : i32 to index
    %c0_66 = arith.constant 0 : index
    %c0_67 = arith.constant 0 : index
    %123 = vector.load %arg6[%122, %c0_66, %c0_67] : memref<4x16x32xf32, #tpu.memory_space<vmem>>, vector<1x16x32xf32>
    %124 = vector.shape_cast %123 : vector<1x16x32xf32> to vector<16x32xf32>
    %125 = vector.shape_cast %121 : vector<16x32xf32> to vector<1x16x32xf32>
    tpu.vector_store %arg6[%122, %c0_66, %c0_67], %125 {strides = array<i32>} : memref<4x16x32xf32, #tpu.memory_space<vmem>>, vector<1x16x32xf32>,
    %c1_i32 = arith.constant 1 : i32
    %126 = arith.index_cast %c1_i32 : i32 to index
    %c0_68 = arith.constant 0 : index
    %c0_69 = arith.constant 0 : index
    %127 = vector.load %arg10[%126, %c0_68, %c0_69] : memref<4x16x128xf32, #tpu.memory_space<vmem>>, vector<1x16x128xf32>
    %128 = vector.shape_cast %127 : vector<1x16x128xf32> to vector<16x128xf32>
    %129 = arith.truncf %83 : vector<16x32xf32> to vector<16x32xbf16>
    %c0_70 = arith.constant 0 : index
    %c0_71 = arith.constant 0 : index
    %c0_72 = arith.constant 0 : index
    %130 = vector.load %arg9[%c0_70, %c0_71, %c0_72] : memref<2x32x128xbf16, #tpu.memory_space<vmem>>, vector<1x32x128xbf16>
    %131 = vector.shape_cast %130 : vector<1x32x128xbf16> to vector<32x128xbf16>
    %cst_73 = arith.constant dense<0.000000e+00> : vector<16x128xf32>
    %132 = tpu.matmul %129, %131, %cst_73 {dimension_numbers = #tpu.dot_dimension_numbers<[1], [0], [0], [1], [0, 0, 1, 1], [], []>} : vector<16x32xbf16>, vector<32x128xbf16>, vector<16x128xf32> -> vector<16x128xf32>
    %133 = vector.extract_strided_slice %128 {offsets = [0, 0], sizes = [16, 32], strides = [1, 1]} : vector<16x128xf32> to vector<16x32xf32>
    %134 = vector.extract_strided_slice %132 {offsets = [0, 0], sizes = [16, 32], strides = [1, 1]} : vector<16x128xf32> to vector<16x32xf32>
    %135 = arith.addf %133, %134 : vector<16x32xf32>
    %136 = arith.negf %135 : vector<16x32xf32>
    %137 = math.exp %136 : vector<16x32xf32>
    %cst_74 = arith.constant 1.000000e+00 : f32
    %138 = vector.broadcast %cst_74 : f32 to vector<16x32xf32>
    %139 = arith.addf %138, %137 : vector<16x32xf32>
    %140 = arith.divf %138, %139 : vector<16x32xf32>
    %141 = vector.extract_strided_slice %128 {offsets = [0, 32], sizes = [16, 32], strides = [1, 1]} : vector<16x128xf32> to vector<16x32xf32>
    %142 = vector.extract_strided_slice %132 {offsets = [0, 32], sizes = [16, 32], strides = [1, 1]} : vector<16x128xf32> to vector<16x32xf32>
    %143 = arith.addf %141, %142 : vector<16x32xf32>
    %144 = arith.negf %143 : vector<16x32xf32>
    %145 = math.exp %144 : vector<16x32xf32>
    %cst_75 = arith.constant 1.000000e+00 : f32
    %146 = vector.broadcast %cst_75 : f32 to vector<16x32xf32>
    %147 = arith.addf %146, %145 : vector<16x32xf32>
    %148 = arith.divf %146, %147 : vector<16x32xf32>
    %149 = vector.extract_strided_slice %128 {offsets = [0, 64], sizes = [16, 32], strides = [1, 1]} : vector<16x128xf32> to vector<16x32xf32>
    %150 = vector.extract_strided_slice %132 {offsets = [0, 64], sizes = [16, 32], strides = [1, 1]} : vector<16x128xf32> to vector<16x32xf32>
    %151 = vector.broadcast %42 : vector<1x32xf32> to vector<16x32xf32>
    %152 = arith.addf %150, %151 : vector<16x32xf32>
    %153 = arith.mulf %140, %152 : vector<16x32xf32>
    %154 = arith.addf %149, %153 : vector<16x32xf32>
    %155 = math.tanh %154 : vector<16x32xf32>
    %cst_76 = arith.constant 1.000000e+00 : f32
    %156 = vector.broadcast %cst_76 : f32 to vector<16x32xf32>
    %157 = arith.subf %156, %148 : vector<16x32xf32>
    %158 = arith.mulf %157, %155 : vector<16x32xf32>
    %159 = arith.mulf %148, %83 : vector<16x32xf32>
    %160 = arith.addf %158, %159 : vector<16x32xf32>
    %161 = arith.truncf %160 : vector<16x32xf32> to vector<16x32xbf16>
    %c1_77 = arith.constant 1 : index
    %c0_78 = arith.constant 0 : index
    %c0_79 = arith.constant 0 : index
    %162 = vector.load %arg8[%c1_77, %c0_78, %c0_79] : memref<2x32x128xbf16, #tpu.memory_space<vmem>>, vector<1x32x128xbf16>
    %163 = vector.shape_cast %162 : vector<1x32x128xbf16> to vector<32x128xbf16>
    %cst_80 = arith.constant dense<0.000000e+00> : vector<16x128xf32>
    %164 = tpu.matmul %161, %163, %cst_80 {dimension_numbers = #tpu.dot_dimension_numbers<[1], [0], [0], [1], [0, 0, 1, 1], [], []>} : vector<16x32xbf16>, vector<32x128xbf16>, vector<16x128xf32> -> vector<16x128xf32>
    %165 = vector.broadcast %40 : vector<1x128xf32> to vector<16x128xf32>
    %166 = arith.addf %164, %165 : vector<16x128xf32>
    %167 = arith.truncf %121 : vector<16x32xf32> to vector<16x32xbf16>
    %c1_81 = arith.constant 1 : index
    %c0_82 = arith.constant 0 : index
    %c0_83 = arith.constant 0 : index
    %168 = vector.load %arg9[%c1_81, %c0_82, %c0_83] : memref<2x32x128xbf16, #tpu.memory_space<vmem>>, vector<1x32x128xbf16>
    %169 = vector.shape_cast %168 : vector<1x32x128xbf16> to vector<32x128xbf16>
    %cst_84 = arith.constant dense<0.000000e+00> : vector<16x128xf32>
    %170 = tpu.matmul %167, %169, %cst_84 {dimension_numbers = #tpu.dot_dimension_numbers<[1], [0], [0], [1], [0, 0, 1, 1], [], []>} : vector<16x32xbf16>, vector<32x128xbf16>, vector<16x128xf32> -> vector<16x128xf32>
    %171 = vector.extract_strided_slice %166 {offsets = [0, 0], sizes = [16, 32], strides = [1, 1]} : vector<16x128xf32> to vector<16x32xf32>
    %172 = vector.extract_strided_slice %170 {offsets = [0, 0], sizes = [16, 32], strides = [1, 1]} : vector<16x128xf32> to vector<16x32xf32>
    %173 = arith.addf %171, %172 : vector<16x32xf32>
    %174 = arith.negf %173 : vector<16x32xf32>
    %175 = math.exp %174 : vector<16x32xf32>
    %cst_85 = arith.constant 1.000000e+00 : f32
    %176 = vector.broadcast %cst_85 : f32 to vector<16x32xf32>
    %177 = arith.addf %176, %175 : vector<16x32xf32>
    %178 = arith.divf %176, %177 : vector<16x32xf32>
    %179 = vector.extract_strided_slice %166 {offsets = [0, 32], sizes = [16, 32], strides = [1, 1]} : vector<16x128xf32> to vector<16x32xf32>
    %180 = vector.extract_strided_slice %170 {offsets = [0, 32], sizes = [16, 32], strides = [1, 1]} : vector<16x128xf32> to vector<16x32xf32>
    %181 = arith.addf %179, %180 : vector<16x32xf32>
    %182 = arith.negf %181 : vector<16x32xf32>
    %183 = math.exp %182 : vector<16x32xf32>
    %cst_86 = arith.constant 1.000000e+00 : f32
    %184 = vector.broadcast %cst_86 : f32 to vector<16x32xf32>
    %185 = arith.addf %184, %183 : vector<16x32xf32>
    %186 = arith.divf %184, %185 : vector<16x32xf32>
    %187 = vector.extract_strided_slice %166 {offsets = [0, 64], sizes = [16, 32], strides = [1, 1]} : vector<16x128xf32> to vector<16x32xf32>
    %188 = vector.extract_strided_slice %170 {offsets = [0, 64], sizes = [16, 32], strides = [1, 1]} : vector<16x128xf32> to vector<16x32xf32>
    %189 = vector.broadcast %44 : vector<1x32xf32> to vector<16x32xf32>
    %190 = arith.addf %188, %189 : vector<16x32xf32>
    %191 = arith.mulf %178, %190 : vector<16x32xf32>
    %192 = arith.addf %187, %191 : vector<16x32xf32>
    %193 = math.tanh %192 : vector<16x32xf32>
    %cst_87 = arith.constant 1.000000e+00 : f32
    %194 = vector.broadcast %cst_87 : f32 to vector<16x32xf32>
    %195 = arith.subf %194, %186 : vector<16x32xf32>
    %196 = arith.mulf %195, %193 : vector<16x32xf32>
    %197 = arith.mulf %186, %121 : vector<16x32xf32>
    %198 = arith.addf %196, %197 : vector<16x32xf32>
    %199 = arith.index_cast %c1_i32 : i32 to index
    %c0_88 = arith.constant 0 : index
    %c0_89 = arith.constant 0 : index
    %200 = vector.load %arg6[%199, %c0_88, %c0_89] : memref<4x16x32xf32, #tpu.memory_space<vmem>>, vector<1x16x32xf32>
    %201 = vector.shape_cast %200 : vector<1x16x32xf32> to vector<16x32xf32>
    %202 = vector.shape_cast %198 : vector<16x32xf32> to vector<1x16x32xf32>
    tpu.vector_store %arg6[%199, %c0_88, %c0_89], %202 {strides = array<i32>} : memref<4x16x32xf32, #tpu.memory_space<vmem>>, vector<1x16x32xf32>,
    %c2_i32 = arith.constant 2 : i32
    %203 = arith.index_cast %c2_i32 : i32 to index
    %c0_90 = arith.constant 0 : index
    %c0_91 = arith.constant 0 : index
    %204 = vector.load %arg10[%203, %c0_90, %c0_91] : memref<4x16x128xf32, #tpu.memory_space<vmem>>, vector<1x16x128xf32>
    %205 = vector.shape_cast %204 : vector<1x16x128xf32> to vector<16x128xf32>
    %206 = arith.truncf %160 : vector<16x32xf32> to vector<16x32xbf16>
    %c0_92 = arith.constant 0 : index
    %c0_93 = arith.constant 0 : index
    %c0_94 = arith.constant 0 : index
    %207 = vector.load %arg9[%c0_92, %c0_93, %c0_94] : memref<2x32x128xbf16, #tpu.memory_space<vmem>>, vector<1x32x128xbf16>
    %208 = vector.shape_cast %207 : vector<1x32x128xbf16> to vector<32x128xbf16>
    %cst_95 = arith.constant dense<0.000000e+00> : vector<16x128xf32>
    %209 = tpu.matmul %206, %208, %cst_95 {dimension_numbers = #tpu.dot_dimension_numbers<[1], [0], [0], [1], [0, 0, 1, 1], [], []>} : vector<16x32xbf16>, vector<32x128xbf16>, vector<16x128xf32> -> vector<16x128xf32>
    %210 = vector.extract_strided_slice %205 {offsets = [0, 0], sizes = [16, 32], strides = [1, 1]} : vector<16x128xf32> to vector<16x32xf32>
    %211 = vector.extract_strided_slice %209 {offsets = [0, 0], sizes = [16, 32], strides = [1, 1]} : vector<16x128xf32> to vector<16x32xf32>
    %212 = arith.addf %210, %211 : vector<16x32xf32>
    %213 = arith.negf %212 : vector<16x32xf32>
    %214 = math.exp %213 : vector<16x32xf32>
    %cst_96 = arith.constant 1.000000e+00 : f32
    %215 = vector.broadcast %cst_96 : f32 to vector<16x32xf32>
    %216 = arith.addf %215, %214 : vector<16x32xf32>
    %217 = arith.divf %215, %216 : vector<16x32xf32>
    %218 = vector.extract_strided_slice %205 {offsets = [0, 32], sizes = [16, 32], strides = [1, 1]} : vector<16x128xf32> to vector<16x32xf32>
    %219 = vector.extract_strided_slice %209 {offsets = [0, 32], sizes = [16, 32], strides = [1, 1]} : vector<16x128xf32> to vector<16x32xf32>
    %220 = arith.addf %218, %219 : vector<16x32xf32>
    %221 = arith.negf %220 : vector<16x32xf32>
    %222 = math.exp %221 : vector<16x32xf32>
    %cst_97 = arith.constant 1.000000e+00 : f32
    %223 = vector.broadcast %cst_97 : f32 to vector<16x32xf32>
    %224 = arith.addf %223, %222 : vector<16x32xf32>
    %225 = arith.divf %223, %224 : vector<16x32xf32>
    %226 = vector.extract_strided_slice %205 {offsets = [0, 64], sizes = [16, 32], strides = [1, 1]} : vector<16x128xf32> to vector<16x32xf32>
    %227 = vector.extract_strided_slice %209 {offsets = [0, 64], sizes = [16, 32], strides = [1, 1]} : vector<16x128xf32> to vector<16x32xf32>
    %228 = vector.broadcast %42 : vector<1x32xf32> to vector<16x32xf32>
    %229 = arith.addf %227, %228 : vector<16x32xf32>
    %230 = arith.mulf %217, %229 : vector<16x32xf32>
    %231 = arith.addf %226, %230 : vector<16x32xf32>
    %232 = math.tanh %231 : vector<16x32xf32>
    %cst_98 = arith.constant 1.000000e+00 : f32
    %233 = vector.broadcast %cst_98 : f32 to vector<16x32xf32>
    %234 = arith.subf %233, %225 : vector<16x32xf32>
    %235 = arith.mulf %234, %232 : vector<16x32xf32>
    %236 = arith.mulf %225, %160 : vector<16x32xf32>
    %237 = arith.addf %235, %236 : vector<16x32xf32>
    %238 = arith.truncf %237 : vector<16x32xf32> to vector<16x32xbf16>
    %c1_99 = arith.constant 1 : index
    %c0_100 = arith.constant 0 : index
    %c0_101 = arith.constant 0 : index
    %239 = vector.load %arg8[%c1_99, %c0_100, %c0_101] : memref<2x32x128xbf16, #tpu.memory_space<vmem>>, vector<1x32x128xbf16>
    %240 = vector.shape_cast %239 : vector<1x32x128xbf16> to vector<32x128xbf16>
    %cst_102 = arith.constant dense<0.000000e+00> : vector<16x128xf32>
    %241 = tpu.matmul %238, %240, %cst_102 {dimension_numbers = #tpu.dot_dimension_numbers<[1], [0], [0], [1], [0, 0, 1, 1], [], []>} : vector<16x32xbf16>, vector<32x128xbf16>, vector<16x128xf32> -> vector<16x128xf32>
    %242 = vector.broadcast %40 : vector<1x128xf32> to vector<16x128xf32>
    %243 = arith.addf %241, %242 : vector<16x128xf32>
    %244 = arith.truncf %198 : vector<16x32xf32> to vector<16x32xbf16>
    %c1_103 = arith.constant 1 : index
    %c0_104 = arith.constant 0 : index
    %c0_105 = arith.constant 0 : index
    %245 = vector.load %arg9[%c1_103, %c0_104, %c0_105] : memref<2x32x128xbf16, #tpu.memory_space<vmem>>, vector<1x32x128xbf16>
    %246 = vector.shape_cast %245 : vector<1x32x128xbf16> to vector<32x128xbf16>
    %cst_106 = arith.constant dense<0.000000e+00> : vector<16x128xf32>
    %247 = tpu.matmul %244, %246, %cst_106 {dimension_numbers = #tpu.dot_dimension_numbers<[1], [0], [0], [1], [0, 0, 1, 1], [], []>} : vector<16x32xbf16>, vector<32x128xbf16>, vector<16x128xf32> -> vector<16x128xf32>
    %248 = vector.extract_strided_slice %243 {offsets = [0, 0], sizes = [16, 32], strides = [1, 1]} : vector<16x128xf32> to vector<16x32xf32>
    %249 = vector.extract_strided_slice %247 {offsets = [0, 0], sizes = [16, 32], strides = [1, 1]} : vector<16x128xf32> to vector<16x32xf32>
    %250 = arith.addf %248, %249 : vector<16x32xf32>
    %251 = arith.negf %250 : vector<16x32xf32>
    %252 = math.exp %251 : vector<16x32xf32>
    %cst_107 = arith.constant 1.000000e+00 : f32
    %253 = vector.broadcast %cst_107 : f32 to vector<16x32xf32>
    %254 = arith.addf %253, %252 : vector<16x32xf32>
    %255 = arith.divf %253, %254 : vector<16x32xf32>
    %256 = vector.extract_strided_slice %243 {offsets = [0, 32], sizes = [16, 32], strides = [1, 1]} : vector<16x128xf32> to vector<16x32xf32>
    %257 = vector.extract_strided_slice %247 {offsets = [0, 32], sizes = [16, 32], strides = [1, 1]} : vector<16x128xf32> to vector<16x32xf32>
    %258 = arith.addf %256, %257 : vector<16x32xf32>
    %259 = arith.negf %258 : vector<16x32xf32>
    %260 = math.exp %259 : vector<16x32xf32>
    %cst_108 = arith.constant 1.000000e+00 : f32
    %261 = vector.broadcast %cst_108 : f32 to vector<16x32xf32>
    %262 = arith.addf %261, %260 : vector<16x32xf32>
    %263 = arith.divf %261, %262 : vector<16x32xf32>
    %264 = vector.extract_strided_slice %243 {offsets = [0, 64], sizes = [16, 32], strides = [1, 1]} : vector<16x128xf32> to vector<16x32xf32>
    %265 = vector.extract_strided_slice %247 {offsets = [0, 64], sizes = [16, 32], strides = [1, 1]} : vector<16x128xf32> to vector<16x32xf32>
    %266 = vector.broadcast %44 : vector<1x32xf32> to vector<16x32xf32>
    %267 = arith.addf %265, %266 : vector<16x32xf32>
    %268 = arith.mulf %255, %267 : vector<16x32xf32>
    %269 = arith.addf %264, %268 : vector<16x32xf32>
    %270 = math.tanh %269 : vector<16x32xf32>
    %cst_109 = arith.constant 1.000000e+00 : f32
    %271 = vector.broadcast %cst_109 : f32 to vector<16x32xf32>
    %272 = arith.subf %271, %263 : vector<16x32xf32>
    %273 = arith.mulf %272, %270 : vector<16x32xf32>
    %274 = arith.mulf %263, %198 : vector<16x32xf32>
    %275 = arith.addf %273, %274 : vector<16x32xf32>
    %276 = arith.index_cast %c2_i32 : i32 to index
    %c0_110 = arith.constant 0 : index
    %c0_111 = arith.constant 0 : index
    %277 = vector.load %arg6[%276, %c0_110, %c0_111] : memref<4x16x32xf32, #tpu.memory_space<vmem>>, vector<1x16x32xf32>
    %278 = vector.shape_cast %277 : vector<1x16x32xf32> to vector<16x32xf32>
    %279 = vector.shape_cast %275 : vector<16x32xf32> to vector<1x16x32xf32>
    tpu.vector_store %arg6[%276, %c0_110, %c0_111], %279 {strides = array<i32>} : memref<4x16x32xf32, #tpu.memory_space<vmem>>, vector<1x16x32xf32>,
    %c3_i32 = arith.constant 3 : i32
    %280 = arith.index_cast %c3_i32 : i32 to index
    %c0_112 = arith.constant 0 : index
    %c0_113 = arith.constant 0 : index
    %281 = vector.load %arg10[%280, %c0_112, %c0_113] : memref<4x16x128xf32, #tpu.memory_space<vmem>>, vector<1x16x128xf32>
    %282 = vector.shape_cast %281 : vector<1x16x128xf32> to vector<16x128xf32>
    %283 = arith.truncf %237 : vector<16x32xf32> to vector<16x32xbf16>
    %c0_114 = arith.constant 0 : index
    %c0_115 = arith.constant 0 : index
    %c0_116 = arith.constant 0 : index
    %284 = vector.load %arg9[%c0_114, %c0_115, %c0_116] : memref<2x32x128xbf16, #tpu.memory_space<vmem>>, vector<1x32x128xbf16>
    %285 = vector.shape_cast %284 : vector<1x32x128xbf16> to vector<32x128xbf16>
    %cst_117 = arith.constant dense<0.000000e+00> : vector<16x128xf32>
    %286 = tpu.matmul %283, %285, %cst_117 {dimension_numbers = #tpu.dot_dimension_numbers<[1], [0], [0], [1], [0, 0, 1, 1], [], []>} : vector<16x32xbf16>, vector<32x128xbf16>, vector<16x128xf32> -> vector<16x128xf32>
    %287 = vector.extract_strided_slice %282 {offsets = [0, 0], sizes = [16, 32], strides = [1, 1]} : vector<16x128xf32> to vector<16x32xf32>
    %288 = vector.extract_strided_slice %286 {offsets = [0, 0], sizes = [16, 32], strides = [1, 1]} : vector<16x128xf32> to vector<16x32xf32>
    %289 = arith.addf %287, %288 : vector<16x32xf32>
    %290 = arith.negf %289 : vector<16x32xf32>
    %291 = math.exp %290 : vector<16x32xf32>
    %cst_118 = arith.constant 1.000000e+00 : f32
    %292 = vector.broadcast %cst_118 : f32 to vector<16x32xf32>
    %293 = arith.addf %292, %291 : vector<16x32xf32>
    %294 = arith.divf %292, %293 : vector<16x32xf32>
    %295 = vector.extract_strided_slice %282 {offsets = [0, 32], sizes = [16, 32], strides = [1, 1]} : vector<16x128xf32> to vector<16x32xf32>
    %296 = vector.extract_strided_slice %286 {offsets = [0, 32], sizes = [16, 32], strides = [1, 1]} : vector<16x128xf32> to vector<16x32xf32>
    %297 = arith.addf %295, %296 : vector<16x32xf32>
    %298 = arith.negf %297 : vector<16x32xf32>
    %299 = math.exp %298 : vector<16x32xf32>
    %cst_119 = arith.constant 1.000000e+00 : f32
    %300 = vector.broadcast %cst_119 : f32 to vector<16x32xf32>
    %301 = arith.addf %300, %299 : vector<16x32xf32>
    %302 = arith.divf %300, %301 : vector<16x32xf32>
    %303 = vector.extract_strided_slice %282 {offsets = [0, 64], sizes = [16, 32], strides = [1, 1]} : vector<16x128xf32> to vector<16x32xf32>
    %304 = vector.extract_strided_slice %286 {offsets = [0, 64], sizes = [16, 32], strides = [1, 1]} : vector<16x128xf32> to vector<16x32xf32>
    %305 = vector.broadcast %42 : vector<1x32xf32> to vector<16x32xf32>
    %306 = arith.addf %304, %305 : vector<16x32xf32>
    %307 = arith.mulf %294, %306 : vector<16x32xf32>
    %308 = arith.addf %303, %307 : vector<16x32xf32>
    %309 = math.tanh %308 : vector<16x32xf32>
    %cst_120 = arith.constant 1.000000e+00 : f32
    %310 = vector.broadcast %cst_120 : f32 to vector<16x32xf32>
    %311 = arith.subf %310, %302 : vector<16x32xf32>
    %312 = arith.mulf %311, %309 : vector<16x32xf32>
    %313 = arith.mulf %302, %237 : vector<16x32xf32>
    %314 = arith.addf %312, %313 : vector<16x32xf32>
    %315 = arith.truncf %314 : vector<16x32xf32> to vector<16x32xbf16>
    %c1_121 = arith.constant 1 : index
    %c0_122 = arith.constant 0 : index
    %c0_123 = arith.constant 0 : index
    %316 = vector.load %arg8[%c1_121, %c0_122, %c0_123] : memref<2x32x128xbf16, #tpu.memory_space<vmem>>, vector<1x32x128xbf16>
    %317 = vector.shape_cast %316 : vector<1x32x128xbf16> to vector<32x128xbf16>
    %cst_124 = arith.constant dense<0.000000e+00> : vector<16x128xf32>
    %318 = tpu.matmul %315, %317, %cst_124 {dimension_numbers = #tpu.dot_dimension_numbers<[1], [0], [0], [1], [0, 0, 1, 1], [], []>} : vector<16x32xbf16>, vector<32x128xbf16>, vector<16x128xf32> -> vector<16x128xf32>
    %319 = vector.broadcast %40 : vector<1x128xf32> to vector<16x128xf32>
    %320 = arith.addf %318, %319 : vector<16x128xf32>
    %321 = arith.truncf %275 : vector<16x32xf32> to vector<16x32xbf16>
    %c1_125 = arith.constant 1 : index
    %c0_126 = arith.constant 0 : index
    %c0_127 = arith.constant 0 : index
    %322 = vector.load %arg9[%c1_125, %c0_126, %c0_127] : memref<2x32x128xbf16, #tpu.memory_space<vmem>>, vector<1x32x128xbf16>
    %323 = vector.shape_cast %322 : vector<1x32x128xbf16> to vector<32x128xbf16>
    %cst_128 = arith.constant dense<0.000000e+00> : vector<16x128xf32>
    %324 = tpu.matmul %321, %323, %cst_128 {dimension_numbers = #tpu.dot_dimension_numbers<[1], [0], [0], [1], [0, 0, 1, 1], [], []>} : vector<16x32xbf16>, vector<32x128xbf16>, vector<16x128xf32> -> vector<16x128xf32>
    %325 = vector.extract_strided_slice %320 {offsets = [0, 0], sizes = [16, 32], strides = [1, 1]} : vector<16x128xf32> to vector<16x32xf32>
    %326 = vector.extract_strided_slice %324 {offsets = [0, 0], sizes = [16, 32], strides = [1, 1]} : vector<16x128xf32> to vector<16x32xf32>
    %327 = arith.addf %325, %326 : vector<16x32xf32>
    %328 = arith.negf %327 : vector<16x32xf32>
    %329 = math.exp %328 : vector<16x32xf32>
    %cst_129 = arith.constant 1.000000e+00 : f32
    %330 = vector.broadcast %cst_129 : f32 to vector<16x32xf32>
    %331 = arith.addf %330, %329 : vector<16x32xf32>
    %332 = arith.divf %330, %331 : vector<16x32xf32>
    %333 = vector.extract_strided_slice %320 {offsets = [0, 32], sizes = [16, 32], strides = [1, 1]} : vector<16x128xf32> to vector<16x32xf32>
    %334 = vector.extract_strided_slice %324 {offsets = [0, 32], sizes = [16, 32], strides = [1, 1]} : vector<16x128xf32> to vector<16x32xf32>
    %335 = arith.addf %333, %334 : vector<16x32xf32>
    %336 = arith.negf %335 : vector<16x32xf32>
    %337 = math.exp %336 : vector<16x32xf32>
    %cst_130 = arith.constant 1.000000e+00 : f32
    %338 = vector.broadcast %cst_130 : f32 to vector<16x32xf32>
    %339 = arith.addf %338, %337 : vector<16x32xf32>
    %340 = arith.divf %338, %339 : vector<16x32xf32>
    %341 = vector.extract_strided_slice %320 {offsets = [0, 64], sizes = [16, 32], strides = [1, 1]} : vector<16x128xf32> to vector<16x32xf32>
    %342 = vector.extract_strided_slice %324 {offsets = [0, 64], sizes = [16, 32], strides = [1, 1]} : vector<16x128xf32> to vector<16x32xf32>
    %343 = vector.broadcast %44 : vector<1x32xf32> to vector<16x32xf32>
    %344 = arith.addf %342, %343 : vector<16x32xf32>
    %345 = arith.mulf %332, %344 : vector<16x32xf32>
    %346 = arith.addf %341, %345 : vector<16x32xf32>
    %347 = math.tanh %346 : vector<16x32xf32>
    %cst_131 = arith.constant 1.000000e+00 : f32
    %348 = vector.broadcast %cst_131 : f32 to vector<16x32xf32>
    %349 = arith.subf %348, %340 : vector<16x32xf32>
    %350 = arith.mulf %349, %347 : vector<16x32xf32>
    %351 = arith.mulf %340, %275 : vector<16x32xf32>
    %352 = arith.addf %350, %351 : vector<16x32xf32>
    %353 = arith.index_cast %c3_i32 : i32 to index
    %c0_132 = arith.constant 0 : index
    %c0_133 = arith.constant 0 : index
    %354 = vector.load %arg6[%353, %c0_132, %c0_133] : memref<4x16x32xf32, #tpu.memory_space<vmem>>, vector<1x16x32xf32>
    %355 = vector.shape_cast %354 : vector<1x16x32xf32> to vector<16x32xf32>
    %356 = vector.shape_cast %352 : vector<16x32xf32> to vector<1x16x32xf32>
    tpu.vector_store %arg6[%353, %c0_132, %c0_133], %356 {strides = array<i32>} : memref<4x16x32xf32, #tpu.memory_space<vmem>>, vector<1x16x32xf32>,
    %c4_i32 = arith.constant 4 : i32
    %c0_134 = arith.constant 0 : index
    %c0_135 = arith.constant 0 : index
    %c0_136 = arith.constant 0 : index
    %357 = vector.load %arg11[%c0_134, %c0_135, %c0_136] : memref<2x16x32xf32, #tpu.memory_space<vmem>>, vector<1x16x32xf32>
    %358 = vector.shape_cast %357 : vector<1x16x32xf32> to vector<16x32xf32>
    %359 = vector.shape_cast %314 : vector<16x32xf32> to vector<1x16x32xf32>
    tpu.vector_store %arg11[%c0_134, %c0_135, %c0_136], %359 {strides = array<i32>} : memref<2x16x32xf32, #tpu.memory_space<vmem>>, vector<1x16x32xf32>,
    %c1_137 = arith.constant 1 : index
    %c0_138 = arith.constant 0 : index
    %c0_139 = arith.constant 0 : index
    %360 = vector.load %arg11[%c1_137, %c0_138, %c0_139] : memref<2x16x32xf32, #tpu.memory_space<vmem>>, vector<1x16x32xf32>
    %361 = vector.shape_cast %360 : vector<1x16x32xf32> to vector<16x32xf32>
    %362 = vector.shape_cast %352 : vector<16x32xf32> to vector<1x16x32xf32>
    tpu.vector_store %arg11[%c1_137, %c0_138, %c0_139], %362 {strides = array<i32>} : memref<2x16x32xf32, #tpu.memory_space<vmem>>, vector<1x16x32xf32>,
    %c0_i32_140 = arith.constant 0 : i32
    %363 = arith.cmpi eq, %arg0, %c0_i32_140 : i32
    %364 = arith.extui %363 : i1 to i32
    %c0_i32_141 = arith.constant 0 : i32
    %365 = arith.cmpi ne, %364, %c0_i32_141 : i32
    scf.if %365 {
      %c0_142 = arith.constant 0 : index
      %c0_143 = arith.constant 0 : index
      %c0_144 = arith.constant 0 : index
      %366 = vector.load %arg7[%c0_142, %c0_143, %c0_144] : memref<2x16x32xf32, #tpu.memory_space<vmem>>, vector<1x16x32xf32>
      %367 = vector.shape_cast %366 : vector<1x16x32xf32> to vector<16x32xf32>
      %368 = vector.shape_cast %314 : vector<16x32xf32> to vector<1x16x32xf32>
      tpu.vector_store %arg7[%c0_142, %c0_143, %c0_144], %368 {strides = array<i32>} : memref<2x16x32xf32, #tpu.memory_space<vmem>>, vector<1x16x32xf32>,
      %c1_145 = arith.constant 1 : index
      %c0_146 = arith.constant 0 : index
      %c0_147 = arith.constant 0 : index
      %369 = vector.load %arg7[%c1_145, %c0_146, %c0_147] : memref<2x16x32xf32, #tpu.memory_space<vmem>>, vector<1x16x32xf32>
      %370 = vector.shape_cast %369 : vector<1x16x32xf32> to vector<16x32xf32>
      %371 = vector.shape_cast %352 : vector<16x32xf32> to vector<1x16x32xf32>
      tpu.vector_store %arg7[%c1_145, %c0_146, %c0_147], %371 {strides = array<i32>} : memref<2x16x32xf32, #tpu.memory_space<vmem>>, vector<1x16x32xf32>,
    } else {
    }
    return
  }
  func.func @transform_0(%arg0: i32) -> (i32, i32, i32) {
    %c0_i32 = arith.constant 0 : i32
    %c0_i32_0 = arith.constant 0 : i32
    %c0_i32_1 = arith.constant 0 : i32
    return %arg0, %c0_i32, %c0_i32_0 : i32, i32, i32
  }
  func.func @transform_3(%arg0: i32) -> (i32, i32, i32) {
    %c0_i32 = arith.constant 0 : i32
    %c0_i32_0 = arith.constant 0 : i32
    %c0_i32_1 = arith.constant 0 : i32
    %c0_i32_2 = arith.constant 0 : i32
    return %c0_i32, %c0_i32_0, %c0_i32_1 : i32, i32, i32
  }
  func.func @transform_4(%arg0: i32) -> (i32, i32, i32) {
    %c0_i32 = arith.constant 0 : i32
    %c0_i32_0 = arith.constant 0 : i32
    %c0_i32_1 = arith.constant 0 : i32
    %c0_i32_2 = arith.constant 0 : i32
    return %c0_i32, %c0_i32_0, %c0_i32_1 : i32, i32, i32
  }
  func.func @transform_5(%arg0: i32) -> (i32, i32, i32) {
    %c0_i32 = arith.constant 0 : i32
    %c0_i32_0 = arith.constant 0 : i32
    %c0_i32_1 = arith.constant 0 : i32
    return %arg0, %c0_i32, %c0_i32_0 : i32, i32, i32
  }
  func.func @transform_6(%arg0: i32) -> (i32, i32, i32) {
    %c0_i32 = arith.constant 0 : i32
    %c0_i32_0 = arith.constant 0 : i32
    %c0_i32_1 = arith.constant 0 : i32
    %c0_i32_2 = arith.constant 0 : i32
    return %c0_i32, %c0_i32_0, %c0_i32_1 : i32, i32, i32
  }
}

</mosaic_0001>

<bundles_post_ra>
// kernel: a_call__.2
= control target key start
LH: loop header
LB: loop body
LE: loop exit
PB: predicated region body
PF: predicated region fallthrough
CT: control target
= control target key end

     0   :  { %vm23_vm0 = vcmask 261120   ;;  %v1067_v0 = vmov 0.0   ;;  %vm1068_vm1 = vmmov 0   ;;  %s1069_s23 = smov 64   ;;  %s1071_s29 = smov 96   ;;  %vm136_vm2 = vcmask 257024   ;;  %s1312_s2 = inlined_call_operand.vmem [shape: bf16[32,128], index: 2, kind: input, shape index: {}]   ;;  %s1313_s1 = inlined_call_operand.vmem [shape: f32[8,32], index: 1, kind: input, shape index: {}]   ;;  %s1314_s3 = inlined_call_operand.vmem [shape: f32[1,32], index: 3, kind: input, shape index: {}]   ;;  %s1315_s0 = inlined_call_operand.vmem [shape: bf16[8,8,128], index: 0, kind: input, shape index: {}]   ;;  %s1316_s4 = inlined_call_operand.vmem [shape: bf16[8,8,32], index: 4, kind: output, shape index: {}]  }
   0x1   :  { %934 = vmatprep.subr.bf16.mxu0 %v1067_v0  ;;  %v1003_v1 = vld [vmem:[%s1312_s2] sm:$0xff]   ;;  %938 = vmatprep.mubr.msk.bf16.mxu0 %vm1068_vm1, %v1067_v0  ;;  %v1004_v2 = vld [vmem:[%s1312_s2 + $0x8] sm:$0xff]  }
   0x2   :  { %942 = vmatprep.subr.bf16.mxu1 %v1067_v0  ;;  %946 = vmatprep.mubr.msk.bf16.mxu1 %vm1068_vm1, %v1067_v0  ;;  %v22_v3 = vld [vmem:[%s1313_s1] sm:$0xff]  ;;  %s1070_s1 = smov 32   ;;  %v1006_v25 = vld [vmem:[%s1312_s2 + $0x8] sm:$0xff]  }
   0x3   :  { %935 = vmatpush3.bf16.msra.mxu0 %v1003_v1  ;;  %v851_v4 = vld [vmem:[%s1314_s3] ss:$0 sm:$0xff]  ;;  %24 = vst.msk [vmem:[#allocation2] sm:$0xff] %vm23_vm0, %v22_v3  ;;  %v1008_v51 = vld [vmem:[%s1312_s2 + $0x8] sm:$0xff]  }
   0x4   :  { %936 = vmatprep.subr.bf16.mxu0 %v1067_v0  ;;  %102 = vrot.lane.b32.xlu0 %v851_v4, %s1069_s23  ;;  %v27_v13 = vld [vmem:[%s1315_s0] sm:$0xff]  }
   0x5   :  { %v28_v14 = vunpack.c.l.bf16 %v27_v13  ;;  %v1005_v24 = vld [vmem:[%s1312_s2] sm:$0xff]   ;;  %v140_v40 = vunpack.c.h.bf16 %v27_v13 }
   0x6   :  { %943 = vmatpush3.bf16.msra.mxu1 %v1005_v24  ;;  %v1007_v50 = vld [vmem:[%s1312_s2] sm:$0xff]  }
   0x7   :  { %937 = vmatpush3.bf16.msra.mxu0 %v1004_v2  ;;  %944 = vmatprep.subr.bf16.mxu1 %v1067_v0  ;;  %v860_v2 = vld [vmem:[%s1315_s0 + $0x8] sm:$0xff]  }
   0x8   :  { %950 = vmatprep.subr.bf16.mxu0 %v1067_v0  ;;  %v240_v3 = vunpack.c.l.bf16 %v860_v2 }
   0xa   :  { %v26_v5 = vld [vmem:[#allocation2] sm:$0xff]  ;;  %945 = vmatpush3.bf16.msra.mxu1 %v1006_v25 }
   0xb   :  { %v29_v6 = vpack.c.bf16 %v26_v5, %v26_v5  ;;  %958 = vmatprep.subr.bf16.mxu1 %v1067_v0 }
   0xd   :  { %939 = vmatmul.mubr.msk.bf16.vlgmr.msra.gmra.mrb[0].mxu0 %vm23_vm0, %v29_v6 }
   0xe   :  { %954 = vmatprep.mubr.msk.bf16.mxu0 %vm1068_vm1, %v1067_v0  ;;  %951 = vmatpush3.bf16.msra.mxu0 %v1007_v50 }
   0xf   :  { %952 = vmatprep.subr.bf16.mxu0 %v1067_v0 }
  0x12   :  { %953 = vmatpush3.bf16.msra.mxu0 %v1008_v51 }
  0x13   :  { %966 = vmatprep.subr.bf16.mxu0 %v1067_v0 }
  0x76   :  { %v1122_v7 = vpop.permute.xlu0 %102 }
  0xe0   :  { %v84_v8 = vpop.f32.mrb[0].mxu0 }
  0xe1   :  { %v105_v9 = vadd.f32 %v1122_v7, %v84_v8  ;;  %v940_v10 = vpop.f32.mrb[1].mxu0  ;;  %v90_v15 = vadd.f32 %v84_v8, %v28_v14 }
  0xe2   :  { %v87_v11 = vpop.f32.mrb[2].mxu0 }
  0xe3   :  { %107 = vrot.lane.b32.xlu0 %v105_v9, %s1069_s23  ;;  %v941_v12 = vpop.f32.mrb[3].mxu0  ;;  %v850_v16 = vmul.f32 -1.442695, %v90_v15  ;;  %v1010_v15 = vld [vmem:[%s1312_s2 + $0x8] sm:$0xff]  }
  0xe5   :  { %1019 = vpow2.f32 %v850_v16 }
  0xe7   :  { %124 = vrot.lane.b32.xlu0 %v26_v5, %s1070_s1 }
  0xef   :  { %v1020_v17 = vpop.eup %1019 }
  0xf0   :  { %v94_v18 = vadd.f32 1.0, %v1020_v17 }
  0xf2   :  { %1021 = vrcp.f32 %v94_v18 }
  0xfc   :  { %v1022_v19 = vpop.eup %1021 }
  0xfd   :  { %v117_v28 = vsub.f32 1.0, %v1022_v19 }
 0x155   :  { %v108_v20 = vpop.permute.xlu0 %107 }
 0x156   :  { %v110_v21 = vmul.f32 %v1022_v19, %v108_v20 }
 0x158   :  { %112 = vrot.lane.b32.xlu1 %v110_v21, %s1069_s23 }
 0x159   :  { %v125_v27 = vpop.permute.xlu0 %124 }
 0x15a   :  { %v127_v30 = vmul.f32 %v1022_v19, %v125_v27 }
 0x1ca   :  { %v113_v22 = vpop.permute.xlu1 %112 }
 0x1cb   :  { %v115_v23 = vadd.f32 %v113_v22, %v28_v14  ;;  %v1009_v14 = vld [vmem:[%s1312_s2] sm:$0xff]  }
 0x1cd   :  { %1023 = vtanh.f32 %v115_v23 }
 0x1d7   :  { %v1024_v26 = vpop.eup %1023 }
 0x1d8   :  { %119 = vrot.lane.b32.xlu1 %v1024_v26, %s1071_s29 }
 0x24a   :  { %v120_v29 = vpop.permute.xlu1 %119 }
 0x24b   :  { %v122_v31 = vmul.f32 %v120_v29, %v117_v28  ;;  %v340_v29 = vunpack.c.h.bf16 %v860_v2 }
 0x24d   :  { %v128_v32 = vadd.f32 %v127_v30, %v122_v31 }
 0x24f   :  { %v1139_v33 = vpack.c.bf16 %v128_v32, %v128_v32 }
 0x251   :  { %145 = vrot.lane.b32.xlu1 %v1139_v33, %s1071_s29 }
 0x2c3   :  { %v146_v34 = vpop.permute.xlu1 %145 }
 0x2c4   :  { %947 = vmatmul.mubr.msk.bf16.vlgmr.msra.gmra.mrb[0].mxu1 %vm23_vm0, %v146_v34 }
 0x2c5   :  { %962 = vmatprep.mubr.msk.bf16.mxu1 %vm1068_vm1, %v1067_v0  ;;  %959 = vmatpush3.bf16.msra.mxu1 %v1009_v14 }
 0x2c6   :  { %960 = vmatprep.subr.bf16.mxu1 %v1067_v0 }
 0x2c9   :  { %961 = vmatpush3.bf16.msra.mxu1 %v1010_v15 }
 0x2ca   :  { %974 = vmatprep.subr.bf16.mxu1 %v1067_v0 }
 0x397   :  { %v196_v35 = vpop.f32.mrb[0].mxu1 }
 0x398   :  { %v209_v36 = vadd.f32 %v196_v35, %v1122_v7  ;;  %v948_v37 = vpop.f32.mrb[1].mxu1  ;;  %v202_v41 = vadd.f32 %v196_v35, %v140_v40 }
 0x399   :  { %v199_v38 = vpop.f32.mrb[2].mxu1 }
 0x39a   :  { %211 = vrot.lane.b32.xlu0 %v209_v36, %s1069_s23  ;;  %v949_v39 = vpop.f32.mrb[3].mxu1  ;;  %v857_v42 = vmul.f32 -1.442695, %v202_v41  ;;  %v1012_v41 = vld [vmem:[%s1312_s2 + $0x8] sm:$0xff]  }
 0x39c   :  { %1025 = vpow2.f32 %v857_v42 }
 0x3a6   :  { %v1026_v43 = vpop.eup %1025 }
 0x3a7   :  { %v206_v44 = vadd.f32 1.0, %v1026_v43 }
 0x3a9   :  { %1027 = vrcp.f32 %v206_v44 }
 0x3b3   :  { %v1028_v45 = vpop.eup %1027 }
 0x3b4   :  { %v221_v53 = vsub.f32 1.0, %v1028_v45  ;;  %v227_v55 = vmul.f32 %v1028_v45, %v128_v32 }
 0x40c   :  { %v212_v46 = vpop.permute.xlu0 %211 }
 0x40d   :  { %v214_v47 = vmul.f32 %v1028_v45, %v212_v46 }
 0x40f   :  { %216 = vrot.lane.b32.xlu1 %v214_v47, %s1069_s23 }
 0x481   :  { %v217_v48 = vpop.permute.xlu1 %216 }
 0x482   :  { %v219_v49 = vadd.f32 %v217_v48, %v140_v40  ;;  %v1011_v40 = vld [vmem:[%s1312_s2] sm:$0xff]  }
 0x484   :  { %1029 = vtanh.f32 %v219_v49 }
 0x48e   :  { %v1030_v52 = vpop.eup %1029 }
 0x48f   :  { %223 = vrot.lane.b32.xlu0 %v1030_v52, %s1071_s29 }
 0x501   :  { %v224_v54 = vpop.permute.xlu0 %223 }
 0x502   :  { %v226_v56 = vmul.f32 %v224_v54, %v221_v53 }
 0x504   :  { %v228_v57 = vadd.f32 %v227_v55, %v226_v56  ;;  %v874_v55 = vld [vmem:[%s1315_s0 + $0x10] sm:$0xff]  }
 0x505   :  { %v440_v56 = vunpack.c.l.bf16 %v874_v55 }
 0x506   :  { %v1158_v58 = vpack.c.bf16 %v228_v57, %v228_v57 }
 0x508   :  { %245 = vrot.lane.b32.xlu1 %v1158_v58, %s1071_s29 }
 0x57a   :  { %v246_v59 = vpop.permute.xlu1 %245 }
 0x57b   :  { %955 = vmatmul.mubr.msk.bf16.vlgmr.msra.gmra.mrb[4].mxu0 %vm23_vm0, %v246_v59 }
 0x57c   :  { %970 = vmatprep.mubr.msk.bf16.mxu0 %vm1068_vm1, %v1067_v0  ;;  %967 = vmatpush3.bf16.msra.mxu0 %v1011_v40 }
 0x57d   :  { %968 = vmatprep.subr.bf16.mxu0 %v1067_v0 }
 0x580   :  { %969 = vmatpush3.bf16.msra.mxu0 %v1012_v41 }
 0x581   :  { %982 = vmatprep.subr.bf16.mxu0 %v1067_v0 }
 0x64e   :  { %v296_v60 = vpop.f32.mrb[4].mxu0 }
 0x64f   :  { %v309_v61 = vadd.f32 %v296_v60, %v1122_v7  ;;  %v956_v62 = vpop.f32.mrb[5].mxu0  ;;  %v302_v4 = vadd.f32 %v296_v60, %v240_v3 }
 0x650   :  { %v299_v63 = vpop.f32.mrb[6].mxu0 }
 0x651   :  { %311 = vrot.lane.b32.xlu0 %v309_v61, %s1069_s23  ;;  %v957_v1 = vpop.f32.mrb[7].mxu0  ;;  %v864_v5 = vmul.f32 -1.442695, %v302_v4  ;;  %v1013_v4 = vld [vmem:[%s1312_s2] sm:$0xff]  }
 0x653   :  { %1031 = vpow2.f32 %v864_v5  ;;  %v1014_v5 = vld [vmem:[%s1312_s2 + $0x8] sm:$0xff]  }
 0x65d   :  { %v1032_v6 = vpop.eup %1031 }
 0x65e   :  { %v306_v8 = vadd.f32 1.0, %v1032_v6 }
 0x660   :  { %1033 = vrcp.f32 %v306_v8 }
 0x66a   :  { %v1034_v9 = vpop.eup %1033 }
 0x66b   :  { %v321_v17 = vsub.f32 1.0, %v1034_v9  ;;  %v327_v19 = vmul.f32 %v1034_v9, %v228_v57 }
 0x6c3   :  { %v312_v10 = vpop.permute.xlu0 %311 }
 0x6c4   :  { %v314_v11 = vmul.f32 %v1034_v9, %v312_v10 }
 0x6c6   :  { %316 = vrot.lane.b32.xlu1 %v314_v11, %s1069_s23 }
 0x738   :  { %v317_v12 = vpop.permute.xlu1 %316 }
 0x739   :  { %v319_v13 = vadd.f32 %v317_v12, %v240_v3 }
 0x73b   :  { %1035 = vtanh.f32 %v319_v13 }
 0x745   :  { %v1036_v16 = vpop.eup %1035 }
 0x746   :  { %323 = vrot.lane.b32.xlu0 %v1036_v16, %s1071_s29 }
 0x7b8   :  { %v324_v18 = vpop.permute.xlu0 %323 }
 0x7b9   :  { %v326_v20 = vmul.f32 %v324_v18, %v321_v17 }
 0x7bb   :  { %v328_v21 = vadd.f32 %v327_v19, %v326_v20  ;;  %v540_v20 = vunpack.c.h.bf16 %v874_v55 }
 0x7bd   :  { %v1180_v22 = vpack.c.bf16 %v328_v21, %v328_v21 }
 0x7bf   :  { %345 = vrot.lane.b32.xlu1 %v1180_v22, %s1071_s29 }
 0x831   :  { %v346_v23 = vpop.permute.xlu1 %345 }
 0x832   :  { %963 = vmatmul.mubr.msk.bf16.vlgmr.msra.gmra.mrb[4].mxu1 %vm23_vm0, %v346_v23 }
 0x833   :  { %978 = vmatprep.mubr.msk.bf16.mxu1 %vm1068_vm1, %v1067_v0  ;;  %975 = vmatpush3.bf16.msra.mxu1 %v1013_v4 }
 0x834   :  { %976 = vmatprep.subr.bf16.mxu1 %v1067_v0 }
 0x837   :  { %977 = vmatpush3.bf16.msra.mxu1 %v1014_v5 }
 0x838   :  { %990 = vmatprep.subr.bf16.mxu1 %v1067_v0 }
 0x905   :  { %v396_v24 = vpop.f32.mrb[4].mxu1 }
 0x906   :  { %v409_v25 = vadd.f32 %v396_v24, %v1122_v7  ;;  %v964_v26 = vpop.f32.mrb[5].mxu1  ;;  %v402_v30 = vadd.f32 %v396_v24, %v340_v29 }
 0x907   :  { %v399_v27 = vpop.f32.mrb[6].mxu1 }
 0x908   :  { %411 = vrot.lane.b32.xlu0 %v409_v25, %s1069_s23  ;;  %v965_v28 = vpop.f32.mrb[7].mxu1  ;;  %v871_v31 = vmul.f32 -1.442695, %v402_v30 }
 0x90a   :  { %1037 = vpow2.f32 %v871_v31  ;;  %v1015_v31 = vld [vmem:[%s1312_s2] sm:$0xff]  }
 0x914   :  { %v1038_v32 = vpop.eup %1037 }
 0x915   :  { %v406_v34 = vadd.f32 1.0, %v1038_v32  ;;  %v1016_v32 = vld [vmem:[%s1312_s2 + $0x8] sm:$0xff]  }
 0x917   :  { %1039 = vrcp.f32 %v406_v34 }
 0x921   :  { %v1040_v35 = vpop.eup %1039 }
 0x922   :  { %v421_v43 = vsub.f32 1.0, %v1040_v35  ;;  %v427_v45 = vmul.f32 %v1040_v35, %v328_v21 }
 0x97a   :  { %v412_v36 = vpop.permute.xlu0 %411 }
 0x97b   :  { %v414_v37 = vmul.f32 %v1040_v35, %v412_v36 }
 0x97d   :  { %416 = vrot.lane.b32.xlu1 %v414_v37, %s1069_s23 }
 0x9ef   :  { %v417_v38 = vpop.permute.xlu1 %416 }
 0x9f0   :  { %v419_v39 = vadd.f32 %v417_v38, %v340_v29 }
 0x9f2   :  { %1041 = vtanh.f32 %v419_v39 }
 0x9fc   :  { %v1042_v42 = vpop.eup %1041 }
 0x9fd   :  { %423 = vrot.lane.b32.xlu0 %v1042_v42, %s1071_s29 }
 0xa6f   :  { %v424_v44 = vpop.permute.xlu0 %423 }
 0xa70   :  { %v426_v46 = vmul.f32 %v424_v44, %v421_v43 }
 0xa72   :  { %v428_v47 = vadd.f32 %v427_v45, %v426_v46 }
 0xa74   :  { %v1199_v48 = vpack.c.bf16 %v428_v47, %v428_v47 }
 0xa76   :  { %445 = vrot.lane.b32.xlu1 %v1199_v48, %s1071_s29 }
 0xae8   :  { %v446_v49 = vpop.permute.xlu1 %445 }
 0xae9   :  { %971 = vmatmul.mubr.msk.bf16.vlgmr.msra.gmra.mrb[8].mxu0 %vm23_vm0, %v446_v49 }
 0xaea   :  { %986 = vmatprep.mubr.msk.bf16.mxu0 %vm1068_vm1, %v1067_v0  ;;  %983 = vmatpush3.bf16.msra.mxu0 %v1015_v31 }
 0xaeb   :  { %984 = vmatprep.subr.bf16.mxu0 %v1067_v0 }
 0xaee   :  { %985 = vmatpush3.bf16.msra.mxu0 %v1016_v32 }
 0xbbc   :  { %v496_v50 = vpop.f32.mrb[8].mxu0 }
 0xbbd   :  { %v509_v51 = vadd.f32 %v496_v50, %v1122_v7  ;;  %v972_v52 = vpop.f32.mrb[9].mxu0  ;;  %v502_v57 = vadd.f32 %v496_v50, %v440_v56 }
 0xbbe   :  { %v499_v53 = vpop.f32.mrb[10].mxu0 }
 0xbbf   :  { %511 = vrot.lane.b32.xlu0 %v509_v51, %s1069_s23  ;;  %v973_v54 = vpop.f32.mrb[11].mxu0  ;;  %v878_v59 = vmul.f32 -1.442695, %v502_v57 }
 0xbc1   :  { %1043 = vpow2.f32 %v878_v59 }
 0xbcb   :  { %v1044_v60 = vpop.eup %1043 }
 0xbcc   :  { %v506_v61 = vadd.f32 1.0, %v1044_v60  ;;  %v1017_v60 = vld [vmem:[%s1312_s2] sm:$0xff]  }
 0xbce   :  { %1045 = vrcp.f32 %v506_v61  ;;  %v1018_v61 = vld [vmem:[%s1312_s2 + $0x8] sm:$0xff]  }
 0xbd8   :  { %v1046_v62 = vpop.eup %1045 }
 0xbd9   :  { %v521_v8 = vsub.f32 1.0, %v1046_v62  ;;  %v527_v10 = vmul.f32 %v1046_v62, %v428_v47  ;;  %v888_v47 = vld [vmem:[%s1315_s0 + $0x18] sm:$0xff]  }
 0xbda   :  { %v640_v49 = vunpack.c.l.bf16 %v888_v47 }
 0xc31   :  { %v512_v63 = vpop.permute.xlu0 %511 }
 0xc32   :  { %v514_v1 = vmul.f32 %v1046_v62, %v512_v63 }
 0xc34   :  { %516 = vrot.lane.b32.xlu1 %v514_v1, %s1069_s23 }
 0xca6   :  { %v517_v2 = vpop.permute.xlu1 %516 }
 0xca7   :  { %v519_v3 = vadd.f32 %v517_v2, %v440_v56 }
 0xca9   :  { %1047 = vtanh.f32 %v519_v3 }
 0xcb3   :  { %v1048_v6 = vpop.eup %1047 }
 0xcb4   :  { %523 = vrot.lane.b32.xlu0 %v1048_v6, %s1071_s29 }
 0xd26   :  { %v524_v9 = vpop.permute.xlu0 %523 }
 0xd27   :  { %v526_v11 = vmul.f32 %v524_v9, %v521_v8 }
 0xd29   :  { %v528_v12 = vadd.f32 %v527_v10, %v526_v11 }
 0xd2b   :  { %v1221_v13 = vpack.c.bf16 %v528_v12, %v528_v12 }
 0xd2d   :  { %545 = vrot.lane.b32.xlu1 %v1221_v13, %s1071_s29 }
 0xd9f   :  { %v546_v14 = vpop.permute.xlu1 %545 }
 0xda0   :  { %979 = vmatmul.mubr.msk.bf16.vlgmr.msra.gmra.mrb[8].mxu1 %vm23_vm0, %v546_v14 }
 0xda1   :  { %994 = vmatprep.mubr.msk.bf16.mxu1 %vm1068_vm1, %v1067_v0  ;;  %991 = vmatpush3.bf16.msra.mxu1 %v1017_v60 }
 0xda2   :  { %992 = vmatprep.subr.bf16.mxu1 %v1067_v0 }
 0xda5   :  { %993 = vmatpush3.bf16.msra.mxu1 %v1018_v61 }
 0xe73   :  { %v596_v15 = vpop.f32.mrb[8].mxu1 }
 0xe74   :  { %v609_v16 = vadd.f32 %v596_v15, %v1122_v7  ;;  %v980_v17 = vpop.f32.mrb[9].mxu1  ;;  %v602_v21 = vadd.f32 %v596_v15, %v540_v20 }
 0xe75   :  { %v599_v18 = vpop.f32.mrb[10].mxu1 }
 0xe76   :  { %611 = vrot.lane.b32.xlu0 %v609_v16, %s1069_s23  ;;  %v981_v19 = vpop.f32.mrb[11].mxu1  ;;  %v885_v23 = vmul.f32 -1.442695, %v602_v21 }
 0xe78   :  { %1049 = vpow2.f32 %v885_v23 }
 0xe82   :  { %v1050_v24 = vpop.eup %1049 }
 0xe83   :  { %v606_v25 = vadd.f32 1.0, %v1050_v24 }
 0xe85   :  { %1051 = vrcp.f32 %v606_v25 }
 0xe8f   :  { %v1052_v26 = vpop.eup %1051 }
 0xe90   :  { %v621_v35 = vsub.f32 1.0, %v1052_v26  ;;  %v627_v37 = vmul.f32 %v1052_v26, %v528_v12  ;;  %v740_v12 = vunpack.c.h.bf16 %v888_v47 }
 0xee8   :  { %v612_v27 = vpop.permute.xlu0 %611 }
 0xee9   :  { %v614_v28 = vmul.f32 %v1052_v26, %v612_v27 }
 0xeeb   :  { %616 = vrot.lane.b32.xlu1 %v614_v28, %s1069_s23 }
 0xf5d   :  { %v617_v29 = vpop.permute.xlu1 %616 }
 0xf5e   :  { %v619_v30 = vadd.f32 %v617_v29, %v540_v20 }
 0xf60   :  { %1053 = vtanh.f32 %v619_v30 }
 0xf6a   :  { %v1054_v34 = vpop.eup %1053 }
 0xf6b   :  { %623 = vrot.lane.b32.xlu0 %v1054_v34, %s1071_s29 }
 0xfdd   :  { %v624_v36 = vpop.permute.xlu0 %623 }
 0xfde   :  { %v626_v38 = vmul.f32 %v624_v36, %v621_v35 }
 0xfe0   :  { %v628_v39 = vadd.f32 %v627_v37, %v626_v38 }
 0xfe2   :  { %v1239_v40 = vpack.c.bf16 %v628_v39, %v628_v39 }
 0xfe4   :  { %645 = vrot.lane.b32.xlu1 %v1239_v40, %s1071_s29 }
0x1056   :  { %v646_v41 = vpop.permute.xlu1 %645 }
0x1057   :  { %987 = vmatmul.mubr.msk.bf16.vlgmr.msra.gmra.mrb[12].mxu0 %vm23_vm0, %v646_v41 }
0x112a   :  { %v696_v42 = vpop.f32.mrb[12].mxu0 }
0x112b   :  { %v709_v43 = vadd.f32 %v696_v42, %v1122_v7  ;;  %v988_v44 = vpop.f32.mrb[13].mxu0  ;;  %v702_v50 = vadd.f32 %v696_v42, %v640_v49 }
0x112c   :  { %v699_v45 = vpop.f32.mrb[14].mxu0 }
0x112d   :  { %711 = vrot.lane.b32.xlu0 %v709_v43, %s1069_s23  ;;  %v989_v46 = vpop.f32.mrb[15].mxu0  ;;  %v892_v51 = vmul.f32 -1.442695, %v702_v50 }
0x112f   :  { %1055 = vpow2.f32 %v892_v51 }
0x1139   :  { %v1056_v52 = vpop.eup %1055 }
0x113a   :  { %v706_v53 = vadd.f32 1.0, %v1056_v52 }
0x113c   :  { %1057 = vrcp.f32 %v706_v53 }
0x1146   :  { %v1058_v54 = vpop.eup %1057 }
0x1147   :  { %v721_v63 = vsub.f32 1.0, %v1058_v54  ;;  %v727_v2 = vmul.f32 %v1058_v54, %v628_v39 }
0x119f   :  { %v712_v55 = vpop.permute.xlu0 %711 }
0x11a0   :  { %v714_v56 = vmul.f32 %v1058_v54, %v712_v55 }
0x11a2   :  { %716 = vrot.lane.b32.xlu1 %v714_v56, %s1069_s23 }
0x1214   :  { %v717_v57 = vpop.permute.xlu1 %716 }
0x1215   :  { %v719_v59 = vadd.f32 %v717_v57, %v640_v49 }
0x1217   :  { %1059 = vtanh.f32 %v719_v59 }
0x1221   :  { %v1060_v62 = vpop.eup %1059 }
0x1222   :  { %723 = vrot.lane.b32.xlu0 %v1060_v62, %s1071_s29 }
0x1294   :  { %v724_v1 = vpop.permute.xlu0 %723 }
0x1295   :  { %v726_v3 = vmul.f32 %v724_v1, %v721_v63 }
0x1297   :  { %v728_v4 = vadd.f32 %v727_v2, %v726_v3 }
0x1299   :  { %v729_v5 = vpack.c.bf16 %v728_v4, %v728_v4 }
0x129b   :  { %745 = vrot.lane.b32.xlu1 %v729_v5, %s1071_s29 }
0x130d   :  { %v746_v6 = vpop.permute.xlu1 %745 }
0x130e   :  { %995 = vmatmul.mubr.msk.bf16.vlgmr.msra.gmra.mrb[12].mxu1 %vm23_vm0, %v746_v6 }
0x13e1   :  { %v796_v8 = vpop.f32.mrb[12].mxu1 }
0x13e2   :  { %v809_v9 = vadd.f32 %v796_v8, %v1122_v7  ;;  %v996_v10 = vpop.f32.mrb[13].mxu1  ;;  %v802_v14 = vadd.f32 %v796_v8, %v740_v12 }
0x13e3   :  { %v799_v0 = vpop.f32.mrb[14].mxu1 }
0x13e4   :  { %811 = vrot.lane.b32.xlu0 %v809_v9, %s1069_s23  ;;  %v997_v11 = vpop.f32.mrb[15].mxu1  ;;  %v899_v15 = vmul.f32 -1.442695, %v802_v14 }
0x13e6   :  { %1061 = vpow2.f32 %v899_v15 }
0x13f0   :  { %v1062_v16 = vpop.eup %1061 }
0x13f1   :  { %v806_v17 = vadd.f32 1.0, %v1062_v16 }
0x13f3   :  { %1063 = vrcp.f32 %v806_v17 }
0x13fd   :  { %v1064_v18 = vpop.eup %1063 }
0x13fe   :  { %v821_v25 = vsub.f32 1.0, %v1064_v18  ;;  %v827_v27 = vmul.f32 %v1064_v18, %v728_v4 }
0x1456   :  { %v812_v19 = vpop.permute.xlu0 %811 }
0x1457   :  { %v814_v20 = vmul.f32 %v1064_v18, %v812_v19 }
0x1459   :  { %816 = vrot.lane.b32.xlu1 %v814_v20, %s1069_s23 }
0x145d   :  { %133 = vrot.lane.b32.xlu1 %v1139_v33, %s1071_s29 }
0x1461   :  { %333 = vrot.lane.b32.xlu1 %v1180_v22, %s1071_s29 }
0x1465   :  { %533 = vrot.lane.b32.xlu1 %v1221_v13, %s1071_s29 }
0x1469   :  { %733 = vrot.lane.b32.xlu1 %v729_v5, %s1071_s29 }
0x14cb   :  { %v817_v7 = vpop.permute.xlu1 %816 }
0x14cc   :  { %v819_v21 = vadd.f32 %v817_v7, %v740_v12 }
0x14ce   :  { %1065 = vtanh.f32 %v819_v21 }
0x14cf   :  { %v134_v23 = vpop.permute.xlu1 %133 }
0x14d0   :  { %137 = vst.msk [vmem:[%s1316_s4] sm:$0xf] %vm136_vm2, %v134_v23 }
0x14d3   :  { %v334_v24 = vpop.permute.xlu1 %333 }
0x14d4   :  { %866 = vst.msk [vmem:[%s1316_s4 + $0x8] sm:$0xf] %vm136_vm2, %v334_v24 }
0x14d7   :  { %v534_v33 = vpop.permute.xlu1 %533 }
0x14d8   :  { %v1066_v22 = vpop.eup %1065  ;;  %880 = vst.msk [vmem:[%s1316_s4 + $0x10] sm:$0xf] %vm136_vm2, %v534_v33 }
0x14d9   :  { %823 = vrot.lane.b32.xlu0 %v1066_v22, %s1071_s29 }
0x14db   :  { %v734_v13 = vpop.permute.xlu1 %733 }
0x14dc   :  { %894 = vst.msk [vmem:[%s1316_s4 + $0x18] sm:$0xf] %vm136_vm2, %v734_v13 }
0x14dd   :  { %233 = vrot.lane.b32.xlu0 %v1158_v58, %s1071_s29 }
0x14e1   :  { %433 = vrot.lane.b32.xlu0 %v1199_v48, %s1071_s29 }
0x14e5   :  { %633 = vrot.lane.b32.xlu0 %v1239_v40, %s1071_s29 }
0x154b   :  { %v824_v26 = vpop.permute.xlu0 %823 }
0x154c   :  { %v826_v28 = vmul.f32 %v824_v26, %v821_v25 }
0x154e   :  { %v828_v29 = vadd.f32 %v827_v27, %v826_v28 }
0x154f   :  { %v234_v30 = vpop.permute.xlu0 %233 }
0x1550   :  { %859 = vst.msk [vmem:[%s1316_s4 + $0x4] sm:$0xf] %vm136_vm2, %v234_v30  ;;  %839 = vrot.lane.b32.xlu1 %v828_v29, %s1071_s29  ;;  %v909_v58 = vpack.c.bf16 %v828_v29, %v828_v29 }
0x1552   :  { %833 = vrot.lane.b32.xlu0 %v909_v58, %s1071_s29 }
0x1553   :  { %v434_v48 = vpop.permute.xlu0 %433 }
0x1554   :  { %873 = vst.msk [vmem:[%s1316_s4 + $0xc] sm:$0xf] %vm136_vm2, %v434_v48 }
0x1557   :  { %v634_v31 = vpop.permute.xlu0 %633 }
0x1558   :  { %887 = vst.msk [vmem:[%s1316_s4 + $0x14] sm:$0xf] %vm136_vm2, %v634_v31 }
0x15c2   :  { %v840_v32 = vpop.permute.xlu1 %839 }
0x15c3   :  { %842 = vst.msk [vmem:[#allocation2] sm:$0xff] %vm23_vm0, %v840_v32 }
0x15c4   :  { %v834_v34 = vpop.permute.xlu0 %833 }
0x15c5   :  { %901 = vst.msk [vmem:[%s1316_s4 + $0x1c] sm:$0xf] %vm136_vm2, %v834_v34 }

// kernel: a_call__.3
= control target key start
LH: loop header
LB: loop body
LE: loop exit
PB: predicated region body
PF: predicated region fallthrough
CT: control target
= control target key end

     0   :  { %vm23_vm0 = vcmask 261120   ;;  %v1853_v0 = vmov 0.0   ;;  %s2333_s0 = inlined_call_operand.vmem [shape: bf16[4,16,32], index: 0, kind: input, shape index: {}]   ;;  %s2334_s1 = inlined_call_operand.vmem [shape: bf16[2,32,128], index: 1, kind: input, shape index: {}]   ;;  %s2335_s2 = inlined_call_operand.vmem [shape: bf16[2,32,128], index: 2, kind: input, shape index: {}]   ;;  %s2336_s3 = inlined_call_operand.vmem [shape: f32[2,1,128], index: 3, kind: input, shape index: {}]   ;;  %s2337_s4 = inlined_call_operand.vmem [shape: f32[2,1,32], index: 4, kind: input, shape index: {}]   ;;  %s2338_s5 = inlined_call_operand.vmem [shape: f32[4,16,32], index: 5, kind: output, shape index: {0}]   ;;  %s2339_s6 = inlined_call_operand.vmem [shape: f32[2,16,32], index: 6, kind: output, shape index: {1}]  }
   0x1   :  { %24 = vst.msk [vmem:[#allocation5] sm:$0xff] %vm23_vm0, %v1853_v0  ;;  %25 = vst.msk [vmem:[#allocation5 + $0x8] sm:$0xff] %vm23_vm0, %v1853_v0 }
   0x2   :  { %26 = vst.msk [vmem:[#allocation5 + $0x10] sm:$0xff] %vm23_vm0, %v1853_v0  ;;  %27 = vst.msk [vmem:[#allocation5 + $0x18] sm:$0xff] %vm23_vm0, %v1853_v0 }
   0x3   :  { %v1904_v1 = vld [vmem:[%s2334_s1] sm:$0xff]  ;;  %v1909_v2 = vld [vmem:[%s2334_s1 + $0x8] sm:$0xff]  ;;  %v1914_v3 = vld [vmem:[%s2334_s1 + $0x10] sm:$0xff] }
   0x4   :  { %v1919_v4 = vld [vmem:[%s2334_s1 + $0x18] sm:$0xff] }
   0x5   :  { %75 = vsyncadd [#allocation6], 512 }
   0x6   :  { %1849 = dma.done.wait [#allocation6], 512 }
   0x7   :  { %1850 = vsyncadd [#allocation6], 4294966784 }
   0x8   :  { %v1924_v5 = vld [vmem:[%s2335_s2] sm:$0xff]  ;;  %v1929_v6 = vld [vmem:[%s2335_s2 + $0x8] sm:$0xff]  ;;  %v1934_v7 = vld [vmem:[%s2335_s2 + $0x10] sm:$0xff] }
   0x9   :  { %v1939_v8 = vld [vmem:[%s2335_s2 + $0x18] sm:$0xff] }
   0xa   :  { %128 = vsyncadd [#allocation8], 512 }
   0xb   :  { %1851 = dma.done.wait [#allocation8], 512 }
   0xc   :  { %1852 = vsyncadd [#allocation8], 4294966784  ;;  %1616 = vmatprep.subr.bf16.mxu0 %v1853_v0  ;;  %1624 = vmatprep.subr.bf16.mxu1 %v1853_v0  ;;  %vm1854_vm1 = vmmov 0   ;;  %v1532_v9 = vld [vmem:[%s2337_s4] ss:$0 sm:$0xff]  ;;  %s1855_s2 = smov 64  }
   0xd   :  { %1617 = vmatpush3.bf16.msra.mxu0 %v1904_v1  ;;  %1620 = vmatprep.mubr.msk.bf16.mxu0 %vm1854_vm1, %v1853_v0  ;;  %v1749_v10 = vld [vmem:[%s2333_s0] sm:$0xff]   ;;  %v1750_v11 = vld [vmem:[%s2333_s0 + $0x10] sm:$0xff]   ;;  %v1978_v13 = vld [vmem:[#allocation5 + $0x8] sm:$0xff]  ;;  %s1856_s22 = smov 96   ;;  %s1857_s23 = smov 32  }
   0xe   :  { %1618 = vmatprep.subr.bf16.mxu0 %v1853_v0  ;;  %1625 = vmatpush3.bf16.msra.mxu1 %v1904_v1  ;;  %v1976_v12 = vld [vmem:[#allocation5] sm:$0xff]  ;;  %v2011_v52 = vld [vmem:[#allocation5 + $0x10] sm:$0xff]  ;;  %v2013_v53 = vld [vmem:[#allocation5 + $0x18] sm:$0xff] }
   0xf   :  { %440 = vrot.lane.b32.xlu0 %v1532_v9, %s1855_s2  ;;  %1626 = vmatprep.subr.bf16.mxu1 %v1853_v0  ;;  %v374_v14 = vpack.c.bf16 %v1978_v13, %v1976_v12  ;;  %v2005_v30 = vld [vmem:[%s2336_s3] ss:$0 sm:$0xff]  ;;  %v1751_v54 = vld [vmem:[%s2333_s0 + $0x8] sm:$0xff]   ;;  %v548_v55 = vpack.c.bf16 %v2013_v53, %v2011_v52  ;;  %v1752_v57 = vld [vmem:[%s2333_s0 + $0x18] sm:$0xff]  }
  0x10   :  { %1628 = vmatprep.mubr.msk.bf16.mxu1 %vm1854_vm1, %v1853_v0 }
  0x11   :  { %1619 = vmatpush3.bf16.msra.mxu0 %v1909_v2 }
  0x12   :  { %1632 = vmatprep.subr.bf16.mxu0 %v1853_v0  ;;  %1627 = vmatpush3.bf16.msra.mxu1 %v1909_v2 }
  0x13   :  { %1640 = vmatprep.subr.bf16.mxu1 %v1853_v0 }
  0x14   :  { %1621 = vmatmul.mubr.msk.bf16.vlgmr.msra.gmra.mrb[0].mxu0 %vm23_vm0, %v1749_v10 }
  0x15   :  { %1633 = vmatpush3.bf16.msra.mxu0 %v1904_v1  ;;  %1636 = vmatprep.mubr.msk.bf16.mxu0 %vm1854_vm1, %v1853_v0 }
  0x16   :  { %1634 = vmatprep.subr.bf16.mxu0 %v1853_v0  ;;  %1629 = vmatmul.mubr.msk.bf16.vlgmr.msra.gmra.mrb[0].mxu1 %vm23_vm0, %v1751_v54 }
  0x17   :  { %1641 = vmatpush3.bf16.msra.mxu1 %v1904_v1  ;;  %1644 = vmatprep.mubr.msk.bf16.mxu1 %vm1854_vm1, %v1853_v0 }
  0x18   :  { %1642 = vmatprep.subr.bf16.mxu1 %v1853_v0 }
  0x19   :  { %1635 = vmatpush3.bf16.msra.mxu0 %v1909_v2 }
  0x1a   :  { %1648 = vmatprep.subr.bf16.mxu0 %v1853_v0 }
  0x1b   :  { %1643 = vmatpush3.bf16.msra.mxu1 %v1909_v2 }
  0x1c   :  { %1637 = vmatmul.mubr.msk.bf16.vlgmr.msra.gmra.mrb[4].mxu0 %vm23_vm0, %v1750_v11  ;;  %1656 = vmatprep.subr.bf16.mxu1 %v1853_v0  ;;  %v1538_v11 = vld [vmem:[%s2337_s4 + $0x1] ss:$0 sm:$0xff] }
  0x1d   :  { %1649 = vmatpush3.bf16.msra.mxu0 %v1924_v5  ;;  %1652 = vmatprep.mubr.msk.bf16.mxu0 %vm1854_vm1, %v1853_v0 }
  0x1e   :  { %1650 = vmatprep.subr.bf16.mxu0 %v1853_v0  ;;  %1645 = vmatmul.mubr.msk.bf16.vlgmr.msra.gmra.mrb[4].mxu1 %vm23_vm0, %v1752_v57 }
  0x1f   :  { %1657 = vmatpush3.bf16.msra.mxu1 %v1914_v3  ;;  %1660 = vmatprep.mubr.msk.bf16.mxu1 %vm1854_vm1, %v1853_v0 }
  0x20   :  { %1658 = vmatprep.subr.bf16.mxu1 %v1853_v0 }
  0x21   :  { %1651 = vmatpush3.bf16.msra.mxu0 %v1929_v6 }
  0x22   :  { %1664 = vmatprep.subr.bf16.mxu0 %v1853_v0 }
  0x23   :  { %1659 = vmatpush3.bf16.msra.mxu1 %v1919_v4 }
  0x24   :  { %1653 = vmatmul.mubr.msk.bf16.vlgmr.msra.gmra.mrb[8].mxu0 %vm23_vm0, %v374_v14  ;;  %1672 = vmatprep.subr.bf16.mxu1 %v1853_v0 }
  0x25   :  { %1665 = vmatpush3.bf16.msra.mxu0 %v1934_v7  ;;  %1668 = vmatprep.mubr.msk.bf16.mxu0 %vm1854_vm1, %v1853_v0 }
  0x26   :  { %1666 = vmatprep.subr.bf16.mxu0 %v1853_v0 }
  0x29   :  { %1667 = vmatpush3.bf16.msra.mxu0 %v1939_v8 }
  0x2a   :  { %1680 = vmatprep.subr.bf16.mxu0 %v1853_v0 }
  0x2c   :  { %1669 = vmatmul.mubr.msk.bf16.vlgmr.msra.gmra.mrb[12].mxu0 %vm23_vm0, %v548_v55 }
  0x2d   :  { %1681 = vmatpush3.bf16.msra.mxu0 %v1914_v3  ;;  %1684 = vmatprep.mubr.msk.bf16.mxu0 %vm1854_vm1, %v1853_v0 }
  0x2e   :  { %1682 = vmatprep.subr.bf16.mxu0 %v1853_v0 }
  0x31   :  { %1683 = vmatpush3.bf16.msra.mxu0 %v1919_v4 }
  0x32   :  { %1696 = vmatprep.subr.bf16.mxu0 %v1853_v0 }
  0x81   :  { %v1996_v23 = vpop.permute.xlu0 %440 }
  0xe7   :  { %v188_v15 = vpop.f32.mrb[0].mxu0 }
  0xe8   :  { %v1622_v16 = vpop.f32.mrb[1].mxu0  ;;  %v189_v31 = vadd.f32 %v2005_v30, %v188_v15 }
  0xe9   :  { %v191_v17 = vpop.f32.mrb[2].mxu0  ;;  %v2061_v15 = vpop.f32.mrb[0].mxu1 }
  0xea   :  { %v1623_v18 = vpop.f32.mrb[3].mxu0  ;;  %v192_v32 = vadd.f32 %v2005_v30, %v191_v17  ;;  %v1630_v17 = vpop.f32.mrb[1].mxu1 }
  0xef   :  { %v1992_v19 = vpop.f32.mrb[4].mxu0 }
  0xf0   :  { %v1638_v20 = vpop.f32.mrb[5].mxu0 }
  0xf1   :  { %v1994_v21 = vpop.f32.mrb[6].mxu0  ;;  %v245_v20 = vpop.f32.mrb[2].mxu1 }
  0xf2   :  { %v1639_v22 = vpop.f32.mrb[7].mxu0 }
  0xf7   :  { %v414_v24 = vpop.f32.mrb[8].mxu0 }
  0xf8   :  { %v443_v25 = vadd.f32 %v1996_v23, %v414_v24  ;;  %v1654_v26 = vpop.f32.mrb[9].mxu0  ;;  %v421_v33 = vadd.f32 %v414_v24, %v189_v31  ;;  %v1631_v24 = vpop.f32.mrb[3].mxu1 }
  0xf9   :  { %v417_v27 = vpop.f32.mrb[10].mxu0  ;;  %v2063_v26 = vpop.f32.mrb[4].mxu1 }
  0xfa   :  { %447 = vrot.lane.b32.xlu0 %v443_v25, %s1855_s2  ;;  %v1655_v28 = vpop.f32.mrb[11].mxu0  ;;  %v444_v29 = vadd.f32 %v1996_v23, %v417_v27  ;;  %v422_v34 = vadd.f32 %v417_v27, %v192_v32  ;;  %v1530_v35 = vmul.f32 -1.442695, %v421_v33  ;;  %v1646_v27 = vpop.f32.mrb[5].mxu1 }
  0xfb   :  { %v2065_v28 = vpop.f32.mrb[6].mxu1 }
  0xfc   :  { %449 = vrot.lane.b32.xlu1 %v444_v29, %s1855_s2  ;;  %v1531_v36 = vmul.f32 -1.442695, %v422_v34  ;;  %1753 = vpow2.f32 %v1530_v35  ;;  %v1647_v29 = vpop.f32.mrb[7].mxu1  ;;  %v2090_v35 = vld [vmem:[%s2336_s3 + $0x1] ss:$0 sm:$0xff] }
  0xfe   :  { %1755 = vpow2.f32 %v1531_v36 }
  0xff   :  { %v589_v16 = vpop.f32.mrb[12].mxu0 }
 0x100   :  { %v1670_v18 = vpop.f32.mrb[13].mxu0 }
 0x101   :  { %v592_v22 = vpop.f32.mrb[14].mxu0 }
 0x102   :  { %v1671_v25 = vpop.f32.mrb[15].mxu0 }
 0x106   :  { %v1754_v37 = vpop.eup %1753 }
 0x107   :  { %v429_v39 = vadd.f32 1.0, %v1754_v37 }
 0x108   :  { %v1756_v38 = vpop.eup %1755 }
 0x109   :  { %v430_v40 = vadd.f32 1.0, %v1756_v38  ;;  %1757 = vrcp.f32 %v429_v39 }
 0x10b   :  { %1759 = vrcp.f32 %v430_v40 }
 0x113   :  { %v1758_v41 = vpop.eup %1757 }
 0x114   :  { %v467_v61 = vsub.f32 1.0, %v1758_v41 }
 0x115   :  { %v1760_v44 = vpop.eup %1759 }
 0x116   :  { %v468_v62 = vsub.f32 1.0, %v1760_v44 }
 0x16c   :  { %v448_v42 = vpop.permute.xlu0 %447 }
 0x16d   :  { %v453_v43 = vmul.f32 %v1758_v41, %v448_v42 }
 0x16e   :  { %v450_v45 = vpop.permute.xlu1 %449 }
 0x16f   :  { %v454_v46 = vmul.f32 %v1760_v44, %v450_v45  ;;  %457 = vrot.lane.b32.xlu1 %v453_v43, %s1855_s2 }
 0x171   :  { %459 = vrot.lane.b32.xlu0 %v454_v46, %s1855_s2 }
 0x1e1   :  { %v458_v47 = vpop.permute.xlu1 %457 }
 0x1e2   :  { %v463_v48 = vadd.f32 %v458_v47, %v189_v31 }
 0x1e3   :  { %v460_v49 = vpop.permute.xlu0 %459 }
 0x1e4   :  { %1761 = vtanh.f32 %v463_v48  ;;  %v464_v50 = vadd.f32 %v460_v49, %v192_v32 }
 0x1e6   :  { %1763 = vtanh.f32 %v464_v50 }
 0x1ee   :  { %v1762_v51 = vpop.eup %1761 }
 0x1ef   :  { %471 = vrot.lane.b32.xlu1 %v1762_v51, %s1856_s22 }
 0x1f0   :  { %v1764_v56 = vpop.eup %1763 }
 0x1f1   :  { %473 = vrot.lane.b32.xlu0 %v1764_v56, %s1856_s22 }
 0x1f3   :  { %481 = vrot.lane.b32.xlu1 %v1976_v12, %s1857_s23 }
 0x1f5   :  { %483 = vrot.lane.b32.xlu0 %v1978_v13, %s1857_s23 }
 0x1f9   :  { %615 = vrot.lane.b32.xlu0 %v1538_v11, %s1855_s2 }
 0x261   :  { %v472_v58 = vpop.permute.xlu1 %471 }
 0x262   :  { %v477_v2 = vmul.f32 %v472_v58, %v467_v61 }
 0x263   :  { %v474_v59 = vpop.permute.xlu0 %473 }
 0x264   :  { %v478_v9 = vmul.f32 %v474_v59, %v468_v62 }
 0x265   :  { %v482_v60 = vpop.permute.xlu1 %481 }
 0x266   :  { %v487_v63 = vmul.f32 %v1758_v41, %v482_v60 }
 0x267   :  { %v484_v1 = vpop.permute.xlu0 %483 }
 0x268   :  { %v488_v10 = vmul.f32 %v1760_v44, %v484_v1  ;;  %v2053_v12 = vadd.f32 %v487_v63, %v477_v2  ;;  %v243_v1 = vadd.f32 %v2005_v30, %v2061_v15  ;;  %v246_v2 = vadd.f32 %v2005_v30, %v245_v20 }
 0x26a   :  { %v2055_v13 = vadd.f32 %v488_v10, %v478_v9 }
 0x26b   :  { %v2067_v31 = vpop.permute.xlu0 %615 }
 0x26c   :  { %v491_v14 = vpack.c.bf16 %v2055_v13, %v2053_v12  ;;  %v619_v32 = vadd.f32 %v2067_v31, %v592_v22  ;;  %v618_v33 = vadd.f32 %v2067_v31, %v589_v16 }
 0x26e   :  { %502 = vrot.lane.b32.xlu1 %v491_v14, %s1856_s22  ;;  %624 = vrot.lane.b32.xlu0 %v619_v32, %s1855_s2 }
 0x272   :  { %622 = vrot.lane.b32.xlu1 %v618_v33, %s1855_s2 }
 0x2e0   :  { %v503_v34 = vpop.permute.xlu1 %502  ;;  %v625_v60 = vpop.permute.xlu0 %624 }
 0x2e1   :  { %1661 = vmatmul.mubr.msk.bf16.vlgmr.msra.gmra.mrb[8].mxu1 %vm23_vm0, %v503_v34 }
 0x2e2   :  { %1673 = vmatpush3.bf16.msra.mxu1 %v1924_v5  ;;  %1676 = vmatprep.mubr.msk.bf16.mxu1 %vm1854_vm1, %v1853_v0 }
 0x2e3   :  { %1674 = vmatprep.subr.bf16.mxu1 %v1853_v0 }
 0x2e4   :  { %v623_v58 = vpop.permute.xlu1 %622 }
 0x2e6   :  { %1675 = vmatpush3.bf16.msra.mxu1 %v1929_v6 }
 0x2e7   :  { %1688 = vmatprep.subr.bf16.mxu1 %v1853_v0 }
 0x2e9   :  { %1677 = vmatmul.mubr.msk.bf16.vlgmr.msra.gmra.mrb[12].mxu1 %vm23_vm0, %v503_v34 }
 0x2ea   :  { %1689 = vmatpush3.bf16.msra.mxu1 %v1934_v7  ;;  %1692 = vmatprep.mubr.msk.bf16.mxu1 %vm1854_vm1, %v1853_v0 }
 0x2eb   :  { %1690 = vmatprep.subr.bf16.mxu1 %v1853_v0 }
 0x2ee   :  { %1691 = vmatpush3.bf16.msra.mxu1 %v1939_v8 }
 0x2ef   :  { %1704 = vmatprep.subr.bf16.mxu1 %v1853_v0 }
 0x3b4   :  { %v541_v36 = vpop.f32.mrb[8].mxu1 }
 0x3b5   :  { %v542_v37 = vadd.f32 %v2090_v35, %v541_v36  ;;  %v1662_v38 = vpop.f32.mrb[9].mxu1 }
 0x3b6   :  { %v544_v39 = vpop.f32.mrb[10].mxu1 }
 0x3b7   :  { %v596_v40 = vadd.f32 %v589_v16, %v542_v37  ;;  %v545_v41 = vadd.f32 %v2090_v35, %v544_v39  ;;  %v1663_v42 = vpop.f32.mrb[11].mxu1 }
 0x3b9   :  { %v1536_v43 = vmul.f32 -1.442695, %v596_v40  ;;  %v597_v44 = vadd.f32 %v592_v22, %v545_v41 }
 0x3bb   :  { %1765 = vpow2.f32 %v1536_v43  ;;  %v1537_v45 = vmul.f32 -1.442695, %v597_v44 }
 0x3bc   :  { %v714_v46 = vpop.f32.mrb[12].mxu1 }
 0x3bd   :  { %1767 = vpow2.f32 %v1537_v45  ;;  %v735_v47 = vadd.f32 %v714_v46, %v1996_v23  ;;  %v1678_v48 = vpop.f32.mrb[13].mxu1  ;;  %v721_v9 = vadd.f32 %v714_v46, %v243_v1 }
 0x3be   :  { %v717_v49 = vpop.f32.mrb[14].mxu1 }
 0x3bf   :  { %v736_v50 = vadd.f32 %v717_v49, %v1996_v23  ;;  %739 = vrot.lane.b32.xlu1 %v735_v47, %s1855_s2  ;;  %v1679_v51 = vpop.f32.mrb[15].mxu1  ;;  %v722_v10 = vadd.f32 %v717_v49, %v246_v2  ;;  %v1540_v11 = vmul.f32 -1.442695, %v721_v9 }
 0x3c1   :  { %741 = vrot.lane.b32.xlu0 %v736_v50, %s1855_s2  ;;  %v1541_v14 = vmul.f32 -1.442695, %v722_v10 }
 0x3c5   :  { %v1766_v54 = vpop.eup %1765 }
 0x3c6   :  { %v604_v55 = vadd.f32 1.0, %v1766_v54 }
 0x3c7   :  { %v1768_v56 = vpop.eup %1767 }
 0x3c8   :  { %1769 = vrcp.f32 %v604_v55  ;;  %v605_v57 = vadd.f32 1.0, %v1768_v56 }
 0x3ca   :  { %1771 = vrcp.f32 %v605_v57 }
 0x3cb   :  { %1773 = vpow2.f32 %v1540_v11 }
 0x3cc   :  { %1775 = vpow2.f32 %v1541_v14 }
 0x3d2   :  { %v1770_v59 = vpop.eup %1769 }
 0x3d3   :  { %v628_v61 = vmul.f32 %v1770_v59, %v623_v58  ;;  %v642_v48 = vsub.f32 1.0, %v1770_v59 }
 0x3d4   :  { %v1772_v62 = vpop.eup %1771 }
 0x3d5   :  { %v629_v63 = vmul.f32 %v1772_v62, %v625_v60  ;;  %632 = vrot.lane.b32.xlu1 %v628_v61, %s1855_s2  ;;  %v1774_v16 = vpop.eup %1773 }
 0x3d6   :  { %v1776_v17 = vpop.eup %1775  ;;  %v729_v18 = vadd.f32 1.0, %v1774_v16 }
 0x3d7   :  { %634 = vrot.lane.b32.xlu0 %v629_v63, %s1855_s2  ;;  %v730_v22 = vadd.f32 1.0, %v1776_v17 }
 0x3d8   :  { %1777 = vrcp.f32 %v729_v18 }
 0x3d9   :  { %1779 = vrcp.f32 %v730_v22 }
 0x3e2   :  { %v1778_v24 = vpop.eup %1777 }
 0x3e3   :  { %v1780_v29 = vpop.eup %1779  ;;  %v759_v58 = vsub.f32 1.0, %v1778_v24 }
 0x3e4   :  { %v760_v63 = vsub.f32 1.0, %v1780_v29 }
 0x431   :  { %v740_v25 = vpop.permute.xlu1 %739 }
 0x432   :  { %v745_v27 = vmul.f32 %v1778_v24, %v740_v25 }
 0x433   :  { %v742_v32 = vpop.permute.xlu0 %741 }
 0x434   :  { %v746_v15 = vmul.f32 %v1780_v29, %v742_v32  ;;  %749 = vrot.lane.b32.xlu1 %v745_v27, %s1855_s2 }
 0x436   :  { %751 = vrot.lane.b32.xlu0 %v746_v15, %s1855_s2 }
 0x447   :  { %v633_v20 = vpop.permute.xlu1 %632 }
 0x448   :  { %v638_v33 = vadd.f32 %v633_v20, %v542_v37 }
 0x449   :  { %v635_v34 = vpop.permute.xlu0 %634 }
 0x44a   :  { %1781 = vtanh.f32 %v638_v33  ;;  %v639_v36 = vadd.f32 %v635_v34, %v545_v41 }
 0x44c   :  { %1783 = vtanh.f32 %v639_v36 }
 0x454   :  { %v1782_v38 = vpop.eup %1781 }
 0x455   :  { %646 = vrot.lane.b32.xlu1 %v1782_v38, %s1856_s22 }
 0x456   :  { %v1784_v39 = vpop.eup %1783 }
 0x457   :  { %648 = vrot.lane.b32.xlu0 %v1784_v39, %s1856_s22 }
 0x459   :  { %656 = vrot.lane.b32.xlu1 %v2011_v52, %s1857_s23  ;;  %v643_v52 = vsub.f32 1.0, %v1772_v62 }
 0x45b   :  { %658 = vrot.lane.b32.xlu0 %v2013_v53, %s1857_s23 }
 0x4a6   :  { %v750_v40 = vpop.permute.xlu1 %749 }
 0x4a7   :  { %v755_v42 = vadd.f32 %v750_v40, %v243_v1 }
 0x4a8   :  { %v752_v43 = vpop.permute.xlu0 %751 }
 0x4a9   :  { %1785 = vtanh.f32 %v755_v42  ;;  %v756_v37 = vadd.f32 %v752_v43, %v246_v2  ;;  %v772_v2 = vmul.f32 %v1780_v29, %v2055_v13 }
 0x4ab   :  { %1787 = vtanh.f32 %v756_v37 }
 0x4b3   :  { %v1786_v41 = vpop.eup %1785 }
 0x4b4   :  { %763 = vrot.lane.b32.xlu1 %v1786_v41, %s1856_s22 }
 0x4b5   :  { %v1788_v44 = vpop.eup %1787 }
 0x4b6   :  { %765 = vrot.lane.b32.xlu0 %v1788_v44, %s1856_s22 }
 0x4c7   :  { %v647_v45 = vpop.permute.xlu1 %646 }
 0x4c8   :  { %v652_v53 = vmul.f32 %v647_v45, %v642_v48 }
 0x4c9   :  { %v649_v46 = vpop.permute.xlu0 %648 }
 0x4ca   :  { %v653_v51 = vmul.f32 %v649_v46, %v643_v52 }
 0x4cb   :  { %v657_v47 = vpop.permute.xlu1 %656 }
 0x4cc   :  { %v662_v49 = vmul.f32 %v1770_v59, %v657_v47  ;;  %v771_v59 = vmul.f32 %v1778_v24, %v2053_v12 }
 0x4cd   :  { %v659_v50 = vpop.permute.xlu0 %658 }
 0x4ce   :  { %v663_v54 = vmul.f32 %v1772_v62, %v659_v50  ;;  %v2113_v55 = vadd.f32 %v662_v49, %v652_v53 }
 0x4d0   :  { %v2115_v56 = vadd.f32 %v663_v54, %v653_v51  ;;  %v298_v54 = vadd.f32 %v2005_v30, %v1992_v19 }
 0x4d2   :  { %v825_v57 = vpack.c.bf16 %v2115_v56, %v2113_v55 }
 0x4d4   :  { %829 = vrot.lane.b32.xlu1 %v825_v57, %s1856_s22  ;;  %v301_v57 = vadd.f32 %v2005_v30, %v1994_v21 }
 0x526   :  { %v764_v60 = vpop.permute.xlu1 %763 }
 0x527   :  { %v769_v61 = vmul.f32 %v764_v60, %v759_v58 }
 0x528   :  { %v766_v1 = vpop.permute.xlu0 %765 }
 0x529   :  { %v770_v9 = vmul.f32 %v766_v1, %v760_v63  ;;  %v2122_v62 = vadd.f32 %v771_v59, %v769_v61 }
 0x52b   :  { %v2124_v10 = vadd.f32 %v772_v2, %v770_v9 }
 0x52d   :  { %v775_v11 = vpack.c.bf16 %v2124_v10, %v2122_v62 }
 0x52f   :  { %779 = vrot.lane.b32.xlu0 %v775_v11, %s1856_s22 }
 0x546   :  { %v830_v14 = vpop.permute.xlu1 %829 }
 0x547   :  { %1693 = vmatmul.mubr.msk.bf16.vlgmr.msra.gmra.mrb[16].mxu1 %vm23_vm0, %v830_v14 }
 0x548   :  { %1705 = vmatpush3.bf16.msra.mxu1 %v1914_v3  ;;  %1708 = vmatprep.mubr.msk.bf16.mxu1 %vm1854_vm1, %v1853_v0 }
 0x549   :  { %1706 = vmatprep.subr.bf16.mxu1 %v1853_v0 }
 0x54c   :  { %1707 = vmatpush3.bf16.msra.mxu1 %v1919_v4 }
 0x54d   :  { %1720 = vmatprep.subr.bf16.mxu1 %v1853_v0 }
 0x5a1   :  { %v780_v12 = vpop.permute.xlu0 %779 }
 0x5a2   :  { %1685 = vmatmul.mubr.msk.bf16.vlgmr.msra.gmra.mrb[16].mxu0 %vm23_vm0, %v780_v12 }
 0x5a3   :  { %1697 = vmatpush3.bf16.msra.mxu0 %v1924_v5  ;;  %1700 = vmatprep.mubr.msk.bf16.mxu0 %vm1854_vm1, %v1853_v0 }
 0x5a4   :  { %1698 = vmatprep.subr.bf16.mxu0 %v1853_v0 }
 0x5a7   :  { %1699 = vmatpush3.bf16.msra.mxu0 %v1929_v6 }
 0x5a8   :  { %1712 = vmatprep.subr.bf16.mxu0 %v1853_v0 }
 0x5aa   :  { %1701 = vmatmul.mubr.msk.bf16.vlgmr.msra.gmra.mrb[20].mxu0 %vm23_vm0, %v780_v12 }
 0x5ab   :  { %1713 = vmatpush3.bf16.msra.mxu0 %v1934_v7  ;;  %1716 = vmatprep.mubr.msk.bf16.mxu0 %vm1854_vm1, %v1853_v0 }
 0x5ac   :  { %1714 = vmatprep.subr.bf16.mxu0 %v1853_v0 }
 0x5af   :  { %1715 = vmatpush3.bf16.msra.mxu0 %v1939_v8 }
 0x5b0   :  { %1728 = vmatprep.subr.bf16.mxu0 %v1853_v0 }
 0x61a   :  { %v868_v13 = vpop.f32.mrb[16].mxu1 }
 0x61b   :  { %v889_v16 = vadd.f32 %v868_v13, %v2067_v31  ;;  %v1694_v17 = vpop.f32.mrb[17].mxu1 }
 0x61c   :  { %v871_v18 = vpop.f32.mrb[18].mxu1 }
 0x61d   :  { %v890_v22 = vadd.f32 %v871_v18, %v2067_v31  ;;  %893 = vrot.lane.b32.xlu1 %v889_v16, %s1855_s2  ;;  %v1695_v24 = vpop.f32.mrb[19].mxu1 }
 0x61f   :  { %895 = vrot.lane.b32.xlu0 %v890_v22, %s1855_s2 }
 0x675   :  { %v818_v25 = vpop.f32.mrb[16].mxu0 }
 0x676   :  { %v819_v27 = vadd.f32 %v2090_v35, %v818_v25  ;;  %v1686_v29 = vpop.f32.mrb[17].mxu0 }
 0x677   :  { %v821_v32 = vpop.f32.mrb[18].mxu0 }
 0x678   :  { %v875_v15 = vadd.f32 %v868_v13, %v819_v27  ;;  %v822_v20 = vadd.f32 %v2090_v35, %v821_v32  ;;  %v1687_v33 = vpop.f32.mrb[19].mxu0 }
 0x67a   :  { %v1544_v34 = vmul.f32 -1.442695, %v875_v15  ;;  %v876_v36 = vadd.f32 %v871_v18, %v822_v20 }
 0x67c   :  { %1789 = vpow2.f32 %v1544_v34  ;;  %v1545_v38 = vmul.f32 -1.442695, %v876_v36 }
 0x67d   :  { %v978_v39 = vpop.f32.mrb[20].mxu0 }
 0x67e   :  { %1791 = vpow2.f32 %v1545_v38  ;;  %v999_v40 = vadd.f32 %v978_v39, %v1996_v23  ;;  %v1702_v42 = vpop.f32.mrb[21].mxu0  ;;  %v985_v58 = vadd.f32 %v978_v39, %v298_v54 }
 0x67f   :  { %v981_v43 = vpop.f32.mrb[22].mxu0 }
 0x680   :  { %v1000_v37 = vadd.f32 %v981_v43, %v1996_v23  ;;  %v1703_v41 = vpop.f32.mrb[23].mxu0  ;;  %1003 = vrot.lane.b32.xlu1 %v999_v40, %s1855_s2  ;;  %v986_v60 = vadd.f32 %v981_v43, %v301_v57  ;;  %v1549_v61 = vmul.f32 -1.442695, %v985_v58 }
 0x682   :  { %1005 = vrot.lane.b32.xlu0 %v1000_v37, %s1855_s2  ;;  %v1550_v63 = vmul.f32 -1.442695, %v986_v60 }
 0x686   :  { %v1790_v44 = vpop.eup %1789 }
 0x687   :  { %v883_v45 = vadd.f32 1.0, %v1790_v44 }
 0x688   :  { %v1792_v46 = vpop.eup %1791 }
 0x689   :  { %1793 = vrcp.f32 %v883_v45  ;;  %v884_v47 = vadd.f32 1.0, %v1792_v46 }
 0x68b   :  { %1795 = vrcp.f32 %v884_v47 }
 0x68c   :  { %1797 = vpow2.f32 %v1549_v61 }
 0x68d   :  { %1799 = vpow2.f32 %v1550_v63 }
 0x68f   :  { %v894_v52 = vpop.permute.xlu1 %893 }
 0x691   :  { %v896_v53 = vpop.permute.xlu0 %895 }
 0x693   :  { %v1794_v48 = vpop.eup %1793 }
 0x694   :  { %v899_v49 = vmul.f32 %v1794_v48, %v894_v52  ;;  %v925_v42 = vmul.f32 %v1794_v48, %v2113_v55 }
 0x695   :  { %v1796_v50 = vpop.eup %1795 }
 0x696   :  { %v900_v51 = vmul.f32 %v1796_v50, %v896_v53  ;;  %903 = vrot.lane.b32.xlu1 %v899_v49, %s1855_s2  ;;  %v1798_v1 = vpop.eup %1797  ;;  %v914_v39 = vsub.f32 1.0, %v1796_v50  ;;  %v926_v43 = vmul.f32 %v1796_v50, %v2115_v56 }
 0x697   :  { %v1800_v59 = vpop.eup %1799  ;;  %v993_v2 = vadd.f32 1.0, %v1798_v1 }
 0x698   :  { %905 = vrot.lane.b32.xlu0 %v900_v51, %s1855_s2  ;;  %v994_v9 = vadd.f32 1.0, %v1800_v59 }
 0x699   :  { %1801 = vrcp.f32 %v993_v2 }
 0x69a   :  { %1803 = vrcp.f32 %v994_v9 }
 0x6a3   :  { %v1802_v11 = vpop.eup %1801 }
 0x6a4   :  { %v1804_v13 = vpop.eup %1803  ;;  %v1023_v46 = vsub.f32 1.0, %v1802_v11  ;;  %v1035_v51 = vmul.f32 %v1802_v11, %v2122_v62 }
 0x6a5   :  { %v1024_v49 = vsub.f32 1.0, %v1804_v13 }
 0x6f2   :  { %v1004_v14 = vpop.permute.xlu1 %1003 }
 0x6f3   :  { %v1009_v12 = vmul.f32 %v1802_v11, %v1004_v14 }
 0x6f4   :  { %v1006_v19 = vpop.permute.xlu0 %1005 }
 0x6f5   :  { %v1010_v16 = vmul.f32 %v1804_v13, %v1006_v19  ;;  %1013 = vrot.lane.b32.xlu1 %v1009_v12, %s1855_s2 }
 0x6f7   :  { %1015 = vrot.lane.b32.xlu0 %v1010_v16, %s1855_s2 }
 0x708   :  { %v904_v21 = vpop.permute.xlu1 %903 }
 0x709   :  { %v909_v17 = vadd.f32 %v904_v21, %v819_v27 }
 0x70a   :  { %v906_v18 = vpop.permute.xlu0 %905 }
 0x70b   :  { %1805 = vtanh.f32 %v909_v17  ;;  %v910_v22 = vadd.f32 %v906_v18, %v822_v20  ;;  %v913_v20 = vsub.f32 1.0, %v1794_v48  ;;  %v1036_v48 = vmul.f32 %v1804_v13, %v2124_v10 }
 0x70d   :  { %1807 = vtanh.f32 %v910_v22 }
 0x715   :  { %v1806_v24 = vpop.eup %1805 }
 0x716   :  { %917 = vrot.lane.b32.xlu1 %v1806_v24, %s1856_s22 }
 0x717   :  { %v1808_v25 = vpop.eup %1807 }
 0x718   :  { %919 = vrot.lane.b32.xlu0 %v1808_v25, %s1856_s22 }
 0x767   :  { %v1014_v29 = vpop.permute.xlu1 %1013 }
 0x768   :  { %v1019_v32 = vadd.f32 %v1014_v29, %v298_v54 }
 0x769   :  { %v1016_v15 = vpop.permute.xlu0 %1015 }
 0x76a   :  { %1809 = vtanh.f32 %v1019_v32  ;;  %v1020_v33 = vadd.f32 %v1016_v15, %v301_v57 }
 0x76c   :  { %1811 = vtanh.f32 %v1020_v33 }
 0x774   :  { %v1810_v34 = vpop.eup %1809 }
 0x775   :  { %1027 = vrot.lane.b32.xlu1 %v1810_v34, %s1856_s22 }
 0x776   :  { %v1812_v27 = vpop.eup %1811 }
 0x777   :  { %1029 = vrot.lane.b32.xlu0 %v1812_v27, %s1856_s22 }
 0x788   :  { %v918_v36 = vpop.permute.xlu1 %917 }
 0x789   :  { %v923_v38 = vmul.f32 %v918_v36, %v913_v20  ;;  %v356_v20 = vadd.f32 %v2005_v30, %v2065_v28 }
 0x78a   :  { %v920_v40 = vpop.permute.xlu0 %919 }
 0x78b   :  { %v924_v37 = vmul.f32 %v920_v40, %v914_v39  ;;  %v2174_v41 = vadd.f32 %v925_v42, %v923_v38 }
 0x78d   :  { %v2176_v44 = vadd.f32 %v926_v43, %v924_v37 }
 0x78f   :  { %v1089_v45 = vpack.c.bf16 %v2176_v44, %v2174_v41 }
 0x791   :  { %1093 = vrot.lane.b32.xlu1 %v1089_v45, %s1856_s22 }
 0x7e7   :  { %v1028_v47 = vpop.permute.xlu1 %1027 }
 0x7e8   :  { %v1033_v52 = vmul.f32 %v1028_v47, %v1023_v46 }
 0x7e9   :  { %v1030_v53 = vpop.permute.xlu0 %1029 }
 0x7ea   :  { %v1034_v50 = vmul.f32 %v1030_v53, %v1024_v49  ;;  %v2183_v54 = vadd.f32 %v1035_v51, %v1033_v52 }
 0x7ec   :  { %v2185_v57 = vadd.f32 %v1036_v48, %v1034_v50 }
 0x7ee   :  { %v1039_v58 = vpack.c.bf16 %v2185_v57, %v2183_v54 }
 0x7f0   :  { %1043 = vrot.lane.b32.xlu0 %v1039_v58, %s1856_s22 }
 0x803   :  { %v1094_v60 = vpop.permute.xlu1 %1093 }
 0x804   :  { %1717 = vmatmul.mubr.msk.bf16.vlgmr.msra.gmra.mrb[24].mxu0 %vm23_vm0, %v1094_v60 }
 0x805   :  { %1729 = vmatpush3.bf16.msra.mxu0 %v1914_v3  ;;  %1732 = vmatprep.mubr.msk.bf16.mxu0 %vm1854_vm1, %v1853_v0 }
 0x806   :  { %1730 = vmatprep.subr.bf16.mxu0 %v1853_v0 }
 0x809   :  { %1731 = vmatpush3.bf16.msra.mxu0 %v1919_v4 }
 0x862   :  { %v1044_v62 = vpop.permute.xlu0 %1043 }
 0x863   :  { %1709 = vmatmul.mubr.msk.bf16.vlgmr.msra.gmra.mrb[20].mxu1 %vm23_vm0, %v1044_v62 }
 0x864   :  { %1721 = vmatpush3.bf16.msra.mxu1 %v1924_v5  ;;  %1724 = vmatprep.mubr.msk.bf16.mxu1 %vm1854_vm1, %v1853_v0 }
 0x865   :  { %1722 = vmatprep.subr.bf16.mxu1 %v1853_v0 }
 0x868   :  { %1723 = vmatpush3.bf16.msra.mxu1 %v1929_v6 }
 0x869   :  { %1736 = vmatprep.subr.bf16.mxu1 %v1853_v0 }
 0x86b   :  { %1725 = vmatmul.mubr.msk.bf16.vlgmr.msra.gmra.mrb[24].mxu1 %vm23_vm0, %v1044_v62 }
 0x86c   :  { %1737 = vmatpush3.bf16.msra.mxu1 %v1934_v7  ;;  %1740 = vmatprep.mubr.msk.bf16.mxu1 %vm1854_vm1, %v1853_v0 }
 0x86d   :  { %1738 = vmatprep.subr.bf16.mxu1 %v1853_v0 }
 0x870   :  { %1739 = vmatpush3.bf16.msra.mxu1 %v1939_v8 }
 0x8d7   :  { %v1132_v3 = vpop.f32.mrb[24].mxu0 }
 0x8d8   :  { %v1153_v4 = vadd.f32 %v1132_v3, %v2067_v31  ;;  %v1718_v5 = vpop.f32.mrb[25].mxu0 }
 0x8d9   :  { %v1135_v10 = vpop.f32.mrb[26].mxu0 }
 0x8da   :  { %v1154_v6 = vadd.f32 %v1135_v10, %v2067_v31  ;;  %1157 = vrot.lane.b32.xlu1 %v1153_v4, %s1855_s2  ;;  %v1719_v61 = vpop.f32.mrb[27].mxu0 }
 0x8dc   :  { %1159 = vrot.lane.b32.xlu0 %v1154_v6, %s1855_s2 }
 0x936   :  { %v1082_v7 = vpop.f32.mrb[20].mxu1 }
 0x937   :  { %v1083_v63 = vadd.f32 %v2090_v35, %v1082_v7  ;;  %v1710_v1 = vpop.f32.mrb[21].mxu1 }
 0x938   :  { %v1085_v59 = vpop.f32.mrb[22].mxu1 }
 0x939   :  { %v1139_v0 = vadd.f32 %v1132_v3, %v1083_v63  ;;  %v1086_v8 = vadd.f32 %v2090_v35, %v1085_v59  ;;  %v1711_v2 = vpop.f32.mrb[23].mxu1 }
 0x93b   :  { %v1553_v9 = vmul.f32 -1.442695, %v1139_v0  ;;  %v1140_v11 = vadd.f32 %v1135_v10, %v1086_v8 }
 0x93d   :  { %1813 = vpow2.f32 %v1553_v9  ;;  %v1554_v14 = vmul.f32 -1.442695, %v1140_v11 }
 0x93e   :  { %v1242_v12 = vpop.f32.mrb[24].mxu1 }
 0x93f   :  { %1815 = vpow2.f32 %v1554_v14  ;;  %v1263_v13 = vadd.f32 %v1242_v12, %v1996_v23  ;;  %v1726_v19 = vpop.f32.mrb[25].mxu1 }
 0x940   :  { %v1245_v16 = vpop.f32.mrb[26].mxu1 }
 0x941   :  { %v1264_v21 = vadd.f32 %v1245_v16, %v1996_v23  ;;  %1267 = vrot.lane.b32.xlu1 %v1263_v13, %s1855_s2  ;;  %v1727_v17 = vpop.f32.mrb[27].mxu1  ;;  %v353_v23 = vadd.f32 %v2005_v30, %v2063_v26  ;;  %v1250_v38 = vadd.f32 %v1245_v16, %v356_v20 }
 0x943   :  { %1269 = vrot.lane.b32.xlu0 %v1264_v21, %s1855_s2  ;;  %v1249_v36 = vadd.f32 %v1242_v12, %v353_v23  ;;  %v1559_v40 = vmul.f32 -1.442695, %v1250_v38 }
 0x945   :  { %v1558_v39 = vmul.f32 -1.442695, %v1249_v36 }
 0x947   :  { %v1814_v18 = vpop.eup %1813 }
 0x948   :  { %v1147_v22 = vadd.f32 1.0, %v1814_v18 }
 0x949   :  { %v1816_v24 = vpop.eup %1815 }
 0x94a   :  { %1817 = vrcp.f32 %v1147_v22  ;;  %v1148_v25 = vadd.f32 1.0, %v1816_v24 }
 0x94c   :  { %1819 = vrcp.f32 %v1148_v25  ;;  %v1158_v32 = vpop.permute.xlu1 %1157 }
 0x94d   :  { %1821 = vpow2.f32 %v1558_v39 }
 0x94e   :  { %v1160_v34 = vpop.permute.xlu0 %1159  ;;  %1823 = vpow2.f32 %v1559_v40 }
 0x954   :  { %v1818_v29 = vpop.eup %1817 }
 0x955   :  { %v1163_v15 = vmul.f32 %v1818_v29, %v1158_v32  ;;  %v1177_v6 = vsub.f32 1.0, %v1818_v29  ;;  %v1189_v59 = vmul.f32 %v1818_v29, %v2174_v41 }
 0x956   :  { %v1820_v33 = vpop.eup %1819 }
 0x957   :  { %v1164_v27 = vmul.f32 %v1820_v33, %v1160_v34  ;;  %1167 = vrot.lane.b32.xlu1 %v1163_v15, %s1855_s2  ;;  %v1822_v42 = vpop.eup %1821  ;;  %v1190_v0 = vmul.f32 %v1820_v33, %v2176_v44 }
 0x958   :  { %v1824_v43 = vpop.eup %1823  ;;  %v1257_v37 = vadd.f32 1.0, %v1822_v42 }
 0x959   :  { %1169 = vrot.lane.b32.xlu0 %v1164_v27, %s1855_s2  ;;  %v1258_v45 = vadd.f32 1.0, %v1824_v43 }
 0x95a   :  { %1825 = vrcp.f32 %v1257_v37 }
 0x95b   :  { %1827 = vrcp.f32 %v1258_v45 }
 0x964   :  { %v1826_v46 = vpop.eup %1825 }
 0x965   :  { %v1828_v49 = vpop.eup %1827  ;;  %v1287_v14 = vsub.f32 1.0, %v1826_v46  ;;  %v1299_v21 = vmul.f32 %v1826_v46, %v2183_v54 }
 0x966   :  { %v1288_v19 = vsub.f32 1.0, %v1828_v49  ;;  %v1300_v17 = vmul.f32 %v1828_v49, %v2185_v57 }
 0x9b3   :  { %v1268_v47 = vpop.permute.xlu1 %1267 }
 0x9b4   :  { %v1273_v52 = vmul.f32 %v1826_v46, %v1268_v47 }
 0x9b5   :  { %v1270_v26 = vpop.permute.xlu0 %1269 }
 0x9b6   :  { %v1274_v53 = vmul.f32 %v1828_v49, %v1270_v26  ;;  %1277 = vrot.lane.b32.xlu1 %v1273_v52, %s1855_s2 }
 0x9b8   :  { %1279 = vrot.lane.b32.xlu0 %v1274_v53, %s1855_s2 }
 0x9c9   :  { %v1168_v30 = vpop.permute.xlu1 %1167 }
 0x9ca   :  { %v1173_v28 = vadd.f32 %v1168_v30, %v1083_v63  ;;  %v1178_v63 = vsub.f32 1.0, %v1820_v33 }
 0x9cb   :  { %v1170_v51 = vpop.permute.xlu0 %1169 }
 0x9cc   :  { %1829 = vtanh.f32 %v1173_v28  ;;  %v1174_v48 = vadd.f32 %v1170_v51, %v1086_v8 }
 0x9ce   :  { %1831 = vtanh.f32 %v1174_v48 }
 0x9d6   :  { %v1830_v50 = vpop.eup %1829 }
 0x9d7   :  { %1181 = vrot.lane.b32.xlu1 %v1830_v50, %s1856_s22 }
 0x9d8   :  { %v1832_v58 = vpop.eup %1831 }
 0x9d9   :  { %1183 = vrot.lane.b32.xlu0 %v1832_v58, %s1856_s22 }
 0xa28   :  { %v1278_v60 = vpop.permute.xlu1 %1277 }
 0xa29   :  { %v1283_v62 = vadd.f32 %v1278_v60, %v353_v23 }
 0xa2a   :  { %v1280_v3 = vpop.permute.xlu0 %1279 }
 0xa2b   :  { %1833 = vtanh.f32 %v1283_v62  ;;  %v1284_v4 = vadd.f32 %v1280_v3, %v356_v20 }
 0xa2d   :  { %1835 = vtanh.f32 %v1284_v4 }
 0xa35   :  { %v1834_v5 = vpop.eup %1833 }
 0xa36   :  { %1291 = vrot.lane.b32.xlu1 %v1834_v5, %s1856_s22 }
 0xa37   :  { %v1836_v10 = vpop.eup %1835 }
 0xa38   :  { %1293 = vrot.lane.b32.xlu0 %v1836_v10, %s1856_s22 }
 0xa49   :  { %v1182_v61 = vpop.permute.xlu1 %1181 }
 0xa4a   :  { %v1187_v7 = vmul.f32 %v1182_v61, %v1177_v6 }
 0xa4b   :  { %v1184_v1 = vpop.permute.xlu0 %1183 }
 0xa4c   :  { %v1188_v8 = vmul.f32 %v1184_v1, %v1178_v63  ;;  %v2233_v2 = vadd.f32 %v1189_v59, %v1187_v7 }
 0xa4e   :  { %v2235_v9 = vadd.f32 %v1190_v0, %v1188_v8 }
 0xa50   :  { %v1353_v11 = vpack.c.bf16 %v2235_v9, %v2233_v2 }
 0xa52   :  { %1357 = vrot.lane.b32.xlu1 %v1353_v11, %s1856_s22 }
 0xaa8   :  { %v1292_v12 = vpop.permute.xlu1 %1291 }
 0xaa9   :  { %v1297_v13 = vmul.f32 %v1292_v12, %v1287_v14 }
 0xaaa   :  { %v1294_v16 = vpop.permute.xlu0 %1293 }
 0xaab   :  { %v1298_v18 = vmul.f32 %v1294_v16, %v1288_v19  ;;  %v2242_v22 = vadd.f32 %v1299_v21, %v1297_v13 }
 0xaad   :  { %v2244_v24 = vadd.f32 %v1300_v17, %v1298_v18 }
 0xaaf   :  { %v1303_v25 = vpack.c.bf16 %v2244_v24, %v2242_v22 }
 0xab1   :  { %1307 = vrot.lane.b32.xlu0 %v1303_v25, %s1856_s22 }
 0xac4   :  { %v1358_v29 = vpop.permute.xlu1 %1357 }
 0xac5   :  { %1741 = vmatmul.mubr.msk.bf16.vlgmr.msra.gmra.mrb[28].mxu1 %vm23_vm0, %v1358_v29 }
 0xb23   :  { %v1308_v32 = vpop.permute.xlu0 %1307 }
 0xb24   :  { %1733 = vmatmul.mubr.msk.bf16.vlgmr.msra.gmra.mrb[28].mxu0 %vm23_vm0, %v1308_v32 }
 0xb98   :  { %v1396_v15 = vpop.f32.mrb[28].mxu1 }
 0xb99   :  { %v1417_v54 = vadd.f32 %v1396_v15, %v2067_v31  ;;  %v1742_v57 = vpop.f32.mrb[29].mxu1 }
 0xb9a   :  { %v1399_v33 = vpop.f32.mrb[30].mxu1 }
 0xb9b   :  { %v1418_v34 = vadd.f32 %v1399_v33, %v2067_v31  ;;  %1421 = vrot.lane.b32.xlu1 %v1417_v54, %s1855_s2  ;;  %v1743_v27 = vpop.f32.mrb[31].mxu1 }
 0xb9d   :  { %1423 = vrot.lane.b32.xlu0 %v1418_v34, %s1855_s2 }
 0xbf7   :  { %v1346_v23 = vpop.f32.mrb[28].mxu0 }
 0xbf8   :  { %v1347_v20 = vadd.f32 %v2090_v35, %v1346_v23  ;;  %v1734_v36 = vpop.f32.mrb[29].mxu0 }
 0xbf9   :  { %v1349_v38 = vpop.f32.mrb[30].mxu0 }
 0xbfa   :  { %v1403_v39 = vadd.f32 %v1396_v15, %v1347_v20  ;;  %v1350_v40 = vadd.f32 %v2090_v35, %v1349_v38  ;;  %v1735_v42 = vpop.f32.mrb[31].mxu0 }
 0xbfc   :  { %v1562_v43 = vmul.f32 -1.442695, %v1403_v39  ;;  %v1404_v37 = vadd.f32 %v1399_v33, %v1350_v40 }
 0xbfe   :  { %1837 = vpow2.f32 %v1562_v43  ;;  %v1563_v45 = vmul.f32 -1.442695, %v1404_v37 }
 0xc00   :  { %1839 = vpow2.f32 %v1563_v45 }
 0xc08   :  { %v1838_v31 = vpop.eup %1837 }
 0xc09   :  { %v1411_v46 = vadd.f32 1.0, %v1838_v31 }
 0xc0a   :  { %v1840_v47 = vpop.eup %1839 }
 0xc0b   :  { %1841 = vrcp.f32 %v1411_v46  ;;  %v1412_v52 = vadd.f32 1.0, %v1840_v47 }
 0xc0d   :  { %1843 = vrcp.f32 %v1412_v52  ;;  %v1422_v26 = vpop.permute.xlu1 %1421 }
 0xc0f   :  { %v1424_v28 = vpop.permute.xlu0 %1423 }
 0xc15   :  { %v1842_v49 = vpop.eup %1841 }
 0xc16   :  { %v1427_v53 = vmul.f32 %v1842_v49, %v1422_v26  ;;  %v1441_v3 = vsub.f32 1.0, %v1842_v49  ;;  %v1453_v5 = vmul.f32 %v1842_v49, %v2233_v2 }
 0xc17   :  { %v1844_v30 = vpop.eup %1843 }
 0xc18   :  { %v1428_v51 = vmul.f32 %v1844_v30, %v1424_v28  ;;  %1431 = vrot.lane.b32.xlu1 %v1427_v53, %s1855_s2  ;;  %v1442_v10 = vsub.f32 1.0, %v1844_v30  ;;  %v1454_v61 = vmul.f32 %v1844_v30, %v2235_v9 }
 0xc1a   :  { %1433 = vrot.lane.b32.xlu0 %v1428_v51, %s1855_s2 }
 0xc8a   :  { %v1432_v35 = vpop.permute.xlu1 %1431 }
 0xc8b   :  { %v1437_v48 = vadd.f32 %v1432_v35, %v1347_v20 }
 0xc8c   :  { %v1434_v50 = vpop.permute.xlu0 %1433 }
 0xc8d   :  { %1845 = vtanh.f32 %v1437_v48  ;;  %v1438_v58 = vadd.f32 %v1434_v50, %v1350_v40 }
 0xc8f   :  { %1847 = vtanh.f32 %v1438_v58 }
 0xc97   :  { %v1846_v60 = vpop.eup %1845 }
 0xc98   :  { %1445 = vrot.lane.b32.xlu1 %v1846_v60, %s1856_s22 }
 0xc99   :  { %v1848_v62 = vpop.eup %1847 }
 0xc9a   :  { %1447 = vrot.lane.b32.xlu0 %v1848_v62, %s1856_s22 }
 0xc9c   :  { %668 = vrot.lane.b32.xlu1 %v2113_v55, %s1856_s22 }
 0xc9e   :  { %670 = vrot.lane.b32.xlu0 %v2115_v56, %s1856_s22 }
 0xca0   :  { %931 = vrot.lane.b32.xlu1 %v2174_v41, %s1856_s22 }
 0xca2   :  { %933 = vrot.lane.b32.xlu0 %v2176_v44, %s1856_s22 }
 0xca4   :  { %1195 = vrot.lane.b32.xlu1 %v2233_v2, %s1856_s22 }
 0xca6   :  { %1197 = vrot.lane.b32.xlu0 %v2235_v9, %s1856_s22 }
 0xd0a   :  { %v1446_v4 = vpop.permute.xlu1 %1445 }
 0xd0b   :  { %v1451_v55 = vmul.f32 %v1446_v4, %v1441_v3 }
 0xd0c   :  { %v1448_v6 = vpop.permute.xlu0 %1447 }
 0xd0d   :  { %v1455_v56 = vadd.f32 %v1453_v5, %v1451_v55  ;;  %v1452_v41 = vmul.f32 %v1448_v6, %v1442_v10 }
 0xd0e   :  { %v669_v7 = vpop.permute.xlu1 %668 }
 0xd0f   :  { %v1456_v63 = vadd.f32 %v1454_v61, %v1452_v41  ;;  %674 = vst.msk [vmem:[%s2338_s5] sm:$0xff] %vm23_vm0, %v669_v7  ;;  %1459 = vrot.lane.b32.xlu1 %v1455_v56, %s1856_s22 }
 0xd10   :  { %v671_v44 = vpop.permute.xlu0 %670 }
 0xd11   :  { %675 = vst.msk [vmem:[%s2338_s5 + $0x8] sm:$0xff] %vm23_vm0, %v671_v44  ;;  %1461 = vrot.lane.b32.xlu0 %v1456_v63, %s1856_s22 }
 0xd12   :  { %v932_v1 = vpop.permute.xlu1 %931 }
 0xd13   :  { %1546 = vst.msk [vmem:[%s2338_s5 + $0x10] sm:$0xff] %vm23_vm0, %v932_v1  ;;  %1470 = vrot.lane.b32.xlu1 %v2242_v22, %s1856_s22 }
 0xd14   :  { %v934_v59 = vpop.permute.xlu0 %933 }
 0xd15   :  { %1547 = vst.msk [vmem:[%s2338_s5 + $0x18] sm:$0xff] %vm23_vm0, %v934_v59  ;;  %1472 = vrot.lane.b32.xlu0 %v2244_v24, %s1856_s22 }
 0xd16   :  { %v1196_v0 = vpop.permute.xlu1 %1195 }
 0xd17   :  { %1555 = vst.msk [vmem:[%s2338_s5 + $0x20] sm:$0xff] %vm23_vm0, %v1196_v0 }
 0xd18   :  { %v1198_v8 = vpop.permute.xlu0 %1197 }
 0xd19   :  { %1556 = vst.msk [vmem:[%s2338_s5 + $0x28] sm:$0xff] %vm23_vm0, %v1198_v8 }
 0xd81   :  { %v1460_v2 = vpop.permute.xlu1 %1459 }
 0xd82   :  { %1564 = vst.msk [vmem:[%s2338_s5 + $0x30] sm:$0xff] %vm23_vm0, %v1460_v2  ;;  %1478 = vst.msk [vmem:[#allocation5 + $0x10] sm:$0xff] %vm23_vm0, %v1460_v2 }
 0xd83   :  { %1566 = vst.msk [vmem:[%s2339_s6 + $0x10] sm:$0xff] %vm23_vm0, %v1460_v2  ;;  %v1462_v9 = vpop.permute.xlu0 %1461 }
 0xd84   :  { %1565 = vst.msk [vmem:[%s2338_s5 + $0x38] sm:$0xff] %vm23_vm0, %v1462_v9  ;;  %1479 = vst.msk [vmem:[#allocation5 + $0x18] sm:$0xff] %vm23_vm0, %v1462_v9 }
 0xd85   :  { %1567 = vst.msk [vmem:[%s2339_s6 + $0x18] sm:$0xff] %vm23_vm0, %v1462_v9  ;;  %v1471_v11 = vpop.permute.xlu1 %1470 }
 0xd86   :  { %1476 = vst.msk [vmem:[#allocation5] sm:$0xff] %vm23_vm0, %v1471_v11  ;;  %1483 = vst.msk [vmem:[%s2339_s6] sm:$0xff] %vm23_vm0, %v1471_v11 }
 0xd87   :  { %v1473_v14 = vpop.permute.xlu0 %1472 }
 0xd88   :  { %1477 = vst.msk [vmem:[#allocation5 + $0x8] sm:$0xff] %vm23_vm0, %v1473_v14  ;;  %1484 = vst.msk [vmem:[%s2339_s6 + $0x8] sm:$0xff] %vm23_vm0, %v1473_v14 }

</bundles_post_ra>
